<compile_context>
chip_gen: v7x
topology: tpu7x:2x2x1
jax: 0.10.0
libtpu: 0.0.40
codegen_flags: <defaults>
</compile_context>

<pallas_src>
import functools

import numpy as np

import jax
import jax.numpy as jnp
from jax import lax
from jax.experimental import pallas as pl
from jax.experimental.pallas import tpu as pltpu


LAYERS = [2, 40, 40, 40, 1]


@functools.lru_cache(maxsize=1)
def _num_tensorcores():
    """Best-effort TensorCores-per-chip (v7x has 2; v5e/v6e have 1)."""
    try:
        kind = (getattr(jax.devices()[0], "device_kind", "") or "").lower()
        return 2 if "v7" in kind else 1
    except Exception:
        return 1


def _mlp_kernel(xt_ref, w0_ref, wh_ref, w3_ref, b_ref, o_ref):
    """Fused 4-layer MLP forward for one batch tile (transposed layout).

    xt_ref : (2, TN)       input, features on sublanes, batch on lanes
    w0_ref : (40, 2)       layer-0 weight, torch (out, in) orientation
    wh_ref : (2, 40, 40)   layer-1/2 weights, torch (out, in) orientation
    w3_ref : (40, 1)       layer-3 weight as a column
    b_ref  : (40, 4)       biases b0|b1|b2 in columns 0..2, b3 at [0, 3]
    o_ref  : (1, TN)       lane-dense output row for this tile
    """
    x0 = xt_ref[0:1, :]                      # (1, TN)  input coordinate x
    x1 = xt_ref[1:2, :]                      # (1, TN)  input coordinate y
    w0 = w0_ref[...]                         # (40, 2)

    # Layer 0: contraction depth 2 -> two VPU broadcast-FMAs (MXU stays free).
    h = jnp.tanh(w0[:, 0:1] * x0 + w0[:, 1:2] * x1 + b_ref[:, 0:1])   # (40, TN)

    # Hidden layers on the MXU: h_new[out, n] = sum_in W[out, in] * h[in, n].
    h = jnp.tanh(
        jnp.dot(wh_ref[0], h, preferred_element_type=jnp.float32,
                precision=lax.Precision.HIGHEST) + b_ref[:, 1:2])
    h = jnp.tanh(
        jnp.dot(wh_ref[1], h, preferred_element_type=jnp.float32,
                precision=lax.Precision.HIGHEST) + b_ref[:, 2:3])

    # Output layer (single unit): broadcast multiply + sublane reduce -> (1, TN).
    out = jnp.sum(w3_ref[...] * h, axis=0, keepdims=True) + b_ref[0:1, 3:4]
    o_ref[...] = out.astype(o_ref.dtype)


def prepare_params(params):
    """One-time packing of torch-oriented params (W: (out, in), b: (out,)).

    Call once outside the hot loop; returns device arrays in kernel layout.
    """
    (w0, b0), (w1, b1), (w2, b2), (w3, b3) = params
    f_hidden = int(w1.shape[0])

    w0p = jnp.asarray(w0, jnp.float32)                              # (40, 2)
    wh = jnp.stack([jnp.asarray(w1, jnp.float32),
                    jnp.asarray(w2, jnp.float32)])                  # (2, 40, 40)
    w3c = jnp.asarray(w3, jnp.float32).T                            # (40, 1)
    b_all = jnp.zeros((f_hidden, 4), jnp.float32)
    b_all = b_all.at[:, 0].set(jnp.asarray(b0, jnp.float32))
    b_all = b_all.at[:, 1].set(jnp.asarray(b1, jnp.float32))
    b_all = b_all.at[:, 2].set(jnp.asarray(b2, jnp.float32))
    b_all = b_all.at[0, 3].set(jnp.asarray(b3, jnp.float32)[0])
    return jax.block_until_ready((w0p, wh, w3c, b_all))


@functools.partial(jax.jit, static_argnames=("tile_n",))
def _dnn_forward_jit(x, w0p, wh, w3c, b_all, *, tile_n):
    n, n_feat = x.shape
    num_tc = _num_tensorcores()

    # Only force >= num_tc grid steps on multi-TensorCore chips (v7x).
    # On 1-TC chips (v5e/v6e) one big tile is strictly cheaper.
    if num_tc > 1:
        while tile_n > 128 and pl.cdiv(n, tile_n) < num_tc:
            tile_n -= 128

    num_tiles = pl.cdiv(n, tile_n)
    n_pad = num_tiles * tile_n

    # Single fused transpose + pad (one pass under jit; no extra HBM round trip).
    xt = jnp.pad(x.astype(jnp.float32).T, ((0, 0), (0, n_pad - n)))

    def full(arr):
        nd = arr.ndim
        return pl.BlockSpec(arr.shape, lambda i: (0,) * nd)

    if num_tc > 1 and num_tiles >= num_tc:
        sem = (getattr(pltpu, "CORE_PARALLEL", "parallel"),)
    else:
        sem = ("parallel",)

    out = pl.pallas_call(
        _mlp_kernel,
        out_shape=jax.ShapeDtypeStruct((1, n_pad), jnp.float32),
        grid_spec=pltpu.PrefetchScalarGridSpec(
            num_scalar_prefetch=0,
            grid=(num_tiles,),
            in_specs=[
                pl.BlockSpec((n_feat, tile_n), lambda i: (0, i)),    # x (transposed)
                full(w0p),                                            # W0
                full(wh),                                             # W1, W2
                full(w3c),                                            # W3
                full(b_all),                                          # biases
            ],
            out_specs=pl.BlockSpec((1, tile_n), lambda i: (0, i)),
        ),
        compiler_params=pltpu.CompilerParams(dimension_semantics=sem),
    )(xt, w0p, wh, w3c, b_all)

    # (1, n_pad) -> (N, 1), dropping the padded tail columns.
    return out[0, :n, None]


def dnn_forward(x, packed_params, *, tile_n=1024):
    """Forward pass of the DNN.

    x             : (N, 2) array of collocation points.
    packed_params : output of prepare_params() (pack once, reuse every call).
    """
    assert tile_n % 128 == 0 and tile_n >= 128
    return _dnn_forward_jit(x, *packed_params, tile_n=tile_n)


def init_params(key, layers):
    """Torch-style init: xavier_uniform_ weights, default-uniform biases."""
    params = []
    for i in range(len(layers) - 1):
        fan_in, fan_out = layers[i], layers[i + 1]
        key, kw, kb = jax.random.split(key, 3)
        bound_w = float(np.sqrt(6.0 / (fan_in + fan_out)))
        w = jax.random.uniform(kw, (fan_out, fan_in), jnp.float32, -bound_w, bound_w)
        bound_b = float(1.0 / np.sqrt(fan_in))
        b = jax.random.uniform(kb, (fan_out,), jnp.float32, -bound_b, bound_b)
        params.append((w, b))
    return params


def reference_forward(x, params):
    """Float64 numpy reference (matches the torch .double() module's math)."""
    h = np.asarray(x, np.float64)
    for i, (w, b) in enumerate(params):
        h = h @ np.asarray(w, np.float64).T + np.asarray(b, np.float64)
        if i < len(params) - 1:
            h = np.tanh(h)
    return h


if __name__ == "__main__":
    key = jax.random.PRNGKey(0)
    key, kx = jax.random.split(key)

    # Small batch of 2-D collocation points (x, y) in [-1, 1]^2, deliberately
    # not a multiple of the tile size so the padded-tail path is exercised.
    N = 300
    x = jax.random.uniform(kx, (N, LAYERS[0]), jnp.float32, -1.0, 1.0)

    raw_params = init_params(key, LAYERS)
    packed = prepare_params(raw_params)      # one-time packing, off the hot path

    out = dnn_forward(x, packed)             # default tile_n=1024 -> 1 grid step
    out = jax.block_until_ready(out)

    ref = reference_forward(np.asarray(x), raw_params)
    assert out.shape == (N, 1), out.shape
    assert np.allclose(np.asarray(out), ref, atol=5e-4, rtol=5e-4), \
        "mismatch vs float64 reference"

    print("KERNEL_OK")
</pallas_src>

<mosaic_0001>
module attributes {stable_mosaic.version = 11 : i64} {
  func.func @_mlp_kernel(%arg0: i32, %arg1: memref<2x1024xf32, #tpu.memory_space<vmem>>, %arg2: memref<40x2xf32, #tpu.memory_space<vmem>>, %arg3: memref<2x40x40xf32, #tpu.memory_space<vmem>>, %arg4: memref<40x1xf32, #tpu.memory_space<vmem>>, %arg5: memref<40x4xf32, #tpu.memory_space<vmem>>, %arg6: memref<1x1024xf32, #tpu.memory_space<vmem>>) attributes {dimension_semantics = [#tpu.dimension_semantics<parallel>], iteration_bounds = array<i64: 1>, scalar_prefetch = 0 : i64, scratch_operands = 0 : i64, tpu.core_type = #tpu.core_type<tc>, window_params = [{transform_indices = @transform_0, window_bounds = array<i64: 2, 1024>}, {pipeline_mode = #tpu.pipeline_mode<synchronous>, transform_indices = @transform_1, window_bounds = array<i64: 40, 2>}, {pipeline_mode = #tpu.pipeline_mode<synchronous>, transform_indices = @transform_2, window_bounds = array<i64: 2, 40, 40>}, {pipeline_mode = #tpu.pipeline_mode<synchronous>, transform_indices = @transform_3, window_bounds = array<i64: 40, 1>}, {pipeline_mode = #tpu.pipeline_mode<synchronous>, transform_indices = @transform_4, window_bounds = array<i64: 40, 4>}, {transform_indices = @transform_5, window_bounds = array<i64: 1, 1024>}]} {
    %c0 = arith.constant 0 : index
    %c0_0 = arith.constant 0 : index
    %0 = vector.load %arg1[%c0, %c0_0] : memref<2x1024xf32, #tpu.memory_space<vmem>>, vector<1x1024xf32>
    %c1 = arith.constant 1 : index
    %c0_1 = arith.constant 0 : index
    %1 = vector.load %arg1[%c1, %c0_1] : memref<2x1024xf32, #tpu.memory_space<vmem>>, vector<1x1024xf32>
    %c0_2 = arith.constant 0 : index
    %c0_3 = arith.constant 0 : index
    %2 = vector.load %arg2[%c0_2, %c0_3] : memref<40x2xf32, #tpu.memory_space<vmem>>, vector<40x2xf32>
    %3 = vector.extract_strided_slice %2 {offsets = [0, 0], sizes = [40, 1], strides = [1, 1]} : vector<40x2xf32> to vector<40x1xf32>
    %4 = vector.broadcast %3 : vector<40x1xf32> to vector<40x1024xf32>
    %5 = vector.broadcast %0 : vector<1x1024xf32> to vector<40x1024xf32>
    %6 = arith.mulf %4, %5 : vector<40x1024xf32>
    %7 = vector.extract_strided_slice %2 {offsets = [0, 1], sizes = [40, 1], strides = [1, 1]} : vector<40x2xf32> to vector<40x1xf32>
    %8 = vector.broadcast %7 : vector<40x1xf32> to vector<40x1024xf32>
    %9 = vector.broadcast %1 : vector<1x1024xf32> to vector<40x1024xf32>
    %10 = arith.mulf %8, %9 : vector<40x1024xf32>
    %11 = arith.addf %6, %10 : vector<40x1024xf32>
    %c0_4 = arith.constant 0 : index
    %c0_5 = arith.constant 0 : index
    %12 = vector.load %arg5[%c0_4, %c0_5] : memref<40x4xf32, #tpu.memory_space<vmem>>, vector<40x1xf32>
    %13 = vector.broadcast %12 : vector<40x1xf32> to vector<40x1024xf32>
    %14 = arith.addf %11, %13 : vector<40x1024xf32>
    %15 = math.tanh %14 : vector<40x1024xf32>
    %c0_6 = arith.constant 0 : index
    %c0_7 = arith.constant 0 : index
    %c0_8 = arith.constant 0 : index
    %16 = vector.load %arg3[%c0_6, %c0_7, %c0_8] : memref<2x40x40xf32, #tpu.memory_space<vmem>>, vector<1x40x40xf32>
    %17 = vector.shape_cast %16 : vector<1x40x40xf32> to vector<40x40xf32>
    %cst = arith.constant dense<0.000000e+00> : vector<40x1024xf32>
    %18 = tpu.matmul %17, %15, %cst {dimension_numbers = #tpu.dot_dimension_numbers<[1], [0], [0], [1], [0, 0, 1, 1], [], []>, precision = #tpu.contract_precision<fp32>} : vector<40x40xf32>, vector<40x1024xf32>, vector<40x1024xf32> -> vector<40x1024xf32>
    %c0_9 = arith.constant 0 : index
    %c1_10 = arith.constant 1 : index
    %19 = vector.load %arg5[%c0_9, %c1_10] : memref<40x4xf32, #tpu.memory_space<vmem>>, vector<40x1xf32>
    %20 = vector.broadcast %19 : vector<40x1xf32> to vector<40x1024xf32>
    %21 = arith.addf %18, %20 : vector<40x1024xf32>
    %22 = math.tanh %21 : vector<40x1024xf32>
    %c1_11 = arith.constant 1 : index
    %c0_12 = arith.constant 0 : index
    %c0_13 = arith.constant 0 : index
    %23 = vector.load %arg3[%c1_11, %c0_12, %c0_13] : memref<2x40x40xf32, #tpu.memory_space<vmem>>, vector<1x40x40xf32>
    %24 = vector.shape_cast %23 : vector<1x40x40xf32> to vector<40x40xf32>
    %cst_14 = arith.constant dense<0.000000e+00> : vector<40x1024xf32>
    %25 = tpu.matmul %24, %22, %cst_14 {dimension_numbers = #tpu.dot_dimension_numbers<[1], [0], [0], [1], [0, 0, 1, 1], [], []>, precision = #tpu.contract_precision<fp32>} : vector<40x40xf32>, vector<40x1024xf32>, vector<40x1024xf32> -> vector<40x1024xf32>
    %c0_15 = arith.constant 0 : index
    %c2 = arith.constant 2 : index
    %26 = vector.load %arg5[%c0_15, %c2] : memref<40x4xf32, #tpu.memory_space<vmem>>, vector<40x1xf32>
    %27 = vector.broadcast %26 : vector<40x1xf32> to vector<40x1024xf32>
    %28 = arith.addf %25, %27 : vector<40x1024xf32>
    %29 = math.tanh %28 : vector<40x1024xf32>
    %c0_16 = arith.constant 0 : index
    %c0_17 = arith.constant 0 : index
    %30 = vector.load %arg4[%c0_16, %c0_17] : memref<40x1xf32, #tpu.memory_space<vmem>>, vector<40x1xf32>
    %31 = vector.broadcast %30 : vector<40x1xf32> to vector<40x1024xf32>
    %32 = arith.mulf %31, %29 : vector<40x1024xf32>
    %cst_18 = arith.constant dense<0.000000e+00> : vector<1024xf32>
    %33 = vector.multi_reduction <add>, %32, %cst_18 [0] : vector<40x1024xf32> to vector<1024xf32>
    %34 = vector.shape_cast %33 : vector<1024xf32> to vector<1x1024xf32>
    %c0_19 = arith.constant 0 : index
    %c3 = arith.constant 3 : index
    %35 = vector.load %arg5[%c0_19, %c3] : memref<40x4xf32, #tpu.memory_space<vmem>>, vector<1x1xf32>
    %36 = vector.broadcast %35 : vector<1x1xf32> to vector<1x1024xf32>
    %37 = arith.addf %34, %36 : vector<1x1024xf32>
    %c0_20 = arith.constant 0 : index
    %c0_21 = arith.constant 0 : index
    %38 = vector.load %arg6[%c0_20, %c0_21] : memref<1x1024xf32, #tpu.memory_space<vmem>>, vector<1x1024xf32>
    tpu.vector_store %arg6[%c0_20, %c0_21], %37 {strides = array<i32>} : memref<1x1024xf32, #tpu.memory_space<vmem>>, vector<1x1024xf32>,
    return
  }
  func.func @transform_0(%arg0: i32) -> (i32, i32) {
    %c0_i32 = arith.constant 0 : i32
    %c0_i32_0 = arith.constant 0 : i32
    return %c0_i32, %arg0 : i32, i32
  }
  func.func @transform_1(%arg0: i32) -> (i32, i32) {
    %c0_i32 = arith.constant 0 : i32
    %c0_i32_0 = arith.constant 0 : i32
    %c0_i32_1 = arith.constant 0 : i32
    return %c0_i32, %c0_i32_0 : i32, i32
  }
  func.func @transform_2(%arg0: i32) -> (i32, i32, i32) {
    %c0_i32 = arith.constant 0 : i32
    %c0_i32_0 = arith.constant 0 : i32
    %c0_i32_1 = arith.constant 0 : i32
    %c0_i32_2 = arith.constant 0 : i32
    return %c0_i32, %c0_i32_0, %c0_i32_1 : i32, i32, i32
  }
  func.func @transform_3(%arg0: i32) -> (i32, i32) {
    %c0_i32 = arith.constant 0 : i32
    %c0_i32_0 = arith.constant 0 : i32
    %c0_i32_1 = arith.constant 0 : i32
    return %c0_i32, %c0_i32_0 : i32, i32
  }
  func.func @transform_4(%arg0: i32) -> (i32, i32) {
    %c0_i32 = arith.constant 0 : i32
    %c0_i32_0 = arith.constant 0 : i32
    %c0_i32_1 = arith.constant 0 : i32
    return %c0_i32, %c0_i32_0 : i32, i32
  }
  func.func @transform_5(%arg0: i32) -> (i32, i32) {
    %c0_i32 = arith.constant 0 : i32
    %c0_i32_0 = arith.constant 0 : i32
    return %c0_i32, %arg0 : i32, i32
  }
}

</mosaic_0001>

<bundles_post_ra>
// kernel: _dnn_forward_jit.1
= control target key start
LH: loop header
LB: loop body
LE: loop exit
PB: predicated region body
PF: predicated region fallthrough
CT: control target
= control target key end

     0   :  { %v8029_v0 = vmov 1   ;;  %v10474_v4 = vmov 0   ;;  %v10476_v12 = vmov 0.0   ;;  %vm410_vm0 = vcmask 326656   ;;  %s10468_s1 = inlined_call_operand.vmem [shape: f32[40,2], index: 1, kind: input, shape index: {}]   ;;  %s10469_s4 = inlined_call_operand.vmem [shape: f32[40,4], index: 4, kind: input, shape index: {}]   ;;  %s10470_s2 = inlined_call_operand.vmem [shape: f32[2,40,40], index: 2, kind: input, shape index: {}]   ;;  %s10471_s0 = inlined_call_operand.vmem [shape: f32[2,1024], index: 0, kind: input, shape index: {}]   ;;  %s10472_s3 = inlined_call_operand.vmem [shape: f32[40,1], index: 3, kind: input, shape index: {}]   ;;  %s10473_s5 = inlined_call_operand.vmem [shape: f32[1,1024], index: 5, kind: output, shape index: {}]  }
   0x1   :  { %7772 = vset.pattern.permute.xlu0 %v8029_v0  ;;  %7770 = vset.pattern.permute.xlu1 %v8029_v0  ;;  %v25_v1 = vld [vmem:[%s10468_s1 + $0x10] sm:$0xff]  ;;  %v23_v2 = vld [vmem:[%s10468_s1] sm:$0xff]  ;;  %v24_v3 = vld [vmem:[%s10468_s1 + $0x8] sm:$0xff]  ;;  %v54_v19 = vlaneseq }
   0x2   :  { %143 = vperm.xlu0 %7772, %v25_v1   ;;  %135 = vperm.xlu1 %7770, %v23_v2   ;;  %v26_v5 = vld [vmem:[%s10468_s1 + $0x18] sm:$0xff]  ;;  %v276_v6 = vld [vmem:[%s10469_s4 + $0x8] sm:$0xff]  ;;  %v275_v7 = vld [vmem:[%s10469_s4] sm:$0xff] }
   0x3   :  { %v27_v8 = vld [vmem:[%s10468_s1 + $0x20] sm:$0xff]  ;;  %v277_v9 = vld [vmem:[%s10469_s4 + $0x10] sm:$0xff]  ;;  %v278_v11 = vld [vmem:[%s10469_s4 + $0x18] sm:$0xff]  ;;  %500 = vmatprep.mubr.f32.mxu0 %v10476_v12  ;;  %1265 = vmatprep.mubr.f32.mxu1 %v10476_v12  ;;  %v8121_v24 = vshrl.u32 %v54_v19, 7 }
   0x4   :  { %v279_v10 = vld [vmem:[%s10469_s4 + $0x20] sm:$0xff]  ;;  %v386_v14 = vld [vmem:[%s10470_s2 + $0x8] sm:$0xff]  ;;  %v387_v15 = vld [vmem:[%s10470_s2 + $0x10] sm:$0xff] }
   0x5   :  { %v385_v13 = vld [vmem:[%s10470_s2] sm:$0xff]  ;;  %v415_v17 = vsel %vm410_vm0, %v386_v14, 0  ;;  %v418_v18 = vsel %vm410_vm0, %v387_v15, 0  ;;  %v388_v23 = vld [vmem:[%s10470_s2 + $0x18] sm:$0xff]  ;;  %10667 = vst [vmem:[#allocation5_spill] sm:$0xff] %v8121_v24  ;;  %v56_v30 = vsub.s32 0, %v8121_v24 }
   0x6   :  { %7773 = vset.pattern.permute.xlu0 %v10474_v4  ;;  %139 = vperm.xlu1 %7770, %v24_v3   ;;  %v412_v16 = vsel %vm410_vm0, %v385_v13, 0  ;;  %v8114_v21 = vand.u32 4294901760, %v415_v17  ;;  %v8116_v22 = vand.u32 4294901760, %v418_v18  ;;  %v421_v25 = vsel %vm410_vm0, %v388_v23, 0  ;;  %v389_v29 = vld [vmem:[%s10470_s2 + $0x20] sm:$0xff] }
   0x7   :  { %30 = vperm.xlu0 %7773, %v23_v2   ;;  %v8112_v20 = vand.u32 4294901760, %v412_v16  ;;  %v8137_v31 = vand.u32 4294901760, %v421_v25  ;;  %v60_v32 = vsub.s32 1, %v8121_v24  ;;  %v64_v33 = vsub.s32 2, %v8121_v24  ;;  %v6894_v37 = vld [vmem:[%s10471_s0 + $0x1] ss:$2 sm:$0xff] }
   0x8   :  { %10665 = vst [vmem:[#allocation3_spill] sm:$0xff] %v8114_v21  ;;  %10666 = vst [vmem:[#allocation4_spill] sm:$0xff] %v8116_v22  ;;  %v8128_v27 = vsub.f32 %v415_v17, %v8114_v21  ;;  %v8131_v28 = vsub.f32 %v418_v18, %v8116_v22  ;;  %v68_v34 = vsub.s32 3, %v8121_v24  ;;  %v424_v35 = vsel %vm410_vm0, %v389_v29, 0  ;;  %v20_v44 = vld [vmem:[%s10471_s0] ss:$2 sm:$0xff] }
   0x9   :  { %10664 = vst [vmem:[#allocation2_spill] sm:$0xff] %v8112_v20  ;;  %v8125_v26 = vsub.f32 %v412_v16, %v8112_v20  ;;  %10671 = vst [vmem:[#allocation9_spill] sm:$0xff] %v8137_v31  ;;  %v72_v36 = vsub.s32 4, %v8121_v24  ;;  %v76_v41 = vsub.s32 5, %v8121_v24  ;;  %v80_v42 = vsub.s32 6, %v8121_v24 }
   0xa   :  { %7771 = vset.pattern.permute.xlu1 %v10474_v4  ;;  %10669 = vst [vmem:[#allocation7_spill] sm:$0xff] %v8128_v27  ;;  %10670 = vst [vmem:[#allocation8_spill] sm:$0xff] %v8131_v28  ;;  %v8151_v39 = vand.u32 4294901760, %v8128_v27  ;;  %v8154_v40 = vand.u32 4294901760, %v8131_v28  ;;  %v84_v43 = vsub.s32 7, %v8121_v24  ;;  %v8163_v45 = vsub.f32 %v421_v25, %v8137_v31 }
   0xb   :  { %35 = vperm.xlu0 %7773, %v24_v3   ;;  %45 = vperm.xlu1 %7771, %v26_v5   ;;  %10668 = vst [vmem:[#allocation6_spill] sm:$0xff] %v8125_v26  ;;  %v8148_v38 = vand.u32 4294901760, %v8125_v26  ;;  %v8165_v46 = vand.u32 4294901760, %v424_v35  ;;  %v8167_v47 = vrot.slane %v6894_v37, %v56_v30  ;;  %v8169_v48 = vrot.slane %v6894_v37, %v60_v32 }
   0xc   :  { %10673 = vst [vmem:[#allocation11_spill] sm:$0xff] %v8151_v39  ;;  %10674 = vst [vmem:[#allocation12_spill] sm:$0xff] %v8154_v40  ;;  %v8171_v49 = vrot.slane %v6894_v37, %v64_v33  ;;  %v8173_v50 = vrot.slane %v6894_v37, %v68_v34  ;;  %v8175_v51 = vrot.slane %v6894_v37, %v72_v36  ;;  %v8196_v61 = vand.u32 4294901760, %v8163_v45 }
   0xd   :  { %10672 = vst [vmem:[#allocation10_spill] sm:$0xff] %v8148_v38  ;;  %10675 = vst [vmem:[#allocation13_spill] sm:$0xff] %v8163_v45  ;;  %v504_v52 = vsub.f32 %v8125_v26, %v8148_v38  ;;  %v515_v53 = vsub.f32 %v8128_v27, %v8151_v39  ;;  %v526_v54 = vsub.f32 %v8131_v28, %v8154_v40 }
   0xe   :  { %10676 = vst [vmem:[#allocation14_spill] sm:$0xff] %v8165_v46  ;;  %10677 = vst [vmem:[#allocation15_spill] sm:$0xff] %v8175_v51  ;;  %v8183_v55 = vrot.slane %v6894_v37, %v76_v41  ;;  %v8185_v56 = vrot.slane %v6894_v37, %v80_v42  ;;  %v8187_v57 = vrot.slane %v6894_v37, %v84_v43 }
   0xf   :  { %40 = vperm.xlu0 %7773, %v25_v1   ;;  %7774 = vset.pattern.permute.xlu1 %v8029_v0  ;;  %v8189_v58 = vrot.slane %v20_v44, %v56_v30  ;;  %v8191_v59 = vrot.slane %v20_v44, %v60_v32  ;;  %v8193_v60 = vrot.slane %v20_v44, %v64_v33 }
  0x10   :  { %147 = vperm.xlu1 %7774, %v26_v5   ;;  %10678 = vst [vmem:[#allocation16_spill] sm:$0xff] %v8183_v55  ;;  %10679 = vst [vmem:[#allocation17_spill] sm:$0xff] %v8185_v56  ;;  %v8199_v62 = vsub.f32 %v424_v35, %v8165_v46  ;;  %v8201_v1 = vrot.slane %v20_v44, %v68_v34  ;;  %v8203_v2 = vrot.slane %v20_v44, %v72_v36 }
  0x11   :  { %10680 = vst [vmem:[#allocation18_spill] sm:$0xff] %v8187_v57  ;;  %10681 = vst [vmem:[#allocation19_spill] sm:$0xff] %v8196_v61  ;;  %v8205_v3 = vrot.slane %v20_v44, %v76_v41  ;;  %v8207_v5 = vrot.slane %v20_v44, %v80_v42 }
  0x12   :  { %10682 = vst [vmem:[#allocation20_spill] sm:$0xff] %v8199_v62  ;;  %v8234_v18 = vand.u32 4294901760, %v8199_v62 }
  0x13   :  { %287 = vperm.xlu0 %7773, %v276_v6  }
  0x14   :  { %7775 = vset.pattern.permute.xlu1 %v10474_v4  ;;  %10688 = vst [vmem:[#allocation26_spill] sm:$0xff] %v8234_v18 }
  0x15   :  { %282 = vperm.xlu1 %7775, %v275_v7  }
  0x17   :  { %50 = vperm.xlu0 %7773, %v27_v8  }
  0x19   :  { %292 = vperm.xlu1 %7775, %v277_v9  }
  0x1b   :  { %302 = vperm.xlu0 %7773, %v279_v10  }
  0x1d   :  { %297 = vperm.xlu1 %7775, %v278_v11  }
  0x1f   :  { %7777 = vset.pattern.permute.xlu0 %v8029_v0 }
  0x20   :  { %395 = vperm.xlu0 %7777, %v276_v6   ;;  %v8209_v6 = vrot.slane %v20_v44, %v84_v43 }
  0x21   :  { %7776 = vset.pattern.permute.xlu1 %v8029_v0 }
  0x22   :  { %151 = vperm.xlu1 %7776, %v27_v8   ;;  %v8213_v8 = vand.u32 4294901760, %v515_v53 }
  0x24   :  { %407 = vperm.xlu0 %7777, %v279_v10   ;;  %10684 = vst [vmem:[#allocation22_spill] sm:$0xff] %v8213_v8 }
  0x26   :  { %391 = vperm.xlu1 %7776, %v275_v7   ;;  %v8211_v7 = vand.u32 4294901760, %v504_v52 }
  0x28   :  { %10683 = vst [vmem:[#allocation21_spill] sm:$0xff] %v8211_v7 }
  0x2a   :  { %399 = vperm.xlu1 %7776, %v277_v9   ;;  %v8215_v9 = vand.u32 4294901760, %v526_v54 }
  0x2c   :  { %10685 = vst [vmem:[#allocation23_spill] sm:$0xff] %v8215_v9 }
  0x2e   :  { %403 = vperm.xlu1 %7776, %v278_v11  }
  0x81   :  { %v136_v63 = vpop.permute.xlu1 %135  ;;  %v144_v0 = vpop.permute.xlu0 %143 }
  0x82   :  { %v8218_v10 = vmul.f32 %v8175_v51, %v136_v63  ;;  %v8221_v11 = vmul.f32 %v8183_v55, %v136_v63  ;;  %v8224_v13 = vmul.f32 %v8185_v56, %v136_v63  ;;  %v8227_v14 = vmul.f32 %v8187_v57, %v136_v63 }
  0x83   :  { %v195_v15 = vmul.f32 %v8167_v47, %v136_v63  ;;  %v196_v16 = vmul.f32 %v8169_v48, %v136_v63  ;;  %v8237_v19 = vmul.f32 %v8175_v51, %v144_v0  ;;  %v8240_v23 = vmul.f32 %v8183_v55, %v144_v0 }
  0x84   :  { %10686 = vst [vmem:[#allocation24_spill] sm:$0xff] %v8221_v11  ;;  %10687 = vst [vmem:[#allocation25_spill] sm:$0xff] %v8227_v14  ;;  %v8243_v25 = vmul.f32 %v8185_v56, %v144_v0  ;;  %v8246_v29 = vmul.f32 %v8187_v57, %v144_v0  ;;  %v197_v32 = vmul.f32 %v8171_v49, %v136_v63 }
  0x85   :  { %10689 = vst [vmem:[#allocation27_spill] sm:$0xff] %v8240_v23  ;;  %v140_v30 = vpop.permute.xlu1 %139  ;;  %v198_v33 = vmul.f32 %v8173_v50, %v136_v63  ;;  %v8251_v34 = vmul.f32 %v8167_v47, %v144_v0  ;;  %v8254_v35 = vmul.f32 %v8169_v48, %v144_v0  ;;  %v8277_v24 = vmul.f32 %v8171_v49, %v144_v0 }
  0x86   :  { %10690 = vst [vmem:[#allocation28_spill] sm:$0xff] %v8246_v29  ;;  %v31_v36 = vpop.permute.xlu0 %30  ;;  %v207_v37 = vmul.f32 %v8175_v51, %v140_v30  ;;  %v8258_v41 = vmul.f32 %v8183_v55, %v140_v30  ;;  %v209_v42 = vmul.f32 %v8185_v56, %v140_v30  ;;  %v8262_v43 = vmul.f32 %v8187_v57, %v140_v30 }
  0x87   :  { %v94_v44 = vmul.f32 %v8189_v58, %v31_v36  ;;  %v95_v52 = vmul.f32 %v8191_v59, %v31_v36  ;;  %v96_v53 = vmul.f32 %v8193_v60, %v31_v36  ;;  %v97_v54 = vmul.f32 %v8201_v1, %v31_v36 }
  0x88   :  { %10691 = vst [vmem:[#allocation29_spill] sm:$0xff] %v8258_v41  ;;  %10692 = vst [vmem:[#allocation30_spill] sm:$0xff] %v8262_v43  ;;  %v98_v63 = vmul.f32 %v8203_v2, %v31_v36  ;;  %v8270_v4 = vmul.f32 %v8205_v3, %v31_v36  ;;  %v100_v17 = vmul.f32 %v8207_v5, %v31_v36 }
  0x89   :  { %v8274_v12 = vmul.f32 %v8209_v6, %v31_v36  ;;  %v8280_v40 = vmul.f32 %v8173_v50, %v144_v0  ;;  %v8283_v39 = vmul.f32 %v8167_v47, %v140_v30  ;;  %v204_v38 = vmul.f32 %v8169_v48, %v140_v30 }
  0x8a   :  { %10693 = vst [vmem:[#allocation31_spill] sm:$0xff] %v8270_v4  ;;  %v36_v28 = vpop.permute.xlu0 %35  ;;  %v46_v27 = vpop.permute.xlu1 %45  ;;  %v8287_v26 = vmul.f32 %v8171_v49, %v140_v30  ;;  %v206_v46 = vmul.f32 %v8173_v50, %v140_v30  ;;  %v236_v36 = vadd.f32 %v196_v16, %v95_v52  ;;  %v8290_v31 = vadd.f32 %v198_v33, %v97_v54 }
  0x8b   :  { %10694 = vst [vmem:[#allocation32_spill] sm:$0xff] %v8274_v12  ;;  %v106_v22 = vmul.f32 %v8203_v2, %v36_v28  ;;  %v8294_v0 = vmul.f32 %v8205_v3, %v36_v28  ;;  %v108_v21 = vmul.f32 %v8207_v5, %v36_v28  ;;  %v8298_v20 = vmul.f32 %v8209_v6, %v36_v28 }
  0x8c   :  { %v8301_v29 = vmul.f32 %v8189_v58, %v36_v28  ;;  %v103_v23 = vmul.f32 %v8191_v59, %v36_v28  ;;  %v8304_v62 = vadd.f32 %v195_v15, %v94_v44  ;;  %v8306_v16 = vadd.f32 %v197_v32, %v96_v53 }
  0x8d   :  { %10695 = vst [vmem:[#allocation33_spill] sm:$0xff] %v8294_v0  ;;  %10696 = vst [vmem:[#allocation34_spill] sm:$0xff] %v8298_v20  ;;  %v122_v30 = vmul.f32 %v8203_v2, %v46_v27  ;;  %v8310_v33 = vmul.f32 %v8205_v3, %v46_v27  ;;  %v124_v52 = vmul.f32 %v8207_v5, %v46_v27 }
  0x8e   :  { %v8314_v54 = vmul.f32 %v8209_v6, %v46_v27  ;;  %v41_v18 = vpop.permute.xlu0 %40  ;;  %v8317_v61 = vmul.f32 %v8193_v60, %v36_v28  ;;  %v105_v45 = vmul.f32 %v8201_v1, %v36_v28  ;;  %v8321_v15 = vmul.f32 %v8189_v58, %v46_v27 }
  0x8f   :  { %10697 = vst [vmem:[#allocation35_spill] sm:$0xff] %v8310_v33  ;;  %v8324_v32 = vmul.f32 %v8191_v59, %v46_v27  ;;  %v148_v44 = vpop.permute.xlu1 %147  ;;  %v114_v53 = vmul.f32 %v8203_v2, %v41_v18  ;;  %v8328_v33 = vmul.f32 %v8205_v3, %v41_v18  ;;  %v8332_v9 = vmul.f32 %v8209_v6, %v41_v18 }
  0x90   :  { %10698 = vst [vmem:[#allocation36_spill] sm:$0xff] %v8314_v54  ;;  %v116_v54 = vmul.f32 %v8207_v5, %v41_v18  ;;  %v8335_v8 = vmul.f32 %v8193_v60, %v46_v27  ;;  %v8338_v28 = vmul.f32 %v8201_v1, %v46_v27  ;;  %v8341_v7 = vmul.f32 %v8189_v58, %v41_v18 }
  0x91   :  { %10699 = vst [vmem:[#allocation37_spill] sm:$0xff] %v8328_v33  ;;  %10700 = vst [vmem:[#allocation38_spill] sm:$0xff] %v8332_v9  ;;  %v111_v43 = vmul.f32 %v8191_v59, %v41_v18  ;;  %v223_v20 = vmul.f32 %v8175_v51, %v148_v44  ;;  %v8346_v33 = vmul.f32 %v8183_v55, %v148_v44 }
  0x92   :  { %10701 = vst [vmem:[#allocation39_spill] sm:$0xff] %v8335_v8  ;;  %v225_v14 = vmul.f32 %v8185_v56, %v148_v44  ;;  %v8350_v9 = vmul.f32 %v8187_v57, %v148_v44  ;;  %v8352_v12 = vpop.permute.xlu0 %287  ;;  %v247_v41 = vadd.f32 %v207_v37, %v106_v22  ;;  %v249_v27 = vadd.f32 %v209_v42, %v108_v21 }
  0x93   :  { %10702 = vst [vmem:[#allocation40_spill] sm:$0xff] %v8346_v33  ;;  %v239_v0 = vadd.f32 %v8218_v10, %v98_v63  ;;  %v241_v11 = vadd.f32 %v8224_v13, %v100_v17  ;;  %v255_v51 = vadd.f32 %v8237_v19, %v114_v53  ;;  %v257_v55 = vadd.f32 %v8243_v25, %v116_v54 }
  0x94   :  { %10703 = vst [vmem:[#allocation41_spill] sm:$0xff] %v8350_v9  ;;  %v8356_v4 = vpop.permute.xlu1 %282  ;;  %v263_v33 = vadd.f32 %v223_v20, %v122_v30  ;;  %v265_v8 = vadd.f32 %v225_v14, %v124_v52  ;;  %v317_v56 = vadd.f32 %v8352_v12, %v247_v41  ;;  %v319_v9 = vadd.f32 %v8352_v12, %v249_v27 }
  0x95   :  { %v309_v57 = vadd.f32 %v8356_v4, %v239_v0  ;;  %v311_v21 = vadd.f32 %v8356_v4, %v241_v11  ;;  %v112_v22 = vmul.f32 %v8193_v60, %v41_v18  ;;  %v113_v10 = vmul.f32 %v8201_v1, %v41_v18 }
  0x96   :  { %v219_v13 = vmul.f32 %v8167_v47, %v148_v44  ;;  %v220_v17 = vmul.f32 %v8169_v48, %v148_v44  ;;  %v51_v19 = vpop.permute.xlu0 %50  ;;  %v221_v20 = vmul.f32 %v8171_v49, %v148_v44  ;;  %v222_v14 = vmul.f32 %v8173_v50, %v148_v44  ;;  %v10706_v44 = vld [vmem:[#allocation15_spill] sm:$0xff] }
  0x97   :  { %v244_v25 = vadd.f32 %v204_v38, %v103_v23  ;;  %v306_v37 = vadd.f32 %v8356_v4, %v236_v36  ;;  %7784 = vtanh.f32 %v317_v56  ;;  %v8372_v41 = vmul.f32 %v8203_v2, %v51_v19 }
  0x98   :  { %v8375_v11 = vmul.f32 %v8205_v3, %v51_v19  ;;  %v8377_v18 = vpop.permute.xlu1 %292  ;;  %v246_v42 = vadd.f32 %v206_v46, %v105_v45  ;;  %7786 = vtanh.f32 %v319_v9  ;;  %v8380_v63 = vmul.f32 %v8207_v5, %v51_v19 }
  0x99   :  { %v8383_v0 = vmul.f32 %v8209_v6, %v51_v19  ;;  %v325_v38 = vadd.f32 %v8377_v18, %v255_v51  ;;  %7788 = vtanh.f32 %v309_v57  ;;  %v327_v56 = vadd.f32 %v8377_v18, %v257_v55  ;;  %v10705_v54 = vld [vmem:[#allocation39_spill] sm:$0xff] }
  0x9a   :  { %10704 = vst [vmem:[#allocation42_spill] sm:$0xff] %v8380_v63  ;;  %v314_v2 = vadd.f32 %v8352_v12, %v244_v25  ;;  %v308_v3 = vadd.f32 %v8356_v4, %v8290_v31  ;;  %7790 = vtanh.f32 %v311_v21  ;;  %v126_v45 = vmul.f32 %v8189_v58, %v51_v19  ;;  %v10712_v25 = vld [vmem:[#allocation24_spill] sm:$0xff] }
  0x9b   :  { %v127_v46 = vmul.f32 %v8191_v59, %v51_v19  ;;  %v8393_v5 = vmul.f32 %v8193_v60, %v51_v19  ;;  %v129_v6 = vmul.f32 %v8201_v1, %v51_v19  ;;  %7792 = vtanh.f32 %v325_v38  ;;  %v10714_v38 = vld [vmem:[#allocation29_spill] sm:$0xff] }
  0x9c   :  { %v8396_v51 = vpop.permute.xlu1 %297  ;;  %v316_v55 = vadd.f32 %v8352_v12, %v246_v42  ;;  %v243_v57 = vadd.f32 %v8283_v39, %v8301_v29  ;;  %7794 = vtanh.f32 %v306_v37  ;;  %v245_v58 = vadd.f32 %v8287_v26, %v8317_v61  ;;  %v10713_v42 = vld [vmem:[#allocation33_spill] sm:$0xff] }
  0x9d   :  { %v333_v31 = vadd.f32 %v8396_v51, %v263_v33  ;;  %v8403_v9 = vadd.f32 %v8396_v51, %v265_v8  ;;  %7796 = vtanh.f32 %v314_v2  ;;  %v305_v59 = vadd.f32 %v8356_v4, %v8304_v62 }
  0x9e   :  { %v252_v60 = vadd.f32 %v8254_v35, %v111_v43  ;;  %v260_v1 = vadd.f32 %v220_v17, %v8324_v32  ;;  %7798 = vtanh.f32 %v327_v56  ;;  %v313_v39 = vadd.f32 %v8352_v12, %v243_v57 }
  0x9f   :  { %v307_v23 = vadd.f32 %v8356_v4, %v8306_v16  ;;  %v315_v8 = vadd.f32 %v8352_v12, %v245_v58  ;;  %7800 = vtanh.f32 %v333_v31  ;;  %v254_v61 = vadd.f32 %v8280_v40, %v113_v10 }
  0xa0   :  { %v322_v29 = vadd.f32 %v8377_v18, %v252_v60  ;;  %v330_v26 = vadd.f32 %v8396_v51, %v260_v1  ;;  %7802 = vtanh.f32 %v308_v3  ;;  %v262_v35 = vadd.f32 %v222_v14, %v8338_v28  ;;  %v10707_v28 = vld [vmem:[#allocation16_spill] sm:$0xff] }
  0xa1   :  { %v152_v62 = vpop.permute.xlu1 %151  ;;  %v251_v43 = vadd.f32 %v8251_v34, %v8341_v7  ;;  %v259_v36 = vadd.f32 %v219_v13, %v8321_v15  ;;  %v8422_v30 = vpop.eup %7784  ;;  %v253_v52 = vadd.f32 %v8277_v24, %v112_v22  ;;  %v261_v32 = vadd.f32 %v221_v20, %v10705_v54  ;;  %v10708_v7 = vld [vmem:[#allocation17_spill] sm:$0xff]  ;;  %v10710_v15 = vld [vmem:[#allocation18_spill] sm:$0xff] }
  0xa2   :  { %v228_v16 = vmul.f32 %v8169_v48, %v152_v62  ;;  %v230_v33 = vmul.f32 %v8173_v50, %v152_v62  ;;  %v8428_v40 = vpop.eup %7786  ;;  %v8431_v53 = vmul.f32 %v10706_v44, %v152_v62  ;;  %v8434_v27 = vmul.f32 %v10707_v28, %v152_v62 }
  0xa3   :  { %v8437_v34 = vmul.f32 %v10708_v7, %v152_v62  ;;  %v8440_v21 = vmul.f32 %v10710_v15, %v152_v62  ;;  %v8442_v48 = vpop.eup %7788  ;;  %v227_v24 = vmul.f32 %v8167_v47, %v152_v62  ;;  %7804 = vtanh.f32 %v316_v55  ;;  %v10711_v47 = vld [vmem:[#allocation31_spill] sm:$0xff] }
  0xa4   :  { %v324_v50 = vadd.f32 %v8377_v18, %v254_v61  ;;  %v332_v22 = vadd.f32 %v8396_v51, %v262_v35  ;;  %v8447_v10 = vpop.eup %7790  ;;  %v229_v13 = vmul.f32 %v8171_v49, %v152_v62  ;;  %7806 = vtanh.f32 %v305_v59  ;;  %v10715_v61 = vld [vmem:[#allocation32_spill] sm:$0xff] }
  0xa5   :  { %10709 = vst [vmem:[#allocation39_spill] sm:$0xff] %v8437_v34  ;;  %v321_v17 = vadd.f32 %v8377_v18, %v251_v43  ;;  %v329_v19 = vadd.f32 %v8396_v51, %v259_v36  ;;  %v8452_v20 = vpop.eup %7792  ;;  %7808 = vtanh.f32 %v313_v39  ;;  %v323_v14 = vadd.f32 %v8377_v18, %v253_v52  ;;  %v8484_v52 = vpop.permute.xlu0 %302 }
  0xa6   :  { %v240_v37 = vadd.f32 %v10712_v25, %v10711_v47  ;;  %v248_v56 = vadd.f32 %v10714_v38, %v10713_v42  ;;  %v7795_v2 = vpop.eup %7794  ;;  %7810 = vtanh.f32 %v307_v23  ;;  %v331_v49 = vadd.f32 %v8396_v51, %v261_v32  ;;  %v10716_v23 = vld [vmem:[#allocation25_spill] sm:$0xff]  ;;  %10720 = vst [vmem:[#allocation16_spill] sm:$0xff] %v8484_v52 }
  0xa7   :  { %v268_v3 = vadd.f32 %v228_v16, %v127_v46  ;;  %v270_v55 = vadd.f32 %v230_v33, %v129_v6  ;;  %v7797_v57 = vpop.eup %7796  ;;  %v426_v31 = vand.u32 4294901760, %v7795_v2  ;;  %7812 = vtanh.f32 %v315_v8  ;;  %v10717_v6 = vld [vmem:[#allocation34_spill] sm:$0xff] }
  0xa8   :  { %v267_v58 = vadd.f32 %v227_v24, %v126_v45  ;;  %v8461_v59 = vadd.f32 %v8356_v4, %v240_v37  ;;  %v8463_v60 = vpop.eup %7798  ;;  %v430_v1 = vand.u32 4294901760, %v7797_v57  ;;  %7814 = vtanh.f32 %v322_v29  ;;  %v10718_v8 = vld [vmem:[#allocation30_spill] sm:$0xff] }
  0xa9   :  { %v8466_v39 = vadd.f32 %v8352_v12, %v248_v56  ;;  %v242_v62 = vadd.f32 %v10716_v23, %v10715_v61  ;;  %v8470_v35 = vpop.eup %7800  ;;  %v8472_v46 = vsub.f32 %v7795_v2, %v426_v31  ;;  %7816 = vtanh.f32 %v330_v26 }
  0xaa   :  { %v269_v45 = vadd.f32 %v229_v13, %v8393_v5  ;;  %v250_v43 = vadd.f32 %v10718_v8, %v10717_v6  ;;  %v7803_v36 = vpop.eup %7802  ;;  %v8477_v16 = vpack.c.bf16 %v430_v1, %v426_v31  ;;  %v8479_v29 = vsub.f32 %v7797_v57, %v430_v1 }
  0xab   :  { %7818 = vtanh.f32 %v324_v50  ;;  %v8482_v33 = vadd.f32 %v8356_v4, %v242_v62  ;;  %v1191_v54 = vand.u32 4294901760, %v7803_v36  ;;  %v10518_v26 = vand.u32 4294901760, %v8472_v46 }
  0xac   :  { %10719 = vst [vmem:[#allocation15_spill] sm:$0xff] %v8477_v16  ;;  %7820 = vtanh.f32 %v332_v22  ;;  %v8488_v5 = vadd.f32 %v8352_v12, %v250_v43  ;;  %6901 = vmatprep.subr.bf16.mxu0 %v8477_v16  ;;  %v338_v32 = vadd.f32 %v8484_v52, %v268_v3  ;;  %v340_v44 = vadd.f32 %v8484_v52, %v270_v55 }
  0xad   :  { %7822 = vtanh.f32 %v321_v17  ;;  %v10517_v28 = vand.u32 4294901760, %v8479_v29  ;;  %v7805_v4 = vpop.eup %7804  ;;  %v8494_v7 = vsub.f32 %v7803_v36, %v1191_v54  ;;  %v337_v15 = vadd.f32 %v8484_v52, %v267_v58 }
  0xae   :  { %7824 = vtanh.f32 %v329_v19  ;;  %v559_v12 = vsub.f32 %v8472_v46, %v10518_v26  ;;  %v7807_v24 = vpop.eup %7806  ;;  %v1195_v50 = vand.u32 4294901760, %v7805_v4  ;;  %v339_v22 = vadd.f32 %v8484_v52, %v269_v45 }
  0xaf   :  { %7826 = vtanh.f32 %v323_v14  ;;  %v571_v13 = vsub.f32 %v8479_v29, %v10517_v28  ;;  %v7809_v17 = vpop.eup %7808  ;;  %v428_v47 = vand.u32 4294901760, %v7807_v24  ;;  %v10516_v19 = vand.u32 4294901760, %v8494_v7 }
  0xb0   :  { %7828 = vtanh.f32 %v331_v49  ;;  %v560_v25 = vand.u32 4294901760, %v559_v12  ;;  %v7811_v37 = vpop.eup %7810  ;;  %v8505_v42 = vpack.c.bf16 %v1195_v50, %v1191_v54  ;;  %v8507_v38 = vsub.f32 %v7805_v4, %v1195_v50 }
  0xb1   :  { %v432_v56 = vand.u32 4294901760, %v7809_v17  ;;  %7830 = vtanh.f32 %v338_v32  ;;  %v7813_v14 = vpop.eup %7812  ;;  %v8509_v2 = vsub.f32 %v7807_v24, %v428_v47  ;;  %v1193_v3 = vand.u32 4294901760, %v7811_v37 }
  0xb2   :  { %10721 = vst [vmem:[#allocation17_spill] sm:$0xff] %v8505_v42  ;;  %7832 = vtanh.f32 %v340_v44  ;;  %v572_v55 = vand.u32 4294901760, %v571_v13  ;;  %v7815_v57 = vpop.eup %7814  ;;  %6949 = vmatprep.subr.bf16.mxu1 %v8505_v42  ;;  %v1197_v58 = vand.u32 4294901760, %v7813_v14  ;;  %v1324_v36 = vsub.f32 %v8494_v7, %v10516_v19 }
  0xb3   :  { %v8512_v49 = vpack.c.bf16 %v432_v56, %v428_v47  ;;  %v8514_v31 = vsub.f32 %v7809_v17, %v432_v56  ;;  %7834 = vtanh.f32 %v337_v15  ;;  %v7817_v1 = vpop.eup %7816  ;;  %v8516_v61 = vsub.f32 %v7811_v37, %v1193_v3 }
  0xb4   :  { %v434_v23 = vand.u32 4294901760, %v7815_v57  ;;  %7836 = vtanh.f32 %v339_v22  ;;  %v8518_v62 = vpack.c.bf16 %v572_v55, %v560_v25  ;;  %v8521_v6 = vpack.c.bf16 %v1197_v58, %v1193_v3 }
  0xb5   :  { %10722 = vst [vmem:[#allocation18_spill] sm:$0xff] %v8512_v49  ;;  %v7819_v45 = vpop.eup %7818  ;;  %6903 = vmatpush1.bf16.msra.mxu0 %v8512_v49  ;;  %v8523_v8 = vsub.f32 %v7813_v14, %v1197_v58  ;;  %v438_v43 = vand.u32 4294901760, %v7817_v1  ;;  %v10515_v4 = vand.u32 4294901760, %v8507_v38  ;;  %v10519_v15 = vand.u32 4294901760, %v8509_v2 }
  0xb6   :  { %10723 = vst [vmem:[#allocation31_spill] sm:$0xff] %v8521_v6  ;;  %v7821_v54 = vpop.eup %7820  ;;  %v8528_v32 = vsub.f32 %v7815_v57, %v434_v23  ;;  %v1199_v44 = vand.u32 4294901760, %v7819_v45  ;;  %6951 = vmatpush1.bf16.msra.mxu1 %v8521_v6  ;;  %v1325_v13 = vand.u32 4294901760, %v1324_v36  ;;  %v10524_v58 = vand.u32 4294901760, %v8514_v31  ;;  %v10730_v6 = vld [vmem:[#allocation21_spill] sm:$0xff] }
  0xb7   :  { %v7823_v12 = vpop.eup %7822  ;;  %v8533_v24 = vpack.c.bf16 %v438_v43, %v434_v23  ;;  %v8535_v50 = vsub.f32 %v7817_v1, %v438_v43  ;;  %v1203_v22 = vand.u32 4294901760, %v7821_v54  ;;  %v1336_v37 = vsub.f32 %v8507_v38, %v10515_v4 }
  0xb8   :  { %v7825_v17 = vpop.eup %7824  ;;  %v8537_v47 = vsub.f32 %v7819_v45, %v1199_v44  ;;  %v436_v25 = vand.u32 4294901760, %v7823_v12  ;;  %v565_v56 = vsub.f32 %v8509_v2, %v10519_v15  ;;  %7838 = vtanh.f32 %v8403_v9 }
  0xb9   :  { %10724 = vst [vmem:[#allocation24_spill] sm:$0xff] %v8533_v24  ;;  %v7827_v14 = vpop.eup %7826  ;;  %6905 = vmatprep.subr.bf16.mxu0 %v8533_v24  ;;  %v8546_v3 = vpack.c.bf16 %v1203_v22, %v1199_v44  ;;  %v8548_v55 = vsub.f32 %v7821_v54, %v1203_v22  ;;  %v440_v57 = vand.u32 4294901760, %v7825_v17  ;;  %v1337_v43 = vand.u32 4294901760, %v1336_v37 }
  0xba   :  { %v7829_v1 = vpop.eup %7828  ;;  %v8551_v23 = vsub.f32 %v7823_v12, %v436_v25  ;;  %v1201_v45 = vand.u32 4294901760, %v7827_v14  ;;  %v566_v36 = vand.u32 4294901760, %v565_v56  ;;  %v577_v54 = vsub.f32 %v8514_v31, %v10524_v58 }
  0xbb   :  { %10725 = vst [vmem:[#allocation33_spill] sm:$0xff] %v8546_v3  ;;  %v7831_v4 = vpop.eup %7830  ;;  %6953 = vmatprep.subr.bf16.mxu1 %v8546_v3  ;;  %v8554_v19 = vpack.c.bf16 %v440_v57, %v436_v25  ;;  %v8556_v28 = vsub.f32 %v7825_v17, %v440_v57  ;;  %v1205_v44 = vand.u32 4294901760, %v7829_v1  ;;  %v6956_v15 = vpack.c.bf16 %v1337_v43, %v1325_v13 }
  0xbc   :  { %v7833_v22 = vpop.eup %7832  ;;  %v8561_v26 = vsub.f32 %v7827_v14, %v1201_v45  ;;  %v8563_v12 = vand.u32 4294901760, %v7831_v4  ;;  %v10527_v37 = vand.u32 4294901760, %v8516_v61  ;;  %v578_v52 = vand.u32 4294901760, %v577_v54 }
  0xbd   :  { %10726 = vst [vmem:[#allocation29_spill] sm:$0xff] %v8554_v19  ;;  %v7835_v56 = vpop.eup %7834  ;;  %6907 = vmatpush1.bf16.msra.mxu0 %v8554_v19  ;;  %v8567_v25 = vpack.c.bf16 %v1205_v44, %v1201_v45  ;;  %v8569_v17 = vsub.f32 %v7829_v1, %v1205_v44  ;;  %v8571_v57 = vand.u32 4294901760, %v7833_v22  ;;  %v10532_v43 = vand.u32 4294901760, %v8523_v8 }
  0xbe   :  { %v7837_v3 = vpop.eup %7836  ;;  %443 = vmatprep.subr.mxu0 %v8563_v12  ;;  %v8574_v14 = vand.u32 4294901760, %v7835_v56  ;;  %v1330_v13 = vsub.f32 %v8516_v61, %v10527_v37  ;;  %v10535_v58 = vand.u32 4294901760, %v8528_v32  ;;  %v6910_v45 = vpack.c.bf16 %v578_v52, %v566_v36 }
  0xbf   :  { %10727 = vst [vmem:[#allocation32_spill] sm:$0xff] %v8567_v25  ;;  %6955 = vmatpush1.bf16.msra.mxu1 %v8567_v25  ;;  %v8582_v1 = vand.u32 4294901760, %v7837_v3  ;;  %v10540_v44 = vand.u32 4294901760, %v8535_v50  ;;  %v10541_v54 = vand.u32 4294901760, %v8537_v47  ;;  %v1342_v37 = vsub.f32 %v8523_v8, %v10532_v43 }
  0xc0   :  { %10728 = vst [vmem:[#allocation25_spill] sm:$0xff] %v8574_v14  ;;  %1208 = vmatprep.subr.mxu1 %v8571_v57  ;;  %v1331_v19 = vand.u32 4294901760, %v1330_v13  ;;  %v583_v24 = vsub.f32 %v8528_v32, %v10535_v58  ;;  %v10544_v13 = vand.u32 4294901760, %v8551_v23  ;;  %v10731_v49 = vand.u32 4294901760, %v8548_v55 }
  0xc1   :  { %10729 = vst [vmem:[#allocation34_spill] sm:$0xff] %v8582_v1  ;;  %445 = vmatpush1.msra.mxu0 %v8574_v14  ;;  %v595_v52 = vsub.f32 %v8535_v50, %v10540_v44  ;;  %v1348_v36 = vsub.f32 %v8537_v47, %v10541_v54  ;;  %v1343_v58 = vand.u32 4294901760, %v1342_v37  ;;  %v10546_v44 = vand.u32 4294901760, %v8561_v26 }
  0xc2   :  { %506 = vmatmul.mubr.f32.vlgmr.msra.gmra.mrb[0].mxu0 %v10730_v6  ;;  %6909 = vmatprep.subr.bf16.mxu0 %v8518_v62  ;;  %v584_v25 = vand.u32 4294901760, %v583_v24  ;;  %v1360_v42 = vsub.f32 %v8548_v55, %v10731_v49  ;;  %v589_v43 = vsub.f32 %v8551_v23, %v10544_v13  ;;  %v10732_v34 = vand.u32 4294901760, %v8556_v28 }
  0xc3   :  { %1210 = vmatpush1.msra.mxu1 %v8582_v1  ;;  %6911 = vmatpush1.bf16.msra.mxu0 %v6910_v45  ;;  %v596_v54 = vand.u32 4294901760, %v595_v52  ;;  %v1349_v16 = vand.u32 4294901760, %v1348_v36  ;;  %v6958_v24 = vpack.c.bf16 %v1343_v58, %v1331_v19  ;;  %v1354_v37 = vsub.f32 %v8561_v26, %v10546_v44 }
  0xc4   :  { %v601_v62 = vsub.f32 %v8556_v28, %v10732_v34  ;;  %1271 = vmatmul.mubr.f32.vlgmr.msra.gmra.mrb[0].mxu1 %v10730_v6  ;;  %6957 = vmatprep.subr.bf16.mxu1 %v6956_v15  ;;  %v1361_v49 = vand.u32 4294901760, %v1360_v42  ;;  %v1365_v45 = vand.u32 4294901760, %v8569_v17  ;;  %v10733_v36 = vmov 0.0   ;;  %v10734_v42 = vld [vmem:[#allocation22_spill] sm:$0xff] }
  0xc5   :  { %v6912_v52 = vpack.c.bf16 %v596_v54, %v584_v25  ;;  %511 = vmatprep.mubr.f32.mxu0 %v10733_v36  ;;  %1276 = vmatprep.mubr.f32.mxu1 %v10733_v36  ;;  %v590_v13 = vand.u32 4294901760, %v589_v43  ;;  %v8624_v34 = vsub.f32 %v7831_v4, %v8563_v12  ;;  %v8630_v58 = vsub.f32 %v7833_v22, %v8571_v57 }
  0xc6   :  { %v602_v63 = vand.u32 4294901760, %v601_v62  ;;  %6959 = vmatpush1.bf16.msra.mxu1 %v6958_v24  ;;  %v6960_v19 = vpack.c.bf16 %v1361_v49, %v1349_v16  ;;  %517 = vmatmul.mubr.f32.gmra.mrb[2].mxu0 %v10734_v42  ;;  %v1366_v15 = vsub.f32 %v8569_v17, %v1365_v45  ;;  %v8635_v4 = vsub.f32 %v7835_v56, %v8574_v14  ;;  %v10735_v24 = vld [vmem:[#allocation23_spill] sm:$0xff]  ;;  %v10736_v49 = vld [vmem:[#allocation13_spill] sm:$0xff] }
  0xc7   :  { %6913 = vmatprep.subr.bf16.mxu0 %v6912_v52  ;;  %v10545_v54 = vand.u32 4294901760, %v8624_v34  ;;  %522 = vmatprep.mubr.f32.mxu0 %v10733_v36  ;;  %v8638_v9 = vsub.f32 %v7837_v3, %v8582_v1  ;;  %v1355_v16 = vand.u32 4294901760, %v1354_v37  ;;  %v10547_v22 = vand.u32 4294901760, %v8630_v58  ;;  %v10737_v37 = vld [vmem:[#allocation19_spill] sm:$0xff] }
  0xc8   :  { %v6914_v25 = vpack.c.bf16 %v602_v63, %v590_v13  ;;  %6961 = vmatprep.subr.bf16.mxu1 %v6960_v19  ;;  %1282 = vmatmul.mubr.f32.gmra.mrb[2].mxu1 %v10734_v42  ;;  %v1367_v43 = vand.u32 4294901760, %v1366_v15  ;;  %v10550_v56 = vand.u32 4294901760, %v8635_v4  ;;  %v10738_v52 = vsub.f32 %v10736_v49, %v10737_v37  ;;  %v10740_v15 = vld [vmem:[#allocation26_spill] sm:$0xff] }
  0xc9   :  { %v607_v63 = vsub.f32 %v8624_v34, %v10545_v54  ;;  %1287 = vmatprep.mubr.f32.mxu1 %v10733_v36  ;;  %v1372_v62 = vsub.f32 %v8630_v58, %v10547_v22  ;;  %v1958_v22 = vand.u32 4294901760, %v8442_v48  ;;  %v10743_v6 = vand.u32 4294901760, %v8509_v2 }
  0xca   :  { %6915 = vmatpush1.bf16.msra.mxu0 %v6914_v25  ;;  %v6962_v3 = vpack.c.bf16 %v1367_v43, %v1355_v16  ;;  %v8655_v19 = vand.u32 4294901760, %v10738_v52  ;;  %v10741_v25 = vld [vmem:[#allocation20_spill] sm:$0xff]  ;;  %v613_v13 = vsub.f32 %v8635_v4, %v10550_v56  ;;  %v10742_v16 = vand.u32 4294901760, %v8638_v9 }
  0xcb   :  { %528 = vmatmul.mubr.f32.gmra.mrb[4].mxu0 %v10735_v24  ;;  %v548_v54 = vsub.f32 %v10741_v25, %v10740_v15  ;;  %v608_v44 = vand.u32 4294901760, %v607_v63  ;;  %v1373_v42 = vand.u32 4294901760, %v1372_v62  ;;  %v6916_v52 = vpack.c.bf16 %v8479_v29, %v8472_v46 }
  0xcc   :  { %10739 = vst [vmem:[#allocation30_spill] sm:$0xff] %v8655_v19  ;;  %v1378_v43 = vsub.f32 %v8638_v9, %v10742_v16  ;;  %533 = vmatprep.mubr.f32.mxu0 %v10733_v36  ;;  %6963 = vmatpush1.bf16.msra.mxu1 %v6962_v3  ;;  %v10744_v63 = vand.u32 4294901760, %v8514_v31  ;;  %v1962_v56 = vand.u32 4294901760, %v8422_v30  ;;  %v614_v16 = vand.u32 4294901760, %v613_v13 }
  0xcd   :  { %609 = vmatprep.subr.mxu0 %v608_v44  ;;  %1293 = vmatmul.mubr.f32.gmra.mrb[4].mxu1 %v10735_v24  ;;  %v10745_v25 = vand.u32 4294901760, %v8516_v61  ;;  %v10746_v3 = vand.u32 4294901760, %v8523_v8  ;;  %v10747_v49 = vand.u32 4294901760, %v8528_v32  ;;  %v10748_v1 = vand.u32 4294901760, %v8535_v50 }
  0xce   :  { %v8673_v15 = vpack.c.bf16 %v10744_v63, %v10743_v6  ;;  %v1379_v37 = vand.u32 4294901760, %v1378_v43  ;;  %1374 = vmatprep.subr.mxu1 %v1373_v42  ;;  %1298 = vmatprep.mubr.f32.mxu1 %v10733_v36  ;;  %v10749_v6 = vand.u32 4294901760, %v8537_v47  ;;  %v10750_v44 = vand.u32 4294901760, %v8548_v55 }
  0xcf   :  { %v8681_v62 = vpack.c.bf16 %v10746_v3, %v10745_v25  ;;  %v8687_v14 = vpack.c.bf16 %v10748_v1, %v10747_v49  ;;  %v10751_v43 = vand.u32 4294901760, %v8551_v23  ;;  %v10752_v25 = vand.u32 4294901760, %v8556_v28  ;;  %615 = vmatpush1.msra.mxu0 %v614_v16 }
  0xd0   :  { %v8694_v13 = vpack.c.bf16 %v10750_v44, %v10749_v6  ;;  %v10754_v3 = vand.u32 4294901760, %v8561_v26  ;;  %7840 = vtanh.f32 %v8461_v59  ;;  %v6964_v1 = vpack.c.bf16 %v8507_v38, %v8494_v7  ;;  %v8713_v6 = vpop.eup %7838  ;;  %1380 = vmatpush1.msra.mxu1 %v1379_v37  ;;  %6917 = vmatprep.subr.bf16.mxu0 %v6916_v52  ;;  %v10757_v44 = vld [vmem:[#allocation37_spill] sm:$0xff]  ;;  %v10758_v59 = vld [vmem:[#allocation27_spill] sm:$0xff]  ;;  %v10763_v37 = vld [vmem:[#allocation28_spill] sm:$0xff] }
  0xd1   :  { %v8700_v63 = vpack.c.bf16 %v10752_v25, %v10751_v43  ;;  %7842 = vtanh.f32 %v8466_v39  ;;  %v8710_v42 = vpack.c.bf16 %v1962_v56, %v1958_v22  ;;  %v2723_v49 = vand.u32 4294901760, %v8447_v10  ;;  %v10759_v43 = vld [vmem:[#allocation35_spill] sm:$0xff]  ;;  %v10760_v25 = vld [vmem:[#allocation40_spill] sm:$0xff]  ;;  %539 = vmatmul.mubr.f32.gmra.mrb[6].mxu0 %v8655_v19  ;;  %1304 = vmatmul.mubr.f32.gmra.mrb[6].mxu1 %v8655_v19 }
  0xd2   :  { %v8704_v24 = vpack.c.bf16 %v1365_v45, %v10754_v3  ;;  %7844 = vtanh.f32 %v8482_v33  ;;  %v2727_v45 = vand.u32 4294901760, %v8428_v40  ;;  %v256_v16 = vadd.f32 %v10758_v59, %v10757_v44  ;;  %6965 = vmatprep.subr.bf16.mxu1 %v6964_v1  ;;  %v10765_v33 = vld [vmem:[#allocation41_spill] sm:$0xff]  ;;  %544 = vmatprep.mubr.f32.mxu0 %v10733_v36 }
  0xd3   :  { %10753 = vst [vmem:[#allocation43_spill] sm:$0xff] %v8700_v63  ;;  %10756 = vst [vmem:[#allocation45_spill] sm:$0xff] %v8710_v42  ;;  %v264_v3 = vadd.f32 %v10760_v25, %v10759_v43  ;;  %v8722_v39 = vand.u32 4294901760, %v548_v54  ;;  %7846 = vtanh.f32 %v8488_v5  ;;  %v10762_v42 = vld [vmem:[#allocation38_spill] sm:$0xff]  ;;  %v8732_v44 = vsub.f32 %v8442_v48, %v1958_v22  ;;  %1309 = vmatprep.mubr.f32.mxu1 %v10733_v36 }
  0xd4   :  { %10755 = vst [vmem:[#allocation44_spill] sm:$0xff] %v8704_v24  ;;  %v258_v52 = vadd.f32 %v10763_v37, %v10762_v42  ;;  %v10764_v24 = vld [vmem:[#allocation36_spill] sm:$0xff]  ;;  %v8734_v1 = vpack.c.bf16 %v2727_v45, %v2723_v49  ;;  %v326_v54 = vadd.f32 %v8377_v18, %v256_v16  ;;  %v1966_v59 = vand.u32 4294901760, %v8452_v20 }
  0xd5   :  { %10761 = vst [vmem:[#allocation37_spill] sm:$0xff] %v8722_v39  ;;  %v266_v63 = vadd.f32 %v10765_v33, %v10764_v24  ;;  %v334_v5 = vadd.f32 %v8396_v51, %v264_v3  ;;  %v1970_v43 = vand.u32 4294901760, %v8470_v35  ;;  %v8744_v25 = vsub.f32 %v8422_v30, %v1962_v56  ;;  %550 = vmatmul.mubr.f32.gmra.mrb[8].mxu0 %v8722_v39  ;;  %v10769_v3 = vld [vmem:[#allocation39_spill] sm:$0xff]  ;;  %v10770_v33 = vld [vmem:[#allocation2_spill] sm:$0xff] }
  0xd6   :  { %v328_v42 = vadd.f32 %v8377_v18, %v258_v52  ;;  %7848 = vtanh.f32 %v326_v54  ;;  %v10564_v48 = vand.u32 4294901760, %v8463_v60  ;;  %v10563_v22 = vand.u32 4294901760, %v8713_v6  ;;  %1315 = vmatmul.mubr.f32.gmra.mrb[8].mxu1 %v8722_v39  ;;  %670 = vmatprep.mubr.f32.mxu0 %v10733_v36 }
  0xd7   :  { %v336_v24 = vadd.f32 %v8396_v51, %v266_v63  ;;  %7850 = vtanh.f32 %v334_v5  ;;  %v8749_v16 = vpack.c.bf16 %v1970_v43, %v1966_v59  ;;  %v8753_v18 = vadd.f32 %v8434_v27, %v8375_v11  ;;  %1435 = vmatprep.mubr.f32.mxu1 %v10733_v36  ;;  %v10768_v63 = vld [vmem:[#allocation42_spill] sm:$0xff] }
  0xd8   :  { %v6918_v51 = vpack.c.bf16 %v8514_v31, %v8509_v2  ;;  %7852 = vtanh.f32 %v328_v42  ;;  %v8763_v30 = vpack.c.bf16 %v10563_v22, %v10564_v48  ;;  %v8767_v56 = vsub.f32 %v8447_v10, %v2723_v49  ;;  %v10777_v48 = vld [vmem:[#allocation17_spill] sm:$0xff] }
  0xd9   :  { %10766 = vst [vmem:[#allocation27_spill] sm:$0xff] %v8749_v16  ;;  %7854 = vtanh.f32 %v336_v24  ;;  %v8771_v11 = vadd.f32 %v8440_v21, %v8383_v0  ;;  %v8775_v27 = vadd.f32 %v8431_v53, %v8372_v41  ;;  %v6966_v31 = vpack.c.bf16 %v8523_v8, %v8516_v61  ;;  %672 = vmatmul.mubr.f32.vlgmr.msra.gmra.mrb[0].mxu0 %v10770_v33 }
  0xda   :  { %10767 = vst [vmem:[#allocation35_spill] sm:$0xff] %v8763_v30  ;;  %v7841_v2 = vpop.eup %7840  ;;  %v8781_v37 = vadd.f32 %v10769_v3, %v10768_v63  ;;  %v10559_v10 = vand.u32 4294901760, %v8732_v44  ;;  %v10558_v49 = vand.u32 4294901760, %v8744_v25  ;;  %v6920_v0 = vpack.c.bf16 %v8535_v50, %v8528_v32  ;;  %6919 = vmatpush1.bf16.msra.mxu0 %v6918_v51  ;;  %1437 = vmatmul.mubr.f32.vlgmr.msra.gmra.mrb[0].mxu1 %v10770_v33  ;;  %v10771_v51 = vld [vmem:[#allocation3_spill] sm:$0xff]  ;;  %v10792_v30 = vld [vmem:[#allocation6_spill] sm:$0xff] }
  0xdb   :  { %v7843_v52 = vpop.eup %7842  ;;  %v6968_v41 = vpack.c.bf16 %v8548_v55, %v8537_v47  ;;  %v6922_v53 = vpack.c.bf16 %v8556_v28, %v8551_v23  ;;  %v1956_v21 = vand.u32 4294901760, %v7841_v2  ;;  %v6970_v8 = vpack.c.bf16 %v8569_v17, %v8561_v26  ;;  %6967 = vmatpush1.bf16.msra.mxu1 %v6966_v31  ;;  %677 = vmatprep.mubr.f32.mxu0 %v10733_v36 }
  0xdc   :  { %v7845_v61 = vpop.eup %7844  ;;  %v1960_v54 = vand.u32 4294901760, %v7843_v52  ;;  %v2095_v5 = vsub.f32 %v8732_v44, %v10559_v10  ;;  %v2107_v32 = vsub.f32 %v8744_v25, %v10558_v49  ;;  %6921 = vmatprep.subr.bf16.mxu0 %v6920_v0  ;;  %v8804_v55 = vsub.f32 %v8428_v40, %v2727_v45  ;;  %1442 = vmatprep.mubr.f32.mxu1 %v10733_v36 }
  0xdd   :  { %v7847_v50 = vpop.eup %7846  ;;  %v8801_v28 = vsub.f32 %v7841_v2, %v1956_v21  ;;  %v2721_v47 = vand.u32 4294901760, %v7845_v61  ;;  %v10557_v26 = vand.u32 4294901760, %v8767_v56  ;;  %6969 = vmatprep.subr.bf16.mxu1 %v6968_v41  ;;  %v8813_v24 = vsub.f32 %v8452_v20, %v1966_v59  ;;  %679 = vmatmul.mubr.f32.gmra.mrb[2].mxu0 %v10771_v51 }
  0xde   :  { %v8808_v23 = vpack.c.bf16 %v1960_v54, %v1956_v21  ;;  %v8810_v17 = vsub.f32 %v7843_v52, %v1960_v54  ;;  %v2725_v42 = vand.u32 4294901760, %v7847_v50  ;;  %v8820_v40 = vsub.f32 %v8470_v35, %v1970_v43  ;;  %6923 = vmatpush1.bf16.msra.mxu0 %v6922_v53  ;;  %1444 = vmatmul.mubr.f32.gmra.mrb[2].mxu1 %v10771_v51 }
  0xdf   :  { %v8817_v2 = vsub.f32 %v7845_v61, %v2721_v47  ;;  %v10561_v45 = vand.u32 4294901760, %v8801_v28  ;;  %v2096_v31 = vand.u32 4294901760, %v2095_v5  ;;  %v2108_v52 = vand.u32 4294901760, %v2107_v32  ;;  %6971 = vmatpush1.bf16.msra.mxu1 %v6970_v8  ;;  %732 = vmatprep.subr.mxu0 %v8624_v34 }
  0xe0   :  { %10772 = vst [vmem:[#allocation40_spill] sm:$0xff] %v8820_v40  ;;  %v7849_v63 = vpop.eup %7848  ;;  %v8824_v3 = vpack.c.bf16 %v2725_v42, %v2721_v47  ;;  %v8826_v20 = vsub.f32 %v7847_v50, %v2725_v42  ;;  %v10560_v59 = vand.u32 4294901760, %v8810_v17  ;;  %v2860_v53 = vsub.f32 %v8767_v56, %v10557_v26  ;;  %1497 = vmatprep.subr.mxu1 %v8630_v58  ;;  %v10774_v50 = vld [vmem:[#allocation4_spill] sm:$0xff] }
  0xe1   :  { %v7851_v0 = vpop.eup %7850  ;;  %v1964_v35 = vand.u32 4294901760, %v7849_v63  ;;  %v2089_v43 = vsub.f32 %v8801_v28, %v10561_v45  ;;  %v10562_v41 = vand.u32 4294901760, %v8817_v2  ;;  %684 = vmatprep.mubr.f32.mxu0 %v10733_v36  ;;  %v8843_v5 = vpack.c.bf16 %v2108_v52, %v2096_v31  ;;  %1449 = vmatprep.mubr.f32.mxu1 %v10733_v36 }
  0xe2   :  { %v7853_v21 = vpop.eup %7852  ;;  %v1968_v61 = vand.u32 4294901760, %v7851_v0  ;;  %v2101_v8 = vsub.f32 %v8810_v17, %v10560_v59  ;;  %v10565_v54 = vand.u32 4294901760, %v8826_v20  ;;  %686 = vmatmul.mubr.f32.gmra.mrb[4].mxu0 %v10774_v50  ;;  %1451 = vmatmul.mubr.f32.gmra.mrb[4].mxu1 %v10774_v50  ;;  %v10570_v22 = vand.u32 4294901760, %v8804_v55 }
  0xe3   :  { %10773 = vst [vmem:[#allocation38_spill] sm:$0xff] %v8843_v5  ;;  %v7855_v32 = vpop.eup %7854  ;;  %v8847_v47 = vsub.f32 %v7849_v63, %v1964_v35  ;;  %v2729_v42 = vand.u32 4294901760, %v7853_v21  ;;  %v2090_v26 = vand.u32 4294901760, %v2089_v43  ;;  %v2854_v49 = vsub.f32 %v8817_v2, %v10562_v41  ;;  %735 = vmatpush1.msra.mxu0 %v8635_v4  ;;  %1500 = vmatpush1.msra.mxu1 %v8638_v9  ;;  %v10776_v63 = vld [vmem:[#allocation15_spill] sm:$0xff] }
  0xe4   :  { %v8854_v10 = vpack.c.bf16 %v1968_v61, %v1964_v35  ;;  %v8856_v31 = vsub.f32 %v7851_v0, %v1968_v61  ;;  %v2733_v52 = vand.u32 4294901760, %v7855_v32  ;;  %v2102_v59 = vand.u32 4294901760, %v2101_v8  ;;  %6925 = vmatprep.subr.bf16.mxu0 %v10776_v63  ;;  %6973 = vmatprep.subr.bf16.mxu1 %v10777_v48 }
  0xe5   :  { %v8860_v45 = vsub.f32 %v7853_v21, %v2729_v42  ;;  %v2855_v43 = vand.u32 4294901760, %v2854_v49  ;;  %v2866_v41 = vsub.f32 %v8826_v20, %v10565_v54  ;;  %691 = vmatprep.mubr.f32.mxu0 %v10733_v36  ;;  %v2861_v8 = vand.u32 4294901760, %v2860_v53  ;;  %1456 = vmatprep.mubr.f32.mxu1 %v10733_v36  ;;  %v10780_v49 = vld [vmem:[#allocation9_spill] sm:$0xff] }
  0xe6   :  { %10775 = vst [vmem:[#allocation28_spill] sm:$0xff] %v8854_v10  ;;  %v8868_v0 = vpack.c.bf16 %v2733_v52, %v2729_v42  ;;  %v8870_v35 = vsub.f32 %v7855_v32, %v2733_v52  ;;  %v8872_v61 = vpack.c.bf16 %v2102_v59, %v2090_v26  ;;  %693 = vmatmul.mubr.f32.gmra.mrb[6].mxu0 %v10780_v49  ;;  %v10571_v39 = vand.u32 4294901760, %v8847_v47  ;;  %v10794_v10 = vld [vmem:[#allocation31_spill] sm:$0xff] }
  0xe7   :  { %v2867_v21 = vand.u32 4294901760, %v2866_v41  ;;  %v2872_v54 = vsub.f32 %v8804_v55, %v10570_v22  ;;  %1458 = vmatmul.mubr.f32.gmra.mrb[6].mxu1 %v10780_v49  ;;  %698 = vmatprep.mubr.f32.mxu0 %v10733_v36  ;;  %v10781_v26 = vand.u32 4294901760, %v8463_v60  ;;  %v10572_v53 = vand.u32 4294901760, %v8860_v45 }
  0xe8   :  { %10778 = vst [vmem:[#allocation36_spill] sm:$0xff] %v8868_v0  ;;  %10779 = vst [vmem:[#allocation41_spill] sm:$0xff] %v8872_v61  ;;  %1463 = vmatprep.mubr.f32.mxu1 %v10733_v36  ;;  %v10783_v42 = vand.u32 4294901760, %v8713_v6  ;;  %v10787_v5 = vand.u32 4294901760, %v8870_v35  ;;  %v10798_v0 = vld [vmem:[#allocation7_spill] sm:$0xff] }
  0xe9   :  { %v8886_v59 = vsub.f32 %v8463_v60, %v10781_v26  ;;  %v8897_v22 = vpack.c.bf16 %v2867_v21, %v2855_v43  ;;  %v2873_v19 = vand.u32 4294901760, %v2872_v54  ;;  %v2113_v60 = vsub.f32 %v8847_v47, %v10571_v39 }
  0xea   :  { %v8895_v52 = vsub.f32 %v8713_v6, %v10783_v42  ;;  %v10786_v26 = vand.u32 4294901760, %v8856_v31  ;;  %v2878_v32 = vsub.f32 %v8860_v45, %v10572_v53  ;;  %v2890_v6 = vsub.f32 %v8870_v35, %v10787_v5  ;;  %v10788_v42 = vld [vmem:[#allocation14_spill] sm:$0xff] }
  0xeb   :  { %10782 = vst [vmem:[#allocation42_spill] sm:$0xff] %v8886_v59  ;;  %10785 = vst [vmem:[#allocation2_spill] sm:$0xff] %v8897_v22  ;;  %700 = vmatmul.mubr.f32.gmra.mrb[8].mxu0 %v10788_v42  ;;  %v8912_v43 = vpack.c.bf16 %v2873_v19, %v2861_v8  ;;  %v2114_v54 = vand.u32 4294901760, %v2113_v60  ;;  %v10790_v21 = vand.u32 4294901760, %v8813_v24  ;;  %v2130_v22 = vand.u32 4294901760, %v8820_v40  ;;  %1465 = vmatmul.mubr.f32.gmra.mrb[8].mxu1 %v10788_v42 }
  0xec   :  { %10784 = vst [vmem:[#allocation39_spill] sm:$0xff] %v8895_v52  ;;  %v2125_v41 = vsub.f32 %v8856_v31, %v10786_v26  ;;  %790 = vmatprep.mubr.f32.mxu0 %v10733_v36  ;;  %v2879_v53 = vand.u32 4294901760, %v2878_v32  ;;  %v2891_v61 = vand.u32 4294901760, %v2890_v6  ;;  %v2883_v5 = vand.u32 4294901760, %v8886_v59  ;;  %1555 = vmatprep.mubr.f32.mxu1 %v10733_v36  ;;  %v10793_v6 = vld [vmem:[#allocation18_spill] sm:$0xff] }
  0xed   :  { %10789 = vst [vmem:[#allocation3_spill] sm:$0xff] %v8912_v43  ;;  %v2119_v39 = vsub.f32 %v8813_v24, %v10790_v21  ;;  %v2131_v19 = vsub.f32 %v8820_v40, %v2130_v22  ;;  %v2895_v8 = vand.u32 4294901760, %v8895_v52  ;;  %v10824_v40 = vand.u32 4294901760, %v8507_v38  ;;  %v10828_v38 = vld [vmem:[#allocation10_spill] sm:$0xff] }
  0xee   :  { %v2126_v26 = vand.u32 4294901760, %v2125_v41  ;;  %v8926_v21 = vpack.c.bf16 %v2891_v61, %v2879_v53  ;;  %v2884_v43 = vsub.f32 %v8886_v59, %v2883_v5  ;;  %v10812_v59 = vand.u32 4294901760, %v8767_v56 }
  0xef   :  { %793 = vmatmul.mubr.f32.vlgmr.msra.gmra.mrb[0].mxu0 %v10792_v30  ;;  %v2120_v16 = vand.u32 4294901760, %v2119_v39  ;;  %v2132_v41 = vand.u32 4294901760, %v2131_v19  ;;  %v2896_v32 = vsub.f32 %v8895_v52, %v2895_v8  ;;  %1558 = vmatmul.mubr.f32.vlgmr.msra.gmra.mrb[0].mxu1 %v10792_v30  ;;  %v10816_v52 = vand.u32 4294901760, %v8847_v47 }
  0xf0   :  { %v8924_v60 = vpack.c.bf16 %v2126_v26, %v2114_v54  ;;  %10791 = vst [vmem:[#allocation4_spill] sm:$0xff] %v8926_v21  ;;  %6927 = vmatpush1.bf16.msra.mxu0 %v10793_v6  ;;  %6975 = vmatpush1.bf16.msra.mxu1 %v10794_v10  ;;  %v10795_v54 = vld [vmem:[#allocation24_spill] sm:$0xff]  ;;  %v2885_v53 = vand.u32 4294901760, %v2884_v43  ;;  %v10797_v21 = vld [vmem:[#allocation33_spill] sm:$0xff] }
  0xf1   :  { %6929 = vmatprep.subr.bf16.mxu0 %v10795_v54  ;;  %v8937_v61 = vpack.c.bf16 %v2132_v41, %v2120_v16  ;;  %v2897_v26 = vand.u32 4294901760, %v2896_v32  ;;  %6977 = vmatprep.subr.bf16.mxu1 %v10797_v21  ;;  %v10799_v43 = vld [vmem:[#allocation29_spill] sm:$0xff]  ;;  %v10800_v41 = vand.u32 4294901760, %v8472_v46  ;;  %v10801_v32 = vand.u32 4294901760, %v8479_v29 }
  0xf2   :  { %798 = vmatprep.mubr.f32.mxu0 %v10733_v36  ;;  %1563 = vmatprep.mubr.f32.mxu1 %v10733_v36  ;;  %v10803_v46 = vand.u32 4294901760, %v8801_v28  ;;  %v10804_v29 = vand.u32 4294901760, %v8810_v17  ;;  %v10810_v16 = vand.u32 4294901760, %v8744_v25 }
  0xf3   :  { %10796 = vst [vmem:[#allocation15_spill] sm:$0xff] %v8937_v61  ;;  %801 = vmatmul.mubr.f32.gmra.mrb[2].mxu0 %v10798_v0  ;;  %v8947_v30 = vpack.c.bf16 %v2897_v26, %v2885_v53  ;;  %1566 = vmatmul.mubr.f32.gmra.mrb[2].mxu1 %v10798_v0  ;;  %v6932_v39 = vpack.c.bf16 %v10801_v32, %v10800_v41  ;;  %v10802_v53 = vld [vmem:[#allocation32_spill] sm:$0xff]  ;;  %v10806_v32 = vand.u32 4294901760, %v8817_v2  ;;  %v10807_v61 = vand.u32 4294901760, %v8826_v20 }
  0xf4   :  { %6931 = vmatpush1.bf16.msra.mxu0 %v10799_v43  ;;  %6979 = vmatpush1.bf16.msra.mxu1 %v10802_v53  ;;  %v8971_v41 = vpack.c.bf16 %v10804_v29, %v10803_v46  ;;  %v10809_v26 = vand.u32 4294901760, %v8732_v44  ;;  %v10813_v46 = vand.u32 4294901760, %v8804_v55 }
  0xf5   :  { %848 = vmatprep.subr.mxu0 %v8563_v12  ;;  %1613 = vmatprep.subr.mxu1 %v8571_v57  ;;  %v8979_v19 = vpack.c.bf16 %v10807_v61, %v10806_v32  ;;  %v10817_v61 = vand.u32 4294901760, %v8856_v31 }
  0xf6   :  { %10805 = vst [vmem:[#allocation17_spill] sm:$0xff] %v8971_v41  ;;  %806 = vmatprep.mubr.f32.mxu0 %v10733_v36  ;;  %v8985_v0 = vpack.c.bf16 %v10810_v16, %v10809_v26  ;;  %v8991_v29 = vpack.c.bf16 %v10813_v46, %v10812_v59  ;;  %1571 = vmatprep.mubr.f32.mxu1 %v10733_v36  ;;  %v10815_v41 = vld [vmem:[#allocation8_spill] sm:$0xff]  ;;  %v10820_v16 = vand.u32 4294901760, %v8870_v35  ;;  %v10822_v46 = vld [vmem:[#allocation25_spill] sm:$0xff] }
  0xf7   :  { %10808 = vst [vmem:[#allocation9_spill] sm:$0xff] %v8979_v19  ;;  %809 = vmatmul.mubr.f32.gmra.mrb[4].mxu0 %v10815_v41  ;;  %v8999_v32 = vpack.c.bf16 %v10817_v61, %v10816_v52  ;;  %v10819_v19 = vand.u32 4294901760, %v8860_v45  ;;  %1574 = vmatmul.mubr.f32.gmra.mrb[4].mxu1 %v10815_v41  ;;  %v9017_v61 = vpack.c.bf16 %v2895_v8, %v2883_v5  ;;  %v10831_v5 = vld [vmem:[#allocation44_spill] sm:$0xff]  ;;  %v10836_v8 = vand.u32 4294901760, %v8638_v9 }
  0xf8   :  { %10811 = vst [vmem:[#allocation14_spill] sm:$0xff] %v8985_v0  ;;  %10814 = vst [vmem:[#allocation18_spill] sm:$0xff] %v8991_v29  ;;  %v10821_v0 = vand.u32 4294901760, %v8813_v24  ;;  %850 = vmatpush1.msra.mxu0 %v10822_v46  ;;  %v10823_v29 = vand.u32 4294901760, %v8494_v7  ;;  %814 = vmatprep.mubr.f32.mxu0 %v10733_v36  ;;  %v10827_v7 = vld [vmem:[#allocation20_spill] sm:$0xff] }
  0xf9   :  { %10818 = vst [vmem:[#allocation31_spill] sm:$0xff] %v8999_v32  ;;  %v9005_v26 = vpack.c.bf16 %v10820_v16, %v10819_v19  ;;  %v10825_v32 = vld [vmem:[#allocation34_spill] sm:$0xff]  ;;  %6933 = vmatprep.subr.bf16.mxu0 %v6932_v39  ;;  %1579 = vmatprep.mubr.f32.mxu1 %v10733_v36  ;;  %v10844_v19 = vld [vmem:[#allocation35_spill] sm:$0xff] }
  0xfa   :  { %v9009_v59 = vpack.c.bf16 %v2130_v22, %v10821_v0  ;;  %v6980_v52 = vpack.c.bf16 %v10824_v40, %v10823_v29  ;;  %1615 = vmatpush1.msra.mxu1 %v10825_v32  ;;  %v10826_v22 = vld [vmem:[#allocation13_spill] sm:$0xff]  ;;  %v10829_v40 = vld [vmem:[#allocation11_spill] sm:$0xff] }
  0xfb   :  { %817 = vmatmul.mubr.f32.gmra.mrb[6].mxu0 %v10826_v22  ;;  %1582 = vmatmul.mubr.f32.gmra.mrb[6].mxu1 %v10826_v22  ;;  %v10830_v0 = vld [vmem:[#allocation43_spill] sm:$0xff]  ;;  %v10845_v29 = vld [vmem:[#allocation41_spill] sm:$0xff] }
  0xfc   :  { %6981 = vmatprep.subr.bf16.mxu1 %v6980_v52  ;;  %822 = vmatprep.mubr.f32.mxu0 %v10733_v36 }
  0xfd   :  { %1587 = vmatprep.mubr.f32.mxu1 %v10733_v36 }
  0xff   :  { %825 = vmatmul.mubr.f32.gmra.mrb[8].mxu0 %v10827_v7  ;;  %1590 = vmatmul.mubr.f32.gmra.mrb[8].mxu1 %v10827_v7 }
 0x100   :  { %905 = vmatprep.mubr.f32.mxu0 %v10733_v36  ;;  %1670 = vmatprep.mubr.f32.mxu1 %v10733_v36 }
 0x103   :  { %909 = vmatmul.mubr.f32.vlgmr.msra.gmra.mrb[0].mxu0 %v10828_v38  ;;  %1674 = vmatmul.mubr.f32.vlgmr.msra.gmra.mrb[0].mxu1 %v10828_v38 }
 0x104   :  { %6935 = vmatpush1.bf16.msra.mxu0 %v8673_v15  ;;  %6983 = vmatpush1.bf16.msra.mxu1 %v8681_v62  ;;  %v10832_v15 = vand.u32 4294901760, %v8624_v34  ;;  %v10833_v62 = vand.u32 4294901760, %v8630_v58  ;;  %v10837_v34 = vld [vmem:[#allocation19_spill] sm:$0xff]  ;;  %v10838_v58 = vld [vmem:[#allocation26_spill] sm:$0xff] }
 0x105   :  { %6937 = vmatprep.subr.bf16.mxu0 %v8687_v14  ;;  %6985 = vmatprep.subr.bf16.mxu1 %v8694_v13  ;;  %v10834_v14 = vld [vmem:[#allocation12_spill] sm:$0xff]  ;;  %v10835_v13 = vand.u32 4294901760, %v8635_v4 }
 0x106   :  { %914 = vmatprep.mubr.f32.mxu0 %v10733_v36  ;;  %1679 = vmatprep.mubr.f32.mxu1 %v10733_v36  ;;  %v10839_v4 = vld [vmem:[#allocation16_spill] sm:$0xff] }
 0x107   :  { %918 = vmatmul.mubr.f32.gmra.mrb[2].mxu0 %v10829_v40  ;;  %1683 = vmatmul.mubr.f32.gmra.mrb[2].mxu1 %v10829_v40  ;;  %v342_v9 = vadd.f32 %v10839_v4, %v8753_v18 }
 0x108   :  { %6939 = vmatpush1.bf16.msra.mxu0 %v10830_v0  ;;  %6987 = vmatpush1.bf16.msra.mxu1 %v10831_v5 }
 0x109   :  { %986 = vmatprep.subr.mxu0 %v10832_v15  ;;  %1751 = vmatprep.subr.mxu1 %v10833_v62  ;;  %7856 = vtanh.f32 %v342_v9  ;;  %v10848_v9 = vld [vmem:[#allocation38_spill] sm:$0xff] }
 0x10a   :  { %923 = vmatprep.mubr.f32.mxu0 %v10733_v36  ;;  %1688 = vmatprep.mubr.f32.mxu1 %v10733_v36 }
 0x10b   :  { %927 = vmatmul.mubr.f32.gmra.mrb[4].mxu0 %v10834_v14  ;;  %1692 = vmatmul.mubr.f32.gmra.mrb[4].mxu1 %v10834_v14 }
 0x10c   :  { %990 = vmatpush1.msra.mxu0 %v10835_v13  ;;  %1755 = vmatpush1.msra.mxu1 %v10836_v8  ;;  %v10847_v13 = vld [vmem:[#allocation21_spill] sm:$0xff] }
 0x10d   :  { %6941 = vmatprep.subr.bf16.mxu0 %v10776_v63  ;;  %6989 = vmatprep.subr.bf16.mxu1 %v10777_v48  ;;  %v344_v48 = vadd.f32 %v10839_v4, %v8771_v11  ;;  %v10840_v11 = vld [vmem:[#allocation45_spill] sm:$0xff] }
 0x10e   :  { %932 = vmatprep.mubr.f32.mxu0 %v10733_v36  ;;  %1697 = vmatprep.mubr.f32.mxu1 %v10733_v36 }
 0x10f   :  { %936 = vmatmul.mubr.f32.gmra.mrb[6].mxu0 %v10837_v34  ;;  %1701 = vmatmul.mubr.f32.gmra.mrb[6].mxu1 %v10837_v34  ;;  %7858 = vtanh.f32 %v344_v48 }
 0x110   :  { %941 = vmatprep.mubr.f32.mxu0 %v10733_v36  ;;  %1706 = vmatprep.mubr.f32.mxu1 %v10733_v36 }
 0x113   :  { %945 = vmatmul.mubr.f32.gmra.mrb[8].mxu0 %v10838_v58  ;;  %1710 = vmatmul.mubr.f32.gmra.mrb[8].mxu1 %v10838_v58  ;;  %v7857_v18 = vpop.eup %7856 }
 0x114   :  { %1045 = vmatprep.mubr.f32.mxu0 %v10733_v36  ;;  %1810 = vmatprep.mubr.f32.mxu1 %v10733_v36 }
 0x117   :  { %1047 = vmatmul.mubr.f32.vlgmr.msra.gmra.mrb[0].mxu0 %v10770_v33  ;;  %1812 = vmatmul.mubr.f32.vlgmr.msra.gmra.mrb[0].mxu1 %v10770_v33 }
 0x118   :  { %6943 = vmatpush1.bf16.msra.mxu0 %v10793_v6  ;;  %6991 = vmatpush1.bf16.msra.mxu1 %v10794_v10  ;;  %v10842_v10 = vld [vmem:[#allocation36_spill] sm:$0xff] }
 0x119   :  { %6945 = vmatprep.subr.bf16.mxu0 %v10795_v54  ;;  %6993 = vmatprep.subr.bf16.mxu1 %v10797_v21  ;;  %v9115_v21 = vand.u32 4294901760, %v7857_v18  ;;  %v10843_v54 = vld [vmem:[#allocation27_spill] sm:$0xff] }
 0x11a   :  { %1052 = vmatprep.mubr.f32.mxu0 %v10733_v36  ;;  %1817 = vmatprep.mubr.f32.mxu1 %v10733_v36 }
 0x11b   :  { %1054 = vmatmul.mubr.f32.gmra.mrb[2].mxu0 %v10771_v51  ;;  %1819 = vmatmul.mubr.f32.gmra.mrb[2].mxu1 %v10771_v51  ;;  %v9140_v16 = vsub.f32 %v7857_v18, %v9115_v21 }
 0x11c   :  { %6947 = vmatpush1.bf16.msra.mxu0 %v10799_v43  ;;  %6995 = vmatpush1.bf16.msra.mxu1 %v10802_v53 }
 0x11d   :  { %1098 = vmatprep.subr.mxu0 %v8563_v12  ;;  %1863 = vmatprep.subr.mxu1 %v8571_v57  ;;  %v341_v12 = vadd.f32 %v10839_v4, %v8775_v27  ;;  %v343_v57 = vadd.f32 %v10839_v4, %v8781_v37  ;;  %v7859_v27 = vpop.eup %7858  ;;  %v10841_v37 = vld [vmem:[#allocation28_spill] sm:$0xff]  ;;  %v2136_v0 = vand.u32 4294901760, %v9140_v16 }
 0x11e   :  { %1059 = vmatprep.mubr.f32.mxu0 %v10733_v36  ;;  %1824 = vmatprep.mubr.f32.mxu1 %v10733_v36  ;;  %v9119_v39 = vand.u32 4294901760, %v7859_v27 }
 0x11f   :  { %1061 = vmatmul.mubr.f32.gmra.mrb[4].mxu0 %v10774_v50  ;;  %1826 = vmatmul.mubr.f32.gmra.mrb[4].mxu1 %v10774_v50  ;;  %7860 = vtanh.f32 %v341_v12  ;;  %v2137_v8 = vsub.f32 %v9140_v16, %v2136_v0  ;;  %v10849_v12 = vld [vmem:[#allocation3_spill] sm:$0xff] }
 0x120   :  { %1100 = vmatpush1.msra.mxu0 %v10822_v46  ;;  %1865 = vmatpush1.msra.mxu1 %v10825_v32  ;;  %7862 = vtanh.f32 %v343_v57  ;;  %v10846_v32 = vld [vmem:[#allocation2_spill] sm:$0xff]  ;;  %v9145_v46 = vsub.f32 %v7859_v27, %v9119_v39  ;;  %v10850_v57 = vld [vmem:[#allocation4_spill] sm:$0xff] }
 0x121   :  { %6997 = vmatprep.subr.bf16.mxu0 %v8808_v23  ;;  %7045 = vmatprep.subr.bf16.mxu1 %v8824_v3  ;;  %v10851_v27 = vld [vmem:[#allocation22_spill] sm:$0xff] }
 0x122   :  { %1066 = vmatprep.mubr.f32.mxu0 %v10733_v36  ;;  %1831 = vmatprep.mubr.f32.mxu1 %v10733_v36  ;;  %v2901_v15 = vand.u32 4294901760, %v9145_v46 }
 0x123   :  { %1068 = vmatmul.mubr.f32.gmra.mrb[6].mxu0 %v10780_v49  ;;  %1833 = vmatmul.mubr.f32.gmra.mrb[6].mxu1 %v10780_v49 }
 0x124   :  { %1073 = vmatprep.mubr.f32.mxu0 %v10733_v36  ;;  %1838 = vmatprep.mubr.f32.mxu1 %v10733_v36  ;;  %v2902_v48 = vsub.f32 %v9145_v46, %v2901_v15 }
 0x127   :  { %1075 = vmatmul.mubr.f32.gmra.mrb[8].mxu0 %v10788_v42  ;;  %1840 = vmatmul.mubr.f32.gmra.mrb[8].mxu1 %v10788_v42 }
 0x128   :  { %1155 = vmatprep.mubr.f32.mxu0 %v10733_v36  ;;  %1920 = vmatprep.mubr.f32.mxu1 %v10733_v36 }
 0x129   :  { %v7861_v63 = vpop.eup %7860 }
 0x12a   :  { %v7863_v6 = vpop.eup %7862  ;;  %v9125_v43 = vand.u32 4294901760, %v7861_v63 }
 0x12b   :  { %1157 = vmatmul.mubr.f32.vlgmr.msra.gmra.mrb[0].mxu0 %v10770_v33  ;;  %1922 = vmatmul.mubr.f32.vlgmr.msra.gmra.mrb[0].mxu1 %v10770_v33  ;;  %v9129_v53 = vand.u32 4294901760, %v7863_v6 }
 0x12c   :  { %6999 = vmatpush1.bf16.msra.mxu0 %v10840_v11  ;;  %7047 = vmatpush1.bf16.msra.mxu1 %v8734_v1  ;;  %v9149_v52 = vsub.f32 %v7861_v63, %v9125_v43  ;;  %v2138_v63 = vand.u32 4294901760, %v2137_v8 }
 0x12d   :  { %7001 = vmatprep.subr.bf16.mxu0 %v10841_v37  ;;  %7049 = vmatprep.subr.bf16.mxu1 %v10842_v10  ;;  %v9154_v5 = vsub.f32 %v7863_v6, %v9129_v53 }
 0x12e   :  { %1162 = vmatprep.mubr.f32.mxu0 %v10733_v36  ;;  %1927 = vmatprep.mubr.f32.mxu1 %v10733_v36  ;;  %v2142_v62 = vand.u32 4294901760, %v9149_v52 }
 0x12f   :  { %1164 = vmatmul.mubr.f32.gmra.mrb[2].mxu0 %v10771_v51  ;;  %1929 = vmatmul.mubr.f32.gmra.mrb[2].mxu1 %v10771_v51  ;;  %v2907_v4 = vand.u32 4294901760, %v9154_v5 }
 0x130   :  { %7003 = vmatpush1.bf16.msra.mxu0 %v10843_v54  ;;  %7051 = vmatpush1.bf16.msra.mxu1 %v10844_v19  ;;  %v2143_v18 = vsub.f32 %v9149_v52, %v2142_v62 }
 0x131   :  { %1973 = vmatprep.subr.mxu0 %v9115_v21  ;;  %2738 = vmatprep.subr.mxu1 %v9119_v39  ;;  %v2908_v6 = vsub.f32 %v9154_v5, %v2907_v4 }
 0x132   :  { %1169 = vmatprep.mubr.f32.mxu0 %v10733_v36  ;;  %1934 = vmatprep.mubr.f32.mxu1 %v10733_v36 }
 0x133   :  { %1171 = vmatmul.mubr.f32.gmra.mrb[4].mxu0 %v10774_v50  ;;  %1936 = vmatmul.mubr.f32.gmra.mrb[4].mxu1 %v10774_v50  ;;  %v2909_v8 = vand.u32 4294901760, %v2908_v6 }
 0x134   :  { %1975 = vmatpush1.msra.mxu0 %v9125_v43  ;;  %2740 = vmatpush1.msra.mxu1 %v9129_v53 }
 0x135   :  { %7005 = vmatprep.subr.bf16.mxu0 %v10845_v29  ;;  %7053 = vmatprep.subr.bf16.mxu1 %v10846_v32  ;;  %v10852_v29 = vld [vmem:[#allocation15_spill] sm:$0xff]  ;;  %v2144_v32 = vand.u32 4294901760, %v2143_v18 }
 0x136   :  { %1176 = vmatprep.mubr.f32.mxu0 %v10733_v36  ;;  %1941 = vmatprep.mubr.f32.mxu1 %v10733_v36 }
 0x137   :  { %1178 = vmatmul.mubr.f32.gmra.mrb[6].mxu0 %v10780_v49  ;;  %1943 = vmatmul.mubr.f32.gmra.mrb[6].mxu1 %v10780_v49 }
 0x138   :  { %1183 = vmatprep.mubr.f32.mxu0 %v10733_v36  ;;  %1948 = vmatprep.mubr.f32.mxu1 %v10733_v36 }
 0x13b   :  { %1185 = vmatmul.mubr.f32.gmra.mrb[8].mxu0 %v10788_v42  ;;  %1950 = vmatmul.mubr.f32.gmra.mrb[8].mxu1 %v10788_v42 }
 0x13c   :  { %2030 = vmatprep.mubr.f32.mxu0 %v10733_v36  ;;  %2795 = vmatprep.mubr.f32.mxu1 %v10733_v36 }
 0x13f   :  { %2036 = vmatmul.mubr.f32.vlgmr.msra.gmra.mrb[10].mxu0 %v10847_v13  ;;  %2801 = vmatmul.mubr.f32.vlgmr.msra.gmra.mrb[10].mxu1 %v10847_v13  ;;  %v10853_v13 = vld [vmem:[#allocation23_spill] sm:$0xff] }
 0x140   :  { %7007 = vmatpush1.bf16.msra.mxu0 %v10848_v9  ;;  %7055 = vmatpush1.bf16.msra.mxu1 %v10849_v12  ;;  %v10854_v9 = vpack.c.bf16 %v8810_v17, %v8801_v28  ;;  %v10857_v12 = vld [vmem:[#allocation37_spill] sm:$0xff]  ;;  %v10858_v28 = vpack.c.bf16 %v8744_v25, %v8732_v44  ;;  %v10859_v17 = vpack.c.bf16 %v8804_v55, %v8767_v56  ;;  %v10862_v44 = vld [vmem:[#allocation40_spill] sm:$0xff]  ;;  %v10864_v56 = vld [vmem:[#allocation39_spill] sm:$0xff] }
 0x141   :  { %7009 = vmatprep.subr.bf16.mxu0 %v8924_v60  ;;  %7057 = vmatprep.subr.bf16.mxu1 %v10850_v57  ;;  %v2903_v60 = vand.u32 4294901760, %v2902_v48  ;;  %v10856_v48 = vld [vmem:[#allocation30_spill] sm:$0xff]  ;;  %v10863_v25 = vpack.c.bf16 %v10862_v44, %v8813_v24 }
 0x142   :  { %2041 = vmatprep.mubr.f32.mxu0 %v10733_v36  ;;  %2806 = vmatprep.mubr.f32.mxu1 %v10733_v36  ;;  %v10865_v55 = vld [vmem:[#allocation42_spill] sm:$0xff] }
 0x143   :  { %2047 = vmatmul.mubr.f32.gmra.mrb[12].mxu0 %v10851_v27  ;;  %2812 = vmatmul.mubr.f32.gmra.mrb[12].mxu1 %v10851_v27  ;;  %v10867_v24 = vld [vmem:[#allocation6_spill] sm:$0xff] }
 0x144   :  { %7011 = vmatpush1.bf16.msra.mxu0 %v10852_v29  ;;  %7059 = vmatpush1.bf16.msra.mxu1 %v8947_v30  ;;  %v10855_v30 = vpack.c.bf16 %v8826_v20, %v8817_v2  ;;  %v10860_v2 = vpack.c.bf16 %v8856_v31, %v8847_v47  ;;  %v10861_v20 = vpack.c.bf16 %v8870_v35, %v8860_v45  ;;  %v10868_v45 = vld [vmem:[#allocation7_spill] sm:$0xff]  ;;  %v10869_v31 = vld [vmem:[#allocation17_spill] sm:$0xff]  ;;  %v10872_v57 = vld [vmem:[#allocation18_spill] sm:$0xff] }
 0x145   :  { %2139 = vmatprep.subr.mxu0 %v2138_v63  ;;  %2904 = vmatprep.subr.mxu1 %v2903_v60  ;;  %v10866_v47 = vpack.c.bf16 %v10864_v56, %v10865_v55  ;;  %v10870_v35 = vld [vmem:[#allocation9_spill] sm:$0xff] }
 0x146   :  { %2052 = vmatprep.mubr.f32.mxu0 %v10733_v36  ;;  %2817 = vmatprep.mubr.f32.mxu1 %v10733_v36 }
 0x147   :  { %2058 = vmatmul.mubr.f32.gmra.mrb[14].mxu0 %v10853_v13  ;;  %2823 = vmatmul.mubr.f32.gmra.mrb[14].mxu1 %v10853_v13 }
 0x148   :  { %2145 = vmatpush1.msra.mxu0 %v2144_v32  ;;  %2910 = vmatpush1.msra.mxu1 %v2909_v8 }
 0x149   :  { %7013 = vmatprep.subr.bf16.mxu0 %v10854_v9  ;;  %7061 = vmatprep.subr.bf16.mxu1 %v10855_v30 }
 0x14a   :  { %2063 = vmatprep.mubr.f32.mxu0 %v10733_v36  ;;  %2828 = vmatprep.mubr.f32.mxu1 %v10733_v36 }
 0x14b   :  { %2069 = vmatmul.mubr.f32.gmra.mrb[16].mxu0 %v10856_v48  ;;  %2834 = vmatmul.mubr.f32.gmra.mrb[16].mxu1 %v10856_v48 }
 0x14c   :  { %2074 = vmatprep.mubr.f32.mxu0 %v10733_v36  ;;  %2839 = vmatprep.mubr.f32.mxu1 %v10733_v36 }
 0x14f   :  { %2080 = vmatmul.mubr.f32.gmra.mrb[18].mxu0 %v10857_v12  ;;  %2845 = vmatmul.mubr.f32.gmra.mrb[18].mxu1 %v10857_v12 }
 0x150   :  { %2200 = vmatprep.mubr.f32.mxu0 %v10733_v36  ;;  %2965 = vmatprep.mubr.f32.mxu1 %v10733_v36 }
 0x153   :  { %2202 = vmatmul.mubr.f32.vlgmr.msra.gmra.mrb[10].mxu0 %v10770_v33  ;;  %2967 = vmatmul.mubr.f32.vlgmr.msra.gmra.mrb[10].mxu1 %v10770_v33 }
 0x154   :  { %7015 = vmatpush1.bf16.msra.mxu0 %v10858_v28  ;;  %7063 = vmatpush1.bf16.msra.mxu1 %v10859_v17 }
 0x155   :  { %7017 = vmatprep.subr.bf16.mxu0 %v10860_v2  ;;  %7065 = vmatprep.subr.bf16.mxu1 %v10861_v20 }
 0x156   :  { %2207 = vmatprep.mubr.f32.mxu0 %v10733_v36  ;;  %2972 = vmatprep.mubr.f32.mxu1 %v10733_v36 }
 0x157   :  { %2209 = vmatmul.mubr.f32.gmra.mrb[12].mxu0 %v10771_v51  ;;  %2974 = vmatmul.mubr.f32.gmra.mrb[12].mxu1 %v10771_v51 }
 0x158   :  { %7019 = vmatpush1.bf16.msra.mxu0 %v10863_v25  ;;  %7067 = vmatpush1.bf16.msra.mxu1 %v10866_v47 }
 0x159   :  { %2262 = vmatprep.subr.mxu0 %v9140_v16  ;;  %3027 = vmatprep.subr.mxu1 %v9145_v46 }
 0x15a   :  { %2214 = vmatprep.mubr.f32.mxu0 %v10733_v36  ;;  %2979 = vmatprep.mubr.f32.mxu1 %v10733_v36 }
 0x15b   :  { %2216 = vmatmul.mubr.f32.gmra.mrb[14].mxu0 %v10774_v50  ;;  %2981 = vmatmul.mubr.f32.gmra.mrb[14].mxu1 %v10774_v50 }
 0x15c   :  { %2265 = vmatpush1.msra.mxu0 %v9149_v52  ;;  %3030 = vmatpush1.msra.mxu1 %v9154_v5 }
 0x15d   :  { %7021 = vmatprep.subr.bf16.mxu0 %v8808_v23  ;;  %7069 = vmatprep.subr.bf16.mxu1 %v8824_v3 }
 0x15e   :  { %2221 = vmatprep.mubr.f32.mxu0 %v10733_v36  ;;  %2986 = vmatprep.mubr.f32.mxu1 %v10733_v36 }
 0x15f   :  { %2223 = vmatmul.mubr.f32.gmra.mrb[16].mxu0 %v10780_v49  ;;  %2988 = vmatmul.mubr.f32.gmra.mrb[16].mxu1 %v10780_v49 }
 0x160   :  { %2228 = vmatprep.mubr.f32.mxu0 %v10733_v36  ;;  %2993 = vmatprep.mubr.f32.mxu1 %v10733_v36 }
 0x163   :  { %2230 = vmatmul.mubr.f32.gmra.mrb[18].mxu0 %v10788_v42  ;;  %2995 = vmatmul.mubr.f32.gmra.mrb[18].mxu1 %v10788_v42 }
 0x164   :  { %2320 = vmatprep.mubr.f32.mxu0 %v10733_v36  ;;  %3085 = vmatprep.mubr.f32.mxu1 %v10733_v36 }
 0x167   :  { %2323 = vmatmul.mubr.f32.vlgmr.msra.gmra.mrb[10].mxu0 %v10867_v24  ;;  %3088 = vmatmul.mubr.f32.vlgmr.msra.gmra.mrb[10].mxu1 %v10867_v24 }
 0x168   :  { %7023 = vmatpush1.bf16.msra.mxu0 %v10840_v11  ;;  %7071 = vmatpush1.bf16.msra.mxu1 %v8734_v1 }
 0x169   :  { %7025 = vmatprep.subr.bf16.mxu0 %v10841_v37  ;;  %7073 = vmatprep.subr.bf16.mxu1 %v10842_v10 }
 0x16a   :  { %2328 = vmatprep.mubr.f32.mxu0 %v10733_v36  ;;  %3093 = vmatprep.mubr.f32.mxu1 %v10733_v36 }
 0x16b   :  { %2331 = vmatmul.mubr.f32.gmra.mrb[12].mxu0 %v10868_v45  ;;  %3096 = vmatmul.mubr.f32.gmra.mrb[12].mxu1 %v10868_v45 }
 0x16c   :  { %7027 = vmatpush1.bf16.msra.mxu0 %v10843_v54  ;;  %7075 = vmatpush1.bf16.msra.mxu1 %v10844_v19 }
 0x16d   :  { %2378 = vmatprep.subr.mxu0 %v9115_v21  ;;  %3143 = vmatprep.subr.mxu1 %v9119_v39 }
 0x16e   :  { %2336 = vmatprep.mubr.f32.mxu0 %v10733_v36  ;;  %3101 = vmatprep.mubr.f32.mxu1 %v10733_v36 }
 0x16f   :  { %2339 = vmatmul.mubr.f32.gmra.mrb[14].mxu0 %v10815_v41  ;;  %3104 = vmatmul.mubr.f32.gmra.mrb[14].mxu1 %v10815_v41  ;;  %v10871_v41 = vld [vmem:[#allocation14_spill] sm:$0xff] }
 0x170   :  { %2380 = vmatpush1.msra.mxu0 %v9125_v43  ;;  %3145 = vmatpush1.msra.mxu1 %v9129_v53 }
 0x171   :  { %7029 = vmatprep.subr.bf16.mxu0 %v10869_v31  ;;  %7077 = vmatprep.subr.bf16.mxu1 %v10870_v35 }
 0x172   :  { %2344 = vmatprep.mubr.f32.mxu0 %v10733_v36  ;;  %3109 = vmatprep.mubr.f32.mxu1 %v10733_v36 }
 0x173   :  { %2347 = vmatmul.mubr.f32.gmra.mrb[16].mxu0 %v10826_v22  ;;  %3112 = vmatmul.mubr.f32.gmra.mrb[16].mxu1 %v10826_v22  ;;  %v10873_v22 = vld [vmem:[#allocation31_spill] sm:$0xff] }
 0x174   :  { %2352 = vmatprep.mubr.f32.mxu0 %v10733_v36  ;;  %3117 = vmatprep.mubr.f32.mxu1 %v10733_v36 }
 0x177   :  { %2355 = vmatmul.mubr.f32.gmra.mrb[18].mxu0 %v10827_v7  ;;  %3120 = vmatmul.mubr.f32.gmra.mrb[18].mxu1 %v10827_v7  ;;  %v9392_v7 = vpop.permute.xlu1 %391 }
 0x178   :  { %2435 = vmatprep.mubr.f32.mxu0 %v10733_v36  ;;  %3200 = vmatprep.mubr.f32.mxu1 %v10733_v36  ;;  %10874 = vst [vmem:[#allocation24_spill] sm:$0xff] %v9392_v7 }
 0x17b   :  { %2439 = vmatmul.mubr.f32.vlgmr.msra.gmra.mrb[10].mxu0 %v10828_v38  ;;  %3204 = vmatmul.mubr.f32.vlgmr.msra.gmra.mrb[10].mxu1 %v10828_v38  ;;  %v9425_v27 = vpop.permute.xlu1 %399 }
 0x17c   :  { %7031 = vmatpush1.bf16.msra.mxu0 %v10871_v41  ;;  %7079 = vmatpush1.bf16.msra.mxu1 %v10872_v57  ;;  %10880 = vst [vmem:[#allocation34_spill] sm:$0xff] %v9425_v27 }
 0x17d   :  { %7033 = vmatprep.subr.bf16.mxu0 %v10873_v22  ;;  %7081 = vmatprep.subr.bf16.mxu1 %v9005_v26 }
 0x17e   :  { %2444 = vmatprep.mubr.f32.mxu0 %v10733_v36  ;;  %3209 = vmatprep.mubr.f32.mxu1 %v10733_v36 }
 0x17f   :  { %2448 = vmatmul.mubr.f32.gmra.mrb[12].mxu0 %v10829_v40  ;;  %3213 = vmatmul.mubr.f32.gmra.mrb[12].mxu1 %v10829_v40  ;;  %v9449_v55 = vpop.permute.xlu1 %403 }
 0x180   :  { %7035 = vmatpush1.bf16.msra.mxu0 %v9009_v59  ;;  %7083 = vmatpush1.bf16.msra.mxu1 %v9017_v61  ;;  %v6898_v59 = vld [vmem:[%s10470_s2 + $0x40] sm:$0xff]  ;;  %v6899_v61 = vld [vmem:[%s10470_s2 + $0x48] sm:$0xff]  ;;  %10884 = vst [vmem:[#allocation11_spill] sm:$0xff] %v9449_v55 }
 0x181   :  { %2516 = vmatprep.subr.mxu0 %v2136_v0  ;;  %3281 = vmatprep.subr.mxu1 %v2901_v15 }
 0x182   :  { %2453 = vmatprep.mubr.f32.mxu0 %v10733_v36  ;;  %3218 = vmatprep.mubr.f32.mxu1 %v10733_v36 }
 0x183   :  { %2457 = vmatmul.mubr.f32.gmra.mrb[14].mxu0 %v10834_v14  ;;  %3222 = vmatmul.mubr.f32.gmra.mrb[14].mxu1 %v10834_v14  ;;  %v3562_v14 = vsel %vm410_vm0, %v6898_v59, 0 }
 0x184   :  { %2520 = vmatpush1.msra.mxu0 %v2142_v62  ;;  %3285 = vmatpush1.msra.mxu1 %v2907_v4  ;;  %v9411_v16 = vand.u32 4294901760, %v3562_v14 }
 0x185   :  { %7037 = vmatprep.subr.bf16.mxu0 %v8808_v23  ;;  %7085 = vmatprep.subr.bf16.mxu1 %v8824_v3  ;;  %v6897_v23 = vld [vmem:[%s10470_s2 + $0x38] sm:$0xff] }
 0x186   :  { %2462 = vmatprep.mubr.f32.mxu0 %v10733_v36  ;;  %3227 = vmatprep.mubr.f32.mxu1 %v10733_v36  ;;  %v9431_v32 = vsub.f32 %v3562_v14, %v9411_v16 }
 0x187   :  { %2466 = vmatmul.mubr.f32.gmra.mrb[16].mxu0 %v10837_v34  ;;  %3231 = vmatmul.mubr.f32.gmra.mrb[16].mxu1 %v10837_v34 }
 0x188   :  { %2471 = vmatprep.mubr.f32.mxu0 %v10733_v36  ;;  %3236 = vmatprep.mubr.f32.mxu1 %v10733_v36  ;;  %10881 = vst [vmem:[#allocation13_spill] sm:$0xff] %v9431_v32  ;;  %v9447_v56 = vand.u32 4294901760, %v9431_v32 }
 0x18a   :  { %10883 = vst [vmem:[#allocation10_spill] sm:$0xff] %v9447_v56 }
 0x18b   :  { %2475 = vmatmul.mubr.f32.gmra.mrb[18].mxu0 %v10838_v58  ;;  %3240 = vmatmul.mubr.f32.gmra.mrb[18].mxu1 %v10838_v58 }
 0x18c   :  { %2575 = vmatprep.mubr.f32.mxu0 %v10733_v36  ;;  %3340 = vmatprep.mubr.f32.mxu1 %v10733_v36 }
 0x18f   :  { %2577 = vmatmul.mubr.f32.vlgmr.msra.gmra.mrb[10].mxu0 %v10770_v33  ;;  %3342 = vmatmul.mubr.f32.vlgmr.msra.gmra.mrb[10].mxu1 %v10770_v33 }
 0x190   :  { %7039 = vmatpush1.bf16.msra.mxu0 %v10840_v11  ;;  %7087 = vmatpush1.bf16.msra.mxu1 %v8734_v1  ;;  %v6895_v1 = vld [vmem:[%s10470_s2 + $0x28] sm:$0xff] }
 0x191   :  { %7041 = vmatprep.subr.bf16.mxu0 %v10841_v37  ;;  %7089 = vmatprep.subr.bf16.mxu1 %v10842_v10 }
 0x192   :  { %2582 = vmatprep.mubr.f32.mxu0 %v10733_v36  ;;  %3347 = vmatprep.mubr.f32.mxu1 %v10733_v36 }
 0x193   :  { %2584 = vmatmul.mubr.f32.gmra.mrb[12].mxu0 %v10771_v51  ;;  %3349 = vmatmul.mubr.f32.gmra.mrb[12].mxu1 %v10771_v51 }
 0x194   :  { %7043 = vmatpush1.bf16.msra.mxu0 %v10843_v54  ;;  %7091 = vmatpush1.bf16.msra.mxu1 %v10844_v19 }
 0x195   :  { %2628 = vmatprep.subr.mxu0 %v9115_v21  ;;  %3393 = vmatprep.subr.mxu1 %v9119_v39  ;;  %v3565_v21 = vsel %vm410_vm0, %v6899_v61, 0 }
 0x196   :  { %2589 = vmatprep.mubr.f32.mxu0 %v10733_v36  ;;  %3354 = vmatprep.mubr.f32.mxu1 %v10733_v36  ;;  %v9416_v0 = vand.u32 4294901760, %v3565_v21 }
 0x197   :  { %2591 = vmatmul.mubr.f32.gmra.mrb[14].mxu0 %v10774_v50  ;;  %3356 = vmatmul.mubr.f32.gmra.mrb[14].mxu1 %v10774_v50 }
 0x198   :  { %2630 = vmatpush1.msra.mxu0 %v9125_v43  ;;  %3395 = vmatpush1.msra.mxu1 %v9129_v53  ;;  %v9408_v43 = vpop.permute.xlu0 %395  ;;  %v9436_v9 = vsub.f32 %v3565_v21, %v9416_v0 }
 0x199   :  { %2596 = vmatprep.mubr.f32.mxu0 %v10733_v36  ;;  %3361 = vmatprep.mubr.f32.mxu1 %v10733_v36  ;;  %10876 = vst [vmem:[#allocation29_spill] sm:$0xff] %v9408_v43 }
 0x19a   :  { %10882 = vst [vmem:[#allocation20_spill] sm:$0xff] %v9436_v9  ;;  %v9454_v45 = vand.u32 4294901760, %v9436_v9 }
 0x19b   :  { %2598 = vmatmul.mubr.f32.gmra.mrb[16].mxu0 %v10780_v49  ;;  %3363 = vmatmul.mubr.f32.gmra.mrb[16].mxu1 %v10780_v49 }
 0x19c   :  { %2603 = vmatprep.mubr.f32.mxu0 %v10733_v36  ;;  %3368 = vmatprep.mubr.f32.mxu1 %v10733_v36  ;;  %10886 = vst [vmem:[#allocation44_spill] sm:$0xff] %v9454_v45 }
 0x19f   :  { %2605 = vmatmul.mubr.f32.gmra.mrb[18].mxu0 %v10788_v42  ;;  %3370 = vmatmul.mubr.f32.gmra.mrb[18].mxu1 %v10788_v42 }
 0x1a0   :  { %2685 = vmatprep.mubr.f32.mxu0 %v10733_v36  ;;  %3450 = vmatprep.mubr.f32.mxu1 %v10733_v36 }
 0x1a3   :  { %2687 = vmatmul.mubr.f32.vlgmr.msra.gmra.mrb[10].mxu0 %v10770_v33  ;;  %3452 = vmatmul.mubr.f32.vlgmr.msra.gmra.mrb[10].mxu1 %v10770_v33  ;;  %v6896_v33 = vld [vmem:[%s10470_s2 + $0x30] sm:$0xff] }
 0x1a4   :  { %2692 = vmatprep.mubr.f32.mxu0 %v10733_v36  ;;  %3457 = vmatprep.mubr.f32.mxu1 %v10733_v36  ;;  %v3556_v3 = vsel %vm410_vm0, %v6896_v33, 0 }
 0x1a7   :  { %2694 = vmatmul.mubr.f32.gmra.mrb[12].mxu0 %v10771_v51  ;;  %3459 = vmatmul.mubr.f32.gmra.mrb[12].mxu1 %v10771_v51  ;;  %v3553_v51 = vsel %vm410_vm0, %v6895_v1, 0 }
 0x1a8   :  { %2699 = vmatprep.mubr.f32.mxu0 %v10733_v36  ;;  %3464 = vmatprep.mubr.f32.mxu1 %v10733_v36 }
 0x1ab   :  { %2701 = vmatmul.mubr.f32.gmra.mrb[14].mxu0 %v10774_v50  ;;  %3466 = vmatmul.mubr.f32.gmra.mrb[14].mxu1 %v10774_v50  ;;  %v3559_v50 = vsel %vm410_vm0, %v6897_v23, 0 }
 0x1ac   :  { %2706 = vmatprep.mubr.f32.mxu0 %v10733_v36  ;;  %3471 = vmatprep.mubr.f32.mxu1 %v10733_v36  ;;  %v9384_v26 = vand.u32 4294901760, %v3559_v50 }
 0x1ae   :  { %v9403_v10 = vsub.f32 %v3559_v50, %v9384_v26 }
 0x1af   :  { %2708 = vmatmul.mubr.f32.gmra.mrb[16].mxu0 %v10780_v49  ;;  %3473 = vmatmul.mubr.f32.gmra.mrb[16].mxu1 %v10780_v49  ;;  %v9380_v49 = vand.u32 4294901760, %v3553_v51 }
 0x1b0   :  { %2713 = vmatprep.mubr.f32.mxu0 %v10733_v36  ;;  %3478 = vmatprep.mubr.f32.mxu1 %v10733_v36  ;;  %10875 = vst [vmem:[#allocation33_spill] sm:$0xff] %v9403_v10  ;;  %v9423_v18 = vand.u32 4294901760, %v9403_v10 }
 0x1b1   :  { %v9395_v40 = vsub.f32 %v3553_v51, %v9380_v49 }
 0x1b2   :  { %10879 = vst [vmem:[#allocation25_spill] sm:$0xff] %v9423_v18  ;;  %v3667_v17 = vsub.f32 %v9403_v10, %v9423_v18 }
 0x1b3   :  { %2715 = vmatmul.mubr.f32.gmra.mrb[18].mxu0 %v10788_v42  ;;  %3480 = vmatmul.mubr.f32.gmra.mrb[18].mxu1 %v10788_v42  ;;  %v9382_v42 = vand.u32 4294901760, %v3556_v3  ;;  %v9414_v52 = vand.u32 4294901760, %v9395_v40 }
 0x1b4   :  { %3641 = vmatprep.mubr.f32.mxu0 %v10733_v36  ;;  %4406 = vmatprep.mubr.f32.mxu1 %v10733_v36  ;;  %v9459_v1 = vand.u32 4294901760, %v3667_v17 }
 0x1b5   :  { %v9400_v37 = vsub.f32 %v3556_v3, %v9382_v42  ;;  %10877 = vst [vmem:[#allocation32_spill] sm:$0xff] %v9414_v52  ;;  %v3645_v8 = vsub.f32 %v9395_v40, %v9414_v52 }
 0x1b6   :  { %10888 = vst [vmem:[#allocation19_spill] sm:$0xff] %v9459_v1 }
 0x1b7   :  { %v9420_v4 = vand.u32 4294901760, %v9400_v37  ;;  %v9451_v24 = vand.u32 4294901760, %v3645_v8 }
 0x1b9   :  { %10878 = vst [vmem:[#allocation8_spill] sm:$0xff] %v9420_v4  ;;  %v3656_v28 = vsub.f32 %v9400_v37, %v9420_v4  ;;  %10885 = vst [vmem:[#allocation43_spill] sm:$0xff] %v9451_v24 }
 0x1bb   :  { %v9457_v22 = vand.u32 4294901760, %v3656_v28 }
 0x1bd   :  { %10887 = vst [vmem:[#allocation12_spill] sm:$0xff] %v9457_v22 }
 0x1fe   :  { %v1158_v38 = vpop.f32.mrb[0].mxu0  ;;  %v1923_v58 = vpop.f32.mrb[0].mxu1 }
 0x1ff   :  { %v7284_v34 = vadd.f32 %v1158_v38, %v9392_v7  ;;  %v1160_v11 = vpop.f32.mrb[1].mxu0  ;;  %v7294_v54 = vadd.f32 %v1923_v58, %v9392_v7  ;;  %v1925_v19 = vpop.f32.mrb[1].mxu1 }
 0x200   :  { %v7285_v39 = vadd.f32 %v1160_v11, %v9392_v7  ;;  %v7295_v53 = vadd.f32 %v1925_v19, %v9392_v7  ;;  %v9466_v58 = vpop.permute.xlu0 %407 }
 0x201   :  { %7864 = vtanh.f32 %v7284_v34  ;;  %10889 = vst [vmem:[#allocation26_spill] sm:$0xff] %v9466_v58 }
 0x202   :  { %7866 = vtanh.f32 %v7294_v54  ;;  %v1165_v46 = vpop.f32.mrb[2].mxu0  ;;  %v1930_v15 = vpop.f32.mrb[2].mxu1 }
 0x203   :  { %7868 = vtanh.f32 %v7285_v39  ;;  %v7286_v5 = vadd.f32 %v1165_v46, %v9408_v43  ;;  %v1167_v62 = vpop.f32.mrb[3].mxu0  ;;  %v7296_v63 = vadd.f32 %v1930_v15, %v9408_v43  ;;  %v1932_v29 = vpop.f32.mrb[3].mxu1 }
 0x204   :  { %7870 = vtanh.f32 %v7295_v53  ;;  %v7287_v6 = vadd.f32 %v1167_v62, %v9408_v43  ;;  %v7297_v60 = vadd.f32 %v1932_v29, %v9408_v43 }
 0x205   :  { %7872 = vtanh.f32 %v7286_v5 }
 0x206   :  { %7874 = vtanh.f32 %v7296_v63  ;;  %v1172_v13 = vpop.f32.mrb[4].mxu0  ;;  %v1937_v48 = vpop.f32.mrb[4].mxu1 }
 0x207   :  { %7876 = vtanh.f32 %v7287_v6  ;;  %v7288_v30 = vadd.f32 %v1172_v13, %v9425_v27  ;;  %v1174_v12 = vpop.f32.mrb[5].mxu0  ;;  %v7298_v2 = vadd.f32 %v1937_v48, %v9425_v27  ;;  %v1939_v44 = vpop.f32.mrb[5].mxu1 }
 0x208   :  { %7878 = vtanh.f32 %v7297_v60  ;;  %v7289_v20 = vadd.f32 %v1174_v12, %v9425_v27  ;;  %v7299_v25 = vadd.f32 %v1939_v44, %v9425_v27 }
 0x209   :  { %7880 = vtanh.f32 %v7288_v30 }
 0x20a   :  { %7882 = vtanh.f32 %v7298_v2  ;;  %v1179_v47 = vpop.f32.mrb[6].mxu0  ;;  %v1944_v41 = vpop.f32.mrb[6].mxu1 }
 0x20b   :  { %v7865_v31 = vpop.eup %7864  ;;  %7884 = vtanh.f32 %v7289_v20  ;;  %v7290_v35 = vadd.f32 %v1179_v47, %v9449_v55  ;;  %v1181_v57 = vpop.f32.mrb[7].mxu0  ;;  %v7300_v23 = vadd.f32 %v1944_v41, %v9449_v55 }
 0x20c   :  { %v7867_v33 = vpop.eup %7866  ;;  %7886 = vtanh.f32 %v7299_v25  ;;  %v7291_v51 = vadd.f32 %v1181_v57, %v9449_v55  ;;  %v1946_v3 = vpop.f32.mrb[7].mxu1  ;;  %v3569_v50 = vand.u32 4294901760, %v7865_v31 }
 0x20d   :  { %v7869_v59 = vpop.eup %7868  ;;  %7888 = vtanh.f32 %v7290_v35  ;;  %v7301_v61 = vadd.f32 %v1946_v3, %v9449_v55  ;;  %v4334_v38 = vand.u32 4294901760, %v7867_v33 }
 0x20e   :  { %v7871_v34 = vpop.eup %7870  ;;  %7890 = vtanh.f32 %v7300_v23  ;;  %v1186_v11 = vpop.f32.mrb[8].mxu0  ;;  %v3567_v21 = vand.u32 4294901760, %v7869_v59  ;;  %v9468_v54 = vsub.f32 %v7865_v31, %v3569_v50 }
 0x20f   :  { %v7873_v19 = vpop.eup %7872  ;;  %7892 = vtanh.f32 %v7291_v51  ;;  %v7292_v53 = vadd.f32 %v1186_v11, %v9466_v58  ;;  %v1951_v46 = vpop.f32.mrb[8].mxu1  ;;  %v4332_v15 = vand.u32 4294901760, %v7871_v34  ;;  %v9473_v62 = vsub.f32 %v7867_v33, %v4334_v38 }
 0x210   :  { %v1188_v5 = vpop.f32.mrb[9].mxu0  ;;  %v7875_v63 = vpop.eup %7874  ;;  %7894 = vtanh.f32 %v7301_v61  ;;  %v7302_v6 = vadd.f32 %v1951_v46, %v9466_v58  ;;  %v9477_v13 = vsub.f32 %v7869_v59, %v3567_v21  ;;  %v3573_v12 = vand.u32 4294901760, %v7873_v19 }
 0x211   :  { %v7293_v29 = vadd.f32 %v1188_v5, %v9466_v58  ;;  %v1953_v60 = vpop.f32.mrb[9].mxu1  ;;  %v7877_v8 = vpop.eup %7876  ;;  %7896 = vtanh.f32 %v7292_v53  ;;  %v9480_v48 = vsub.f32 %v7871_v34, %v4332_v15  ;;  %v4338_v2 = vand.u32 4294901760, %v7875_v63 }
 0x212   :  { %v7303_v30 = vadd.f32 %v1953_v60, %v9466_v58  ;;  %v7879_v28 = vpop.eup %7878  ;;  %7898 = vtanh.f32 %v7302_v6  ;;  %v3571_v17 = vand.u32 4294901760, %v7877_v8  ;;  %v10582_v20 = vand.u32 4294901760, %v9477_v13 }
 0x213   :  { %v7881_v44 = vpop.eup %7880  ;;  %7900 = vtanh.f32 %v7293_v29  ;;  %v4336_v25 = vand.u32 4294901760, %v7879_v28  ;;  %v9483_v47 = vpack.c.bf16 %v3573_v12, %v3569_v50  ;;  %v9485_v31 = vsub.f32 %v7873_v19, %v3573_v12 }
 0x214   :  { %v7883_v35 = vpop.eup %7882  ;;  %7902 = vtanh.f32 %v7303_v30  ;;  %v9487_v41 = vpack.c.bf16 %v3571_v17, %v3567_v21  ;;  %v9489_v57 = vsub.f32 %v7877_v8, %v3571_v17  ;;  %v9491_v33 = vpack.c.bf16 %v4338_v2, %v4334_v38 }
 0x215   :  { %v7885_v23 = vpop.eup %7884  ;;  %v9493_v51 = vpack.c.bf16 %v4336_v25, %v4332_v15  ;;  %v9495_v3 = vsub.f32 %v7879_v28, %v4336_v25  ;;  %v9497_v59 = vsub.f32 %v7875_v63, %v4338_v2  ;;  %v3577_v61 = vand.u32 4294901760, %v7881_v44 }
 0x216   :  { %v7887_v50 = vpop.eup %7886  ;;  %7093 = vmatprep.subr.bf16.mxu0 %v9487_v41  ;;  %v3575_v34 = vand.u32 4294901760, %v7885_v23  ;;  %v4342_v11 = vand.u32 4294901760, %v7883_v35  ;;  %v3700_v21 = vsub.f32 %v9477_v13, %v10582_v20  ;;  %v10583_v38 = vand.u32 4294901760, %v9489_v57 }
 0x217   :  { %v7889_v19 = vpop.eup %7888  ;;  %7141 = vmatprep.subr.bf16.mxu1 %v9493_v51  ;;  %7095 = vmatpush1.bf16.msra.mxu0 %v9483_v47  ;;  %v4340_v53 = vand.u32 4294901760, %v7887_v50  ;;  %v9506_v46 = vsub.f32 %v7881_v44, %v3577_v61  ;;  %v10586_v5 = vand.u32 4294901760, %v9480_v48  ;;  %v10589_v15 = vand.u32 4294901760, %v9495_v3 }
 0x218   :  { %v7891_v63 = vpop.eup %7890  ;;  %7143 = vmatpush1.bf16.msra.mxu1 %v9491_v33  ;;  %v9511_v6 = vsub.f32 %v7885_v23, %v3575_v34  ;;  %v3581_v29 = vand.u32 4294901760, %v7889_v19  ;;  %v9513_v60 = vsub.f32 %v7883_v35, %v4342_v11  ;;  %v3701_v8 = vand.u32 4294901760, %v3700_v21 }
 0x219   :  { %v7893_v30 = vpop.eup %7892  ;;  %v9515_v12 = vsub.f32 %v7887_v50, %v4340_v53  ;;  %v4346_v28 = vand.u32 4294901760, %v7891_v63  ;;  %v3712_v17 = vsub.f32 %v9489_v57, %v10583_v38  ;;  %v4465_v2 = vsub.f32 %v9480_v48, %v10586_v5 }
 0x21a   :  { %v7895_v44 = vpop.eup %7894  ;;  %v3579_v25 = vand.u32 4294901760, %v7893_v30  ;;  %v9523_v23 = vpack.c.bf16 %v3581_v29, %v3577_v61  ;;  %v9525_v39 = vsub.f32 %v7889_v19, %v3581_v29  ;;  %v4477_v35 = vsub.f32 %v9495_v3, %v10589_v15 }
 0x21b   :  { %v9530_v50 = vpop.eup %7896  ;;  %v4344_v21 = vand.u32 4294901760, %v7895_v44  ;;  %v9532_v20 = vpack.c.bf16 %v4346_v28, %v4342_v11  ;;  %v9534_v38 = vsub.f32 %v7891_v63, %v4346_v28  ;;  %v3713_v14 = vand.u32 4294901760, %v3712_v17 }
 0x21c   :  { %10890 = vst [vmem:[#allocation16_spill] sm:$0xff] %v9523_v23  ;;  %v9536_v58 = vpop.eup %7898  ;;  %v9538_v5 = vpack.c.bf16 %v3579_v25, %v3575_v34  ;;  %v9540_v61 = vsub.f32 %v7893_v30, %v3579_v25  ;;  %v9543_v19 = vand.u32 4294901760, %v9530_v50  ;;  %v4466_v29 = vand.u32 4294901760, %v4465_v2 }
 0x21d   :  { %10891 = vst [vmem:[#allocation45_spill] sm:$0xff] %v9532_v20  ;;  %v7901_v55 = vpop.eup %7900  ;;  %v9545_v15 = vpack.c.bf16 %v4344_v21, %v4340_v53  ;;  %v9547_v27 = vsub.f32 %v7895_v44, %v4344_v21  ;;  %v9550_v11 = vand.u32 4294901760, %v9536_v58  ;;  %v7100_v63 = vpack.c.bf16 %v3713_v14, %v3701_v8 }
 0x21e   :  { %v7903_v28 = vpop.eup %7902  ;;  %7097 = vmatprep.subr.bf16.mxu0 %v9538_v5  ;;  %v9553_v34 = vand.u32 4294901760, %v7901_v55  ;;  %v4478_v30 = vand.u32 4294901760, %v4477_v35  ;;  %v10594_v17 = vand.u32 4294901760, %v9468_v54  ;;  %v10599_v25 = vand.u32 4294901760, %v9485_v31 }
 0x21f   :  { %7145 = vmatprep.subr.bf16.mxu1 %v9545_v15  ;;  %7099 = vmatpush1.bf16.msra.mxu0 %v9523_v23  ;;  %v9559_v53 = vand.u32 4294901760, %v7903_v28  ;;  %v10604_v2 = vand.u32 4294901760, %v9473_v62  ;;  %v10609_v14 = vand.u32 4294901760, %v9497_v59  ;;  %v10610_v43 = vand.u32 4294901760, %v9540_v61 }
 0x220   :  { %7147 = vmatpush1.bf16.msra.mxu1 %v9532_v20  ;;  %3584 = vmatprep.subr.mxu0 %v9553_v34  ;;  %v7148_v44 = vpack.c.bf16 %v4478_v30, %v4466_v29  ;;  %v3706_v35 = vsub.f32 %v9468_v54, %v10594_v17  ;;  %v3718_v21 = vsub.f32 %v9485_v31, %v10599_v25  ;;  %v10892_v30 = vand.u32 4294901760, %v9511_v6 }
 0x221   :  { %4349 = vmatprep.subr.mxu1 %v9559_v53  ;;  %v4471_v8 = vsub.f32 %v9473_v62, %v10604_v2  ;;  %v4483_v29 = vsub.f32 %v9497_v59, %v10609_v14  ;;  %v10611_v7 = vand.u32 4294901760, %v9515_v12  ;;  %v3736_v4 = vsub.f32 %v9540_v61, %v10610_v43 }
 0x222   :  { %v3724_v17 = vsub.f32 %v9511_v6, %v10892_v30  ;;  %v3707_v18 = vand.u32 4294901760, %v3706_v35  ;;  %v3719_v25 = vand.u32 4294901760, %v3718_v21  ;;  %v10622_v52 = vand.u32 4294901760, %v9547_v27 }
 0x223   :  { %3586 = vmatpush1.msra.mxu0 %v9543_v19  ;;  %v4472_v2 = vand.u32 4294901760, %v4471_v8  ;;  %v4484_v10 = vand.u32 4294901760, %v4483_v29  ;;  %v4489_v14 = vsub.f32 %v9515_v12, %v10611_v7  ;;  %v3737_v21 = vand.u32 4294901760, %v3736_v4 }
 0x224   :  { %v3725_v23 = vand.u32 4294901760, %v3724_v17  ;;  %4351 = vmatpush1.msra.mxu1 %v9550_v11  ;;  %3647 = vmatmul.mubr.f32.vlgmr.msra.gmra.mrb[20].mxu0 %v9451_v24  ;;  %v7102_v35 = vpack.c.bf16 %v3719_v25, %v3707_v18  ;;  %v4501_v30 = vsub.f32 %v9547_v27, %v10622_v52  ;;  %v10620_v43 = vand.u32 4294901760, %v9506_v46 }
 0x225   :  { %7101 = vmatprep.subr.bf16.mxu0 %v7100_v63  ;;  %4412 = vmatmul.mubr.f32.vlgmr.msra.gmra.mrb[20].mxu1 %v9451_v24  ;;  %v7150_v17 = vpack.c.bf16 %v4484_v10, %v4472_v2  ;;  %v4490_v8 = vand.u32 4294901760, %v4489_v14  ;;  %v10619_v29 = vand.u32 4294901760, %v9525_v39  ;;  %v10618_v7 = vand.u32 4294901760, %v9513_v60 }
 0x226   :  { %7149 = vmatprep.subr.bf16.mxu1 %v7148_v44  ;;  %7103 = vmatpush1.bf16.msra.mxu0 %v7102_v35  ;;  %v7104_v20 = vpack.c.bf16 %v3737_v21, %v3725_v23  ;;  %v4502_v18 = vand.u32 4294901760, %v4501_v30  ;;  %v3730_v4 = vsub.f32 %v9506_v46, %v10620_v43  ;;  %v10614_v25 = vand.u32 4294901760, %v9534_v38 }
 0x227   :  { %7151 = vmatpush1.bf16.msra.mxu1 %v7150_v17  ;;  %3652 = vmatprep.mubr.f32.mxu0 %v10733_v36  ;;  %v3742_v10 = vsub.f32 %v9525_v39, %v10619_v29  ;;  %v4495_v63 = vsub.f32 %v9513_v60, %v10618_v7  ;;  %v9613_v23 = vsub.f32 %v7901_v55, %v9553_v34  ;;  %v10895_v29 = vand.u32 4294901760, %v9489_v57 }
 0x228   :  { %v10893_v2 = vsub.f32 %v9431_v32, %v9447_v56  ;;  %7105 = vmatprep.subr.bf16.mxu0 %v7104_v20  ;;  %v7152_v44 = vpack.c.bf16 %v4502_v18, %v4490_v8  ;;  %4417 = vmatprep.mubr.f32.mxu1 %v10733_v36  ;;  %v3731_v35 = vand.u32 4294901760, %v3730_v4  ;;  %v4507_v21 = vsub.f32 %v9534_v38, %v10614_v25 }
 0x229   :  { %v9625_v30 = vsub.f32 %v7903_v28, %v9559_v53  ;;  %3658 = vmatmul.mubr.f32.gmra.mrb[22].mxu0 %v9457_v22  ;;  %4423 = vmatmul.mubr.f32.gmra.mrb[22].mxu1 %v9457_v22  ;;  %v3743_v55 = vand.u32 4294901760, %v3742_v10  ;;  %v4496_v17 = vand.u32 4294901760, %v4495_v63  ;;  %v9632_v20 = vsub.f32 %v9530_v50, %v9543_v19 }
 0x22a   :  { %v9618_v14 = vand.u32 4294901760, %v10893_v2  ;;  %v10615_v2 = vand.u32 4294901760, %v9613_v23  ;;  %7153 = vmatprep.subr.bf16.mxu1 %v7152_v44  ;;  %v4508_v8 = vand.u32 4294901760, %v4507_v21  ;;  %3663 = vmatprep.mubr.f32.mxu0 %v10733_v36  ;;  %v9638_v28 = vsub.f32 %v9536_v58, %v9550_v11 }
 0x22b   :  { %v10616_v18 = vand.u32 4294901760, %v9625_v30  ;;  %v7108_v4 = vpack.c.bf16 %v9489_v57, %v9477_v13  ;;  %v7106_v10 = vpack.c.bf16 %v3743_v55, %v3731_v35  ;;  %4428 = vmatprep.mubr.f32.mxu1 %v10733_v36  ;;  %v10617_v50 = vand.u32 4294901760, %v9632_v20 }
 0x22c   :  { %v3748_v63 = vsub.f32 %v9613_v23, %v10615_v2  ;;  %v7156_v44 = vpack.c.bf16 %v9495_v3, %v9480_v48  ;;  %v7154_v21 = vpack.c.bf16 %v4508_v8, %v4496_v17  ;;  %v10621_v25 = vand.u32 4294901760, %v9638_v28 }
 0x22d   :  { %v4513_v58 = vsub.f32 %v9625_v30, %v10616_v18  ;;  %v7110_v35 = vpack.c.bf16 %v9485_v31, %v9468_v54  ;;  %7107 = vmatpush1.bf16.msra.mxu0 %v7106_v10  ;;  %4434 = vmatmul.mubr.f32.gmra.mrb[24].mxu1 %v9459_v1  ;;  %v3754_v2 = vsub.f32 %v9632_v20, %v10617_v50  ;;  %v10897_v52 = vand.u32 4294901760, %v9495_v3 }
 0x22e   :  { %v3749_v55 = vand.u32 4294901760, %v3748_v63  ;;  %v7158_v17 = vpack.c.bf16 %v9497_v59, %v9473_v62  ;;  %v7112_v8 = vpack.c.bf16 %v9540_v61, %v9511_v6  ;;  %7155 = vmatpush1.bf16.msra.mxu1 %v7154_v21  ;;  %3669 = vmatmul.mubr.f32.gmra.mrb[24].mxu0 %v9459_v1  ;;  %v4519_v10 = vsub.f32 %v9638_v28, %v10621_v25 }
 0x22f   :  { %v4514_v18 = vand.u32 4294901760, %v4513_v58  ;;  %v7160_v63 = vpack.c.bf16 %v9547_v27, %v9515_v12  ;;  %v7114_v50 = vpack.c.bf16 %v9525_v39, %v9506_v46  ;;  %v3755_v7 = vand.u32 4294901760, %v3754_v2  ;;  %3674 = vmatprep.mubr.f32.mxu0 %v10733_v36  ;;  %4439 = vmatprep.mubr.f32.mxu1 %v10733_v36 }
 0x230   :  { %3750 = vmatprep.subr.mxu0 %v3749_v55  ;;  %v7162_v21 = vpack.c.bf16 %v9534_v38, %v9513_v60  ;;  %v10894_v58 = vand.u32 4294901760, %v9477_v13  ;;  %v10896_v25 = vand.u32 4294901760, %v9480_v48  ;;  %v4520_v55 = vand.u32 4294901760, %v4519_v10 }
 0x231   :  { %4515 = vmatprep.subr.mxu1 %v4514_v18  ;;  %v10898_v2 = vand.u32 4294901760, %v9468_v54  ;;  %v10899_v22 = vand.u32 4294901760, %v9485_v31  ;;  %v10900_v13 = vand.u32 4294901760, %v9473_v62  ;;  %v10901_v57 = vand.u32 4294901760, %v9497_v59  ;;  %3756 = vmatpush1.msra.mxu0 %v3755_v7 }
 0x232   :  { %v9678_v43 = vpack.c.bf16 %v10895_v29, %v10894_v58  ;;  %v9684_v1 = vpack.c.bf16 %v10897_v52, %v10896_v25  ;;  %v10902_v48 = vand.u32 4294901760, %v9511_v6  ;;  %v10903_v52 = vand.u32 4294901760, %v9540_v61  ;;  %4445 = vmatmul.mubr.f32.gmra.mrb[26].mxu1 %v9618_v14  ;;  %7109 = vmatprep.subr.bf16.mxu0 %v7108_v4  ;;  %v10918_v4 = vld [vmem:[#allocation25_spill] sm:$0xff] }
 0x233   :  { %v9691_v24 = vpack.c.bf16 %v10899_v22, %v10898_v2  ;;  %v9697_v29 = vpack.c.bf16 %v10901_v57, %v10900_v13  ;;  %v10904_v54 = vsub.f32 %v9436_v9, %v9454_v45  ;;  %v10905_v62 = vand.u32 4294901760, %v9515_v12  ;;  %4521 = vmatpush1.msra.mxu1 %v4520_v55  ;;  %3680 = vmatmul.mubr.f32.gmra.mrb[26].mxu0 %v9618_v14 }
 0x234   :  { %v9703_v3 = vpack.c.bf16 %v10903_v52, %v10902_v48  ;;  %v10906_v31 = vand.u32 4294901760, %v9547_v27  ;;  %v10907_v6 = vand.u32 4294901760, %v9506_v46  ;;  %v10908_v61 = vand.u32 4294901760, %v9525_v39  ;;  %7157 = vmatprep.subr.bf16.mxu1 %v7156_v44  ;;  %3685 = vmatprep.mubr.f32.mxu0 %v10733_v36  ;;  %v10911_v27 = vld [vmem:[#allocation45_spill] sm:$0xff]  ;;  %v10912_v39 = vld [vmem:[#allocation16_spill] sm:$0xff]  ;;  %v6667_v52 = vld [vmem:[%s10472_s3] sm:$0xff] }
 0x235   :  { %v9709_v22 = vand.u32 4294901760, %v10904_v54  ;;  %v10909_v7 = vand.u32 4294901760, %v9513_v60  ;;  %v10910_v18 = vand.u32 4294901760, %v9534_v38  ;;  %4450 = vmatprep.mubr.f32.mxu1 %v10733_v36  ;;  %v10913_v38 = vld [vmem:[#allocation33_spill] sm:$0xff]  ;;  %v10914_v46 = vld [vmem:[#allocation32_spill] sm:$0xff]  ;;  %v10916_v12 = vand.u32 4294901760, %v9625_v30 }
 0x236   :  { %v9715_v59 = vpack.c.bf16 %v10906_v31, %v10905_v62  ;;  %v9721_v25 = vpack.c.bf16 %v10908_v61, %v10907_v6  ;;  %v10915_v60 = vld [vmem:[#allocation8_spill] sm:$0xff]  ;;  %v10924_v31 = vmov 0   ;;  %v6668_v61 = vld [vmem:[%s10472_s3 + $0x8] sm:$0xff] }
 0x237   :  { %v9727_v10 = vpack.c.bf16 %v10910_v18, %v10909_v7  ;;  %4456 = vmatmul.mubr.f32.gmra.mrb[28].mxu1 %v9709_v22  ;;  %3691 = vmatmul.mubr.f32.gmra.mrb[28].mxu0 %v9709_v22  ;;  %v10921_v44 = vld [vmem:[#allocation24_spill] sm:$0xff] }
 0x238   :  { %4576 = vmatprep.mubr.f32.mxu1 %v10733_v36  ;;  %3811 = vmatprep.mubr.f32.mxu0 %v10733_v36 }
 0x23b   :  { %4578 = vmatmul.mubr.f32.vlgmr.msra.gmra.mrb[20].mxu1 %v9380_v49  ;;  %3813 = vmatmul.mubr.f32.vlgmr.msra.gmra.mrb[20].mxu0 %v9380_v49 }
 0x23c   :  { %7159 = vmatpush1.bf16.msra.mxu1 %v7158_v17  ;;  %4583 = vmatprep.mubr.f32.mxu1 %v10733_v36 }
 0x23d   :  { %7161 = vmatprep.subr.bf16.mxu1 %v7160_v63  ;;  %7111 = vmatpush1.bf16.msra.mxu0 %v7110_v35 }
 0x23e   :  { %3818 = vmatprep.mubr.f32.mxu0 %v10733_v36  ;;  %7113 = vmatprep.subr.bf16.mxu0 %v7112_v8 }
 0x23f   :  { %4585 = vmatmul.mubr.f32.gmra.mrb[22].mxu1 %v9382_v42  ;;  %3820 = vmatmul.mubr.f32.gmra.mrb[22].mxu0 %v9382_v42 }
 0x240   :  { %7163 = vmatpush1.bf16.msra.mxu1 %v7162_v21  ;;  %4590 = vmatprep.mubr.f32.mxu1 %v10733_v36 }
 0x241   :  { %4638 = vmatprep.subr.mxu1 %v9625_v30  ;;  %7115 = vmatpush1.bf16.msra.mxu0 %v7114_v50  ;;  %v10919_v50 = vand.u32 4294901760, %v9638_v28  ;;  %v10920_v30 = vand.u32 4294901760, %v9632_v20 }
 0x242   :  { %3825 = vmatprep.mubr.f32.mxu0 %v10733_v36  ;;  %3873 = vmatprep.subr.mxu0 %v9613_v23 }
 0x243   :  { %4592 = vmatmul.mubr.f32.gmra.mrb[24].mxu1 %v9384_v26  ;;  %3827 = vmatmul.mubr.f32.gmra.mrb[24].mxu0 %v9384_v26 }
 0x244   :  { %4641 = vmatpush1.msra.mxu1 %v9638_v28  ;;  %4597 = vmatprep.mubr.f32.mxu1 %v10733_v36 }
 0x245   :  { %7165 = vmatprep.subr.bf16.mxu1 %v9493_v51  ;;  %3876 = vmatpush1.msra.mxu0 %v9632_v20  ;;  %v8028_v20 = vld [vmem:[%s10469_s4 + $0x18] sm:$0xff] }
 0x246   :  { %3832 = vmatprep.mubr.f32.mxu0 %v10733_v36  ;;  %7117 = vmatprep.subr.bf16.mxu0 %v9487_v41 }
 0x247   :  { %4599 = vmatmul.mubr.f32.gmra.mrb[26].mxu1 %v9411_v16  ;;  %3834 = vmatmul.mubr.f32.gmra.mrb[26].mxu0 %v9411_v16 }
 0x248   :  { %4604 = vmatprep.mubr.f32.mxu1 %v10733_v36  ;;  %3839 = vmatprep.mubr.f32.mxu0 %v10733_v36 }
 0x24b   :  { %4606 = vmatmul.mubr.f32.gmra.mrb[28].mxu1 %v9416_v0  ;;  %3841 = vmatmul.mubr.f32.gmra.mrb[28].mxu0 %v9416_v0 }
 0x24c   :  { %4696 = vmatprep.mubr.f32.mxu1 %v10733_v36  ;;  %3931 = vmatprep.mubr.f32.mxu0 %v10733_v36 }
 0x24f   :  { %4699 = vmatmul.mubr.f32.vlgmr.msra.gmra.mrb[20].mxu1 %v9395_v40  ;;  %3934 = vmatmul.mubr.f32.vlgmr.msra.gmra.mrb[20].mxu0 %v9395_v40 }
 0x250   :  { %7167 = vmatpush1.bf16.msra.mxu1 %v9491_v33  ;;  %4704 = vmatprep.mubr.f32.mxu1 %v10733_v36 }
 0x251   :  { %7169 = vmatprep.subr.bf16.mxu1 %v9545_v15  ;;  %7119 = vmatpush1.bf16.msra.mxu0 %v9483_v47 }
 0x252   :  { %3939 = vmatprep.mubr.f32.mxu0 %v10733_v36  ;;  %7121 = vmatprep.subr.bf16.mxu0 %v9538_v5 }
 0x253   :  { %4707 = vmatmul.mubr.f32.gmra.mrb[22].mxu1 %v9400_v37  ;;  %3942 = vmatmul.mubr.f32.gmra.mrb[22].mxu0 %v9400_v37 }
 0x254   :  { %7171 = vmatpush1.bf16.msra.mxu1 %v10911_v27  ;;  %4712 = vmatprep.mubr.f32.mxu1 %v10733_v36 }
 0x255   :  { %4754 = vmatprep.subr.mxu1 %v9559_v53  ;;  %7123 = vmatpush1.bf16.msra.mxu0 %v10912_v39 }
 0x256   :  { %3947 = vmatprep.mubr.f32.mxu0 %v10733_v36  ;;  %3989 = vmatprep.subr.mxu0 %v9553_v34 }
 0x257   :  { %4715 = vmatmul.mubr.f32.gmra.mrb[24].mxu1 %v10913_v38  ;;  %3950 = vmatmul.mubr.f32.gmra.mrb[24].mxu0 %v10913_v38 }
 0x258   :  { %4756 = vmatpush1.msra.mxu1 %v9550_v11  ;;  %4720 = vmatprep.mubr.f32.mxu1 %v10733_v36 }
 0x259   :  { %7173 = vmatprep.subr.bf16.mxu1 %v9684_v1  ;;  %3991 = vmatpush1.msra.mxu0 %v9543_v19  ;;  %v8032_v1 = vmov 2  }
 0x25a   :  { %3955 = vmatprep.mubr.f32.mxu0 %v10733_v36  ;;  %7125 = vmatprep.subr.bf16.mxu0 %v9678_v43  ;;  %v8024_v43 = vld [vmem:[%s10469_s4] sm:$0xff] }
 0x25b   :  { %4723 = vmatmul.mubr.f32.gmra.mrb[26].mxu1 %v9431_v32  ;;  %3958 = vmatmul.mubr.f32.gmra.mrb[26].mxu0 %v9431_v32 }
 0x25c   :  { %4728 = vmatprep.mubr.f32.mxu1 %v10733_v36  ;;  %3963 = vmatprep.mubr.f32.mxu0 %v10733_v36 }
 0x25d   :  { %7778 = vset.pattern.permute.xlu1 %v8032_v1  ;;  %7779 = vset.pattern.permute.xlu0 %v8032_v1 }
 0x25e   :  { %3533 = vperm.xlu1 %7778, %v8024_v43  }
 0x25f   :  { %4731 = vmatmul.mubr.f32.gmra.mrb[28].mxu1 %v9436_v9  ;;  %3966 = vmatmul.mubr.f32.gmra.mrb[28].mxu0 %v9436_v9 }
 0x260   :  { %4811 = vmatprep.mubr.f32.mxu1 %v10733_v36  ;;  %4046 = vmatprep.mubr.f32.mxu0 %v10733_v36 }
 0x263   :  { %4815 = vmatmul.mubr.f32.vlgmr.msra.gmra.mrb[20].mxu1 %v10914_v46  ;;  %4050 = vmatmul.mubr.f32.vlgmr.msra.gmra.mrb[20].mxu0 %v10914_v46  ;;  %v10929_v46 = vld [vmem:[#allocation43_spill] sm:$0xff] }
 0x264   :  { %7175 = vmatpush1.bf16.msra.mxu1 %v9697_v29  ;;  %4820 = vmatprep.mubr.f32.mxu1 %v10733_v36 }
 0x265   :  { %7177 = vmatprep.subr.bf16.mxu1 %v9715_v59  ;;  %7127 = vmatpush1.bf16.msra.mxu0 %v9691_v24  ;;  %v10917_v24 = vand.u32 4294901760, %v9613_v23  ;;  %v8025_v23 = vld [vmem:[%s10469_s4 + $0x8] sm:$0xff] }
 0x266   :  { %4055 = vmatprep.mubr.f32.mxu0 %v10733_v36  ;;  %7129 = vmatprep.subr.bf16.mxu0 %v9703_v3  ;;  %v10923_v3 = vld [vmem:[#allocation34_spill] sm:$0xff] }
 0x267   :  { %4824 = vmatmul.mubr.f32.gmra.mrb[22].mxu1 %v10915_v60  ;;  %4059 = vmatmul.mubr.f32.gmra.mrb[22].mxu0 %v10915_v60 }
 0x268   :  { %7179 = vmatpush1.bf16.msra.mxu1 %v9727_v10  ;;  %4829 = vmatprep.mubr.f32.mxu1 %v10733_v36  ;;  %v10925_v10 = vld [vmem:[#allocation11_spill] sm:$0xff] }
 0x269   :  { %4892 = vmatprep.subr.mxu1 %v10916_v12  ;;  %7131 = vmatpush1.bf16.msra.mxu0 %v9721_v25 }
 0x26a   :  { %4064 = vmatprep.mubr.f32.mxu0 %v10733_v36  ;;  %4127 = vmatprep.subr.mxu0 %v10917_v24 }
 0x26b   :  { %4833 = vmatmul.mubr.f32.gmra.mrb[24].mxu1 %v10918_v4  ;;  %4068 = vmatmul.mubr.f32.gmra.mrb[24].mxu0 %v10918_v4 }
 0x26c   :  { %4896 = vmatpush1.msra.mxu1 %v10919_v50  ;;  %4838 = vmatprep.mubr.f32.mxu1 %v10733_v36 }
 0x26d   :  { %7181 = vmatprep.subr.bf16.mxu1 %v9493_v51  ;;  %4131 = vmatpush1.msra.mxu0 %v10920_v30  ;;  %v8026_v51 = vld [vmem:[%s10469_s4 + $0x10] sm:$0xff] }
 0x26e   :  { %4073 = vmatprep.mubr.f32.mxu0 %v10733_v36  ;;  %7133 = vmatprep.subr.bf16.mxu0 %v9487_v41  ;;  %v8027_v41 = vld [vmem:[%s10469_s4 + $0x20] sm:$0xff] }
 0x26f   :  { %4842 = vmatmul.mubr.f32.gmra.mrb[26].mxu1 %v9447_v56  ;;  %3537 = vperm.xlu0 %7779, %v8025_v23   ;;  %v6671_v23 = vld [vmem:[%s10472_s3 + $0x20] sm:$0xff] }
 0x270   :  { %4847 = vmatprep.mubr.f32.mxu1 %v10733_v36  ;;  %4077 = vmatmul.mubr.f32.gmra.mrb[26].mxu0 %v9447_v56 }
 0x271   :  { %3541 = vperm.xlu1 %7778, %v8026_v51   ;;  %4082 = vmatprep.mubr.f32.mxu0 %v10733_v36 }
 0x273   :  { %4851 = vmatmul.mubr.f32.gmra.mrb[28].mxu1 %v9454_v45  ;;  %3549 = vperm.xlu0 %7779, %v8027_v41  }
 0x274   :  { %4951 = vmatprep.mubr.f32.mxu1 %v10733_v36  ;;  %4086 = vmatmul.mubr.f32.gmra.mrb[28].mxu0 %v9454_v45 }
 0x275   :  { %3545 = vperm.xlu1 %7778, %v8028_v20   ;;  %4186 = vmatprep.mubr.f32.mxu0 %v10733_v36 }
 0x276   :  { %v2688_v28 = vpop.f32.mrb[10].mxu0  ;;  %v3453_v17 = vpop.f32.mrb[10].mxu1 }
 0x277   :  { %4953 = vmatmul.mubr.f32.vlgmr.msra.gmra.mrb[20].mxu1 %v9380_v49  ;;  %v7304_v35 = vadd.f32 %v2688_v28, %v10921_v44  ;;  %v2690_v8 = vpop.f32.mrb[11].mxu0  ;;  %v7314_v63 = vadd.f32 %v3453_v17, %v10921_v44  ;;  %7781 = vset.pattern.permute.xlu0 %v10924_v31 }
 0x278   :  { %7183 = vmatpush1.bf16.msra.mxu1 %v9491_v33  ;;  %4958 = vmatprep.mubr.f32.mxu1 %v10733_v36  ;;  %v7305_v21 = vadd.f32 %v2690_v8, %v10921_v44  ;;  %v3455_v33 = vpop.f32.mrb[11].mxu1  ;;  %v6670_v8 = vld [vmem:[%s10472_s3 + $0x18] sm:$0xff] }
 0x279   :  { %4188 = vmatmul.mubr.f32.vlgmr.msra.gmra.mrb[20].mxu0 %v9380_v49  ;;  %7185 = vmatprep.subr.bf16.mxu1 %v9545_v15  ;;  %7904 = vtanh.f32 %v7304_v35  ;;  %v7315_v58 = vadd.f32 %v3455_v33, %v10921_v44 }
 0x27a   :  { %7135 = vmatpush1.bf16.msra.mxu0 %v9483_v47  ;;  %4193 = vmatprep.mubr.f32.mxu0 %v10733_v36  ;;  %7906 = vtanh.f32 %v7314_v63  ;;  %v2695_v15 = vpop.f32.mrb[12].mxu0  ;;  %v10922_v47 = vld [vmem:[#allocation29_spill] sm:$0xff]  ;;  %v3460_v2 = vpop.f32.mrb[12].mxu1 }
 0x27b   :  { %7137 = vmatprep.subr.bf16.mxu0 %v9538_v5  ;;  %4960 = vmatmul.mubr.f32.gmra.mrb[22].mxu1 %v9382_v42  ;;  %7908 = vtanh.f32 %v7305_v21  ;;  %v7306_v55 = vadd.f32 %v2695_v15, %v10922_v47  ;;  %v2697_v5 = vpop.f32.mrb[13].mxu0  ;;  %v7316_v13 = vadd.f32 %v3460_v2, %v10922_v47  ;;  %v3462_v29 = vpop.f32.mrb[13].mxu1  ;;  %v10926_v21 = vld [vmem:[#allocation26_spill] sm:$0xff] }
 0x27c   :  { %7187 = vmatpush1.bf16.msra.mxu1 %v10911_v27  ;;  %4965 = vmatprep.mubr.f32.mxu1 %v10733_v36  ;;  %7910 = vtanh.f32 %v7315_v58  ;;  %v7307_v57 = vadd.f32 %v2697_v5, %v10922_v47  ;;  %v7317_v48 = vadd.f32 %v3462_v29, %v10922_v47 }
 0x27d   :  { %4195 = vmatmul.mubr.f32.gmra.mrb[22].mxu0 %v9382_v42  ;;  %5004 = vmatprep.subr.mxu1 %v9559_v53  ;;  %7912 = vtanh.f32 %v7306_v55 }
 0x27e   :  { %7139 = vmatpush1.bf16.msra.mxu0 %v10912_v39  ;;  %4200 = vmatprep.mubr.f32.mxu0 %v10733_v36  ;;  %7914 = vtanh.f32 %v7316_v13  ;;  %v2702_v53 = vpop.f32.mrb[14].mxu0  ;;  %v3467_v54 = vpop.f32.mrb[14].mxu1 }
 0x27f   :  { %4239 = vmatprep.subr.mxu0 %v9553_v34  ;;  %4967 = vmatmul.mubr.f32.gmra.mrb[24].mxu1 %v9384_v26  ;;  %7916 = vtanh.f32 %v7307_v57  ;;  %v7308_v34 = vadd.f32 %v2702_v53, %v10923_v3  ;;  %v2704_v62 = vpop.f32.mrb[15].mxu0  ;;  %v3469_v6 = vpop.f32.mrb[15].mxu1 }
 0x280   :  { %5006 = vmatpush1.msra.mxu1 %v9550_v11  ;;  %4972 = vmatprep.mubr.f32.mxu1 %v10733_v36  ;;  %7918 = vtanh.f32 %v7317_v48  ;;  %v7318_v11 = vadd.f32 %v3467_v54, %v10923_v3  ;;  %v7309_v59 = vadd.f32 %v2704_v62, %v10923_v3  ;;  %v7319_v25 = vadd.f32 %v3469_v6, %v10923_v3 }
 0x281   :  { %4202 = vmatmul.mubr.f32.gmra.mrb[24].mxu0 %v9384_v26  ;;  %7780 = vset.pattern.permute.xlu1 %v10924_v31  ;;  %7920 = vtanh.f32 %v7308_v34 }
 0x282   :  { %4241 = vmatpush1.msra.mxu0 %v9543_v19  ;;  %4207 = vmatprep.mubr.f32.mxu0 %v10733_v36  ;;  %7922 = vtanh.f32 %v7318_v11  ;;  %v2709_v7 = vpop.f32.mrb[16].mxu0  ;;  %v6669_v19 = vld [vmem:[%s10472_s3 + $0x10] sm:$0xff]  ;;  %v3474_v39 = vpop.f32.mrb[16].mxu1 }
 0x283   :  { %4974 = vmatmul.mubr.f32.gmra.mrb[26].mxu1 %v9411_v16  ;;  %6674 = vperm.xlu1 %7780, %v6667_v52   ;;  %v7905_v18 = vpop.eup %7904  ;;  %7924 = vtanh.f32 %v7309_v59  ;;  %v7310_v27 = vadd.f32 %v2709_v7, %v10925_v10  ;;  %v2711_v1 = vpop.f32.mrb[17].mxu0  ;;  %v7320_v12 = vadd.f32 %v3474_v39, %v10925_v10 }
 0x284   :  { %4979 = vmatprep.mubr.f32.mxu1 %v10733_v36  ;;  %6679 = vperm.xlu0 %7781, %v6668_v61   ;;  %v7907_v43 = vpop.eup %7906  ;;  %7926 = vtanh.f32 %v7319_v25  ;;  %v7311_v24 = vadd.f32 %v2711_v1, %v10925_v10  ;;  %v3476_v50 = vpop.f32.mrb[17].mxu1  ;;  %v5099_v30 = vand.u32 4294901760, %v7905_v18 }
 0x285   :  { %4209 = vmatmul.mubr.f32.gmra.mrb[26].mxu0 %v9411_v16  ;;  %v7909_v51 = vpop.eup %7908  ;;  %7928 = vtanh.f32 %v7310_v27  ;;  %v7321_v41 = vadd.f32 %v3476_v50, %v10925_v10  ;;  %v5864_v20 = vand.u32 4294901760, %v7907_v43 }
 0x286   :  { %4214 = vmatprep.mubr.f32.mxu0 %v10733_v36  ;;  %v7911_v28 = vpop.eup %7910  ;;  %7930 = vtanh.f32 %v7320_v12  ;;  %v2716_v44 = vpop.f32.mrb[18].mxu0  ;;  %v5097_v35 = vand.u32 4294901760, %v7909_v51  ;;  %v9903_v17 = vsub.f32 %v7905_v18, %v5099_v30 }
 0x287   :  { %4981 = vmatmul.mubr.f32.gmra.mrb[28].mxu1 %v9416_v0  ;;  %6684 = vperm.xlu1 %7780, %v6669_v19   ;;  %v7913_v63 = vpop.eup %7912  ;;  %7932 = vtanh.f32 %v7311_v24  ;;  %v7312_v33 = vadd.f32 %v2716_v44, %v10926_v21  ;;  %v3481_v58 = vpop.f32.mrb[18].mxu1  ;;  %v5862_v47 = vand.u32 4294901760, %v7911_v28  ;;  %v9910_v55 = vsub.f32 %v7907_v43, %v5864_v20 }
 0x288   :  { %5061 = vmatprep.mubr.f32.mxu1 %v10733_v36  ;;  %v2718_v15 = vpop.f32.mrb[19].mxu0  ;;  %6694 = vperm.xlu0 %7781, %v6671_v23   ;;  %v7915_v2 = vpop.eup %7914  ;;  %7934 = vtanh.f32 %v7321_v41  ;;  %v7322_v5 = vadd.f32 %v3481_v58, %v10926_v21  ;;  %v9915_v29 = vsub.f32 %v7909_v51, %v5097_v35  ;;  %v5103_v3 = vand.u32 4294901760, %v7913_v63 }
 0x289   :  { %4216 = vmatmul.mubr.f32.gmra.mrb[28].mxu0 %v9416_v0  ;;  %v7313_v13 = vadd.f32 %v2718_v15, %v10926_v21  ;;  %v3483_v57 = vpop.f32.mrb[19].mxu1  ;;  %v7917_v48 = vpop.eup %7916  ;;  %7936 = vtanh.f32 %v7312_v33  ;;  %v9919_v52 = vsub.f32 %v7911_v28, %v5862_v47  ;;  %v5868_v62 = vand.u32 4294901760, %v7915_v2 }
 0x28a   :  { %4296 = vmatprep.mubr.f32.mxu0 %v10733_v36  ;;  %v7323_v53 = vadd.f32 %v3483_v57, %v10926_v21  ;;  %v7919_v34 = vpop.eup %7918  ;;  %7938 = vtanh.f32 %v7322_v5  ;;  %v5101_v54 = vand.u32 4294901760, %v7917_v48  ;;  %v10634_v31 = vand.u32 4294901760, %v9915_v29 }
 0x28b   :  { %5063 = vmatmul.mubr.f32.vlgmr.msra.gmra.mrb[20].mxu1 %v9380_v49  ;;  %6689 = vperm.xlu1 %7780, %v6670_v8   ;;  %v7921_v11 = vpop.eup %7920  ;;  %7940 = vtanh.f32 %v7313_v13  ;;  %v5866_v59 = vand.u32 4294901760, %v7919_v34  ;;  %v9924_v6 = vpack.c.bf16 %v5103_v3, %v5099_v30  ;;  %v9926_v61 = vsub.f32 %v7913_v63, %v5103_v3 }
 0x28c   :  { %5068 = vmatprep.mubr.f32.mxu1 %v10733_v36  ;;  %v7923_v25 = vpop.eup %7922  ;;  %7942 = vtanh.f32 %v7323_v53  ;;  %v9929_v7 = vpack.c.bf16 %v5101_v54, %v5097_v35  ;;  %v9931_v19 = vsub.f32 %v7917_v48, %v5101_v54  ;;  %v9933_v18 = vpack.c.bf16 %v5868_v62, %v5864_v20 }
 0x28d   :  { %4298 = vmatmul.mubr.f32.vlgmr.msra.gmra.mrb[20].mxu0 %v9380_v49  ;;  %v7925_v10 = vpop.eup %7924  ;;  %v9936_v27 = vpack.c.bf16 %v5866_v59, %v5862_v47  ;;  %v9938_v39 = vsub.f32 %v7919_v34, %v5866_v59  ;;  %v9940_v1 = vsub.f32 %v7915_v2, %v5868_v62  ;;  %v5107_v43 = vand.u32 4294901760, %v7921_v11 }
 0x28e   :  { %4303 = vmatprep.mubr.f32.mxu0 %v10733_v36  ;;  %v7927_v12 = vpop.eup %7926  ;;  %7189 = vmatprep.subr.bf16.mxu0 %v9929_v7  ;;  %v5105_v24 = vand.u32 4294901760, %v7925_v10  ;;  %v5872_v50 = vand.u32 4294901760, %v7923_v25  ;;  %v5230_v30 = vsub.f32 %v9915_v29, %v10634_v31  ;;  %v10631_v23 = vand.u32 4294901760, %v9931_v19 }
 0x28f   :  { %5070 = vmatmul.mubr.f32.gmra.mrb[22].mxu1 %v9382_v42  ;;  %v7929_v51 = vpop.eup %7928  ;;  %7237 = vmatprep.subr.bf16.mxu1 %v9936_v27  ;;  %v5870_v41 = vand.u32 4294901760, %v7927_v12  ;;  %v9950_v20 = vsub.f32 %v7921_v11, %v5107_v43  ;;  %v10630_v28 = vand.u32 4294901760, %v9919_v52  ;;  %v10629_v44 = vand.u32 4294901760, %v9938_v39 }
 0x290   :  { %5075 = vmatprep.mubr.f32.mxu1 %v10733_v36  ;;  %v7931_v35 = vpop.eup %7930  ;;  %7191 = vmatpush1.bf16.msra.mxu0 %v9924_v6  ;;  %v9956_v8 = vsub.f32 %v7925_v10, %v5105_v24  ;;  %v5111_v63 = vand.u32 4294901760, %v7929_v51  ;;  %v9958_v21 = vsub.f32 %v7923_v25, %v5872_v50  ;;  %v5231_v33 = vand.u32 4294901760, %v5230_v30 }
 0x291   :  { %4305 = vmatmul.mubr.f32.gmra.mrb[22].mxu0 %v9382_v42  ;;  %v7933_v58 = vpop.eup %7932  ;;  %7239 = vmatpush1.bf16.msra.mxu1 %v9933_v18  ;;  %v9961_v15 = vsub.f32 %v7927_v12, %v5870_v41  ;;  %v5876_v47 = vand.u32 4294901760, %v7931_v35  ;;  %v5242_v2 = vsub.f32 %v9931_v19, %v10631_v23  ;;  %v5995_v5 = vsub.f32 %v9919_v52, %v10630_v28 }
 0x292   :  { %4310 = vmatprep.mubr.f32.mxu0 %v10733_v36  ;;  %v7935_v13 = vpop.eup %7934  ;;  %v5109_v57 = vand.u32 4294901760, %v7933_v58  ;;  %v9970_v48 = vpack.c.bf16 %v5111_v63, %v5107_v43  ;;  %v9972_v53 = vsub.f32 %v7929_v51, %v5111_v63  ;;  %v6007_v3 = vsub.f32 %v9938_v39, %v10629_v44 }
 0x293   :  { %5077 = vmatmul.mubr.f32.gmra.mrb[24].mxu1 %v9384_v26  ;;  %v9977_v34 = vpop.eup %7936  ;;  %v5874_v54 = vand.u32 4294901760, %v7935_v13  ;;  %v9981_v62 = vpack.c.bf16 %v5876_v47, %v5872_v50  ;;  %v9983_v11 = vsub.f32 %v7931_v35, %v5876_v47  ;;  %v5243_v59 = vand.u32 4294901760, %v5242_v2 }
 0x294   :  { %5082 = vmatprep.mubr.f32.mxu1 %v10733_v36  ;;  %v9985_v25 = vpop.eup %7938  ;;  %v9988_v10 = vpack.c.bf16 %v5109_v57, %v5105_v24  ;;  %v9990_v43 = vsub.f32 %v7933_v58, %v5109_v57  ;;  %v9993_v12 = vand.u32 4294901760, %v9977_v34  ;;  %v5996_v30 = vand.u32 4294901760, %v5995_v5 }
 0x295   :  { %4312 = vmatmul.mubr.f32.gmra.mrb[24].mxu0 %v9384_v26  ;;  %v9995_v51 = vpop.eup %7940  ;;  %v9997_v63 = vpack.c.bf16 %v5874_v54, %v5870_v41  ;;  %v9999_v50 = vsub.f32 %v7935_v13, %v5874_v54  ;;  %v10002_v35 = vand.u32 4294901760, %v9985_v25  ;;  %v7196_v47 = vpack.c.bf16 %v5243_v59, %v5231_v33 }
 0x296   :  { %4317 = vmatprep.mubr.f32.mxu0 %v10733_v36  ;;  %10927 = vst [vmem:[#allocation28_spill] sm:$0xff] %v9993_v12  ;;  %v10004_v2 = vpop.eup %7942  ;;  %7193 = vmatprep.subr.bf16.mxu0 %v9988_v10  ;;  %v10009_v24 = vand.u32 4294901760, %v9995_v51  ;;  %v6008_v58 = vand.u32 4294901760, %v6007_v3  ;;  %v10633_v5 = vand.u32 4294901760, %v9903_v17  ;;  %v10632_v41 = vand.u32 4294901760, %v9926_v61 }
 0x297   :  { %10928 = vst [vmem:[#allocation36_spill] sm:$0xff] %v10002_v35  ;;  %5084 = vmatmul.mubr.f32.gmra.mrb[26].mxu1 %v9411_v16  ;;  %7241 = vmatprep.subr.bf16.mxu1 %v9997_v63  ;;  %v10016_v33 = vand.u32 4294901760, %v10004_v2  ;;  %v10635_v13 = vand.u32 4294901760, %v9910_v55  ;;  %v10638_v57 = vand.u32 4294901760, %v9940_v1  ;;  %v10639_v54 = vand.u32 4294901760, %v9956_v8 }
 0x298   :  { %5089 = vmatprep.mubr.f32.mxu1 %v10733_v36  ;;  %v7244_v3 = vpack.c.bf16 %v6008_v58, %v5996_v30  ;;  %v5236_v59 = vsub.f32 %v9903_v17, %v10633_v5  ;;  %v5248_v44 = vsub.f32 %v9926_v61, %v10632_v41  ;;  %v10643_v28 = vand.u32 4294901760, %v9990_v43  ;;  %7195 = vmatpush1.bf16.msra.mxu0 %v9970_v48 }
 0x299   :  { %4319 = vmatmul.mubr.f32.gmra.mrb[26].mxu0 %v9411_v16  ;;  %7243 = vmatpush1.bf16.msra.mxu1 %v9981_v62  ;;  %v6001_v23 = vsub.f32 %v9910_v55, %v10635_v13  ;;  %v6013_v30 = vsub.f32 %v9940_v1, %v10638_v57  ;;  %v5254_v58 = vsub.f32 %v9956_v8, %v10639_v54  ;;  %v10645_v41 = vand.u32 4294901760, %v9961_v15 }
 0x29a   :  { %4324 = vmatprep.mubr.f32.mxu0 %v10733_v36  ;;  %5114 = vmatprep.subr.mxu0 %v10009_v24  ;;  %v5237_v5 = vand.u32 4294901760, %v5236_v59  ;;  %v5249_v31 = vand.u32 4294901760, %v5248_v44  ;;  %v5266_v13 = vsub.f32 %v9990_v43, %v10643_v28  ;;  %v10647_v45 = vand.u32 4294901760, %v9999_v50 }
 0x29b   :  { %5091 = vmatmul.mubr.f32.gmra.mrb[28].mxu1 %v9416_v0  ;;  %5879 = vmatprep.subr.mxu1 %v10016_v33  ;;  %v6002_v57 = vand.u32 4294901760, %v6001_v23  ;;  %v6014_v54 = vand.u32 4294901760, %v6013_v30  ;;  %v5255_v56 = vand.u32 4294901760, %v5254_v58  ;;  %v6019_v4 = vsub.f32 %v9961_v15, %v10645_v41 }
 0x29c   :  { %5936 = vmatprep.mubr.f32.mxu1 %v10733_v36  ;;  %v7198_v44 = vpack.c.bf16 %v5249_v31, %v5237_v5  ;;  %v5267_v59 = vand.u32 4294901760, %v5266_v13  ;;  %v6031_v28 = vsub.f32 %v9999_v50, %v10647_v45  ;;  %v10654_v60 = vand.u32 4294901760, %v9950_v20  ;;  %5116 = vmatpush1.msra.mxu0 %v9993_v12 }
 0x29d   :  { %4326 = vmatmul.mubr.f32.gmra.mrb[28].mxu0 %v9416_v0  ;;  %5881 = vmatpush1.msra.mxu1 %v10002_v35  ;;  %v7246_v23 = vpack.c.bf16 %v6014_v54, %v6002_v57  ;;  %v6020_v30 = vand.u32 4294901760, %v6019_v4  ;;  %v10653_v58 = vand.u32 4294901760, %v9972_v53  ;;  %v10651_v41 = vand.u32 4294901760, %v9958_v21 }
 0x29e   :  { %5171 = vmatprep.mubr.f32.mxu0 %v10733_v36  ;;  %7197 = vmatprep.subr.bf16.mxu0 %v7196_v47  ;;  %v7200_v31 = vpack.c.bf16 %v5267_v59, %v5255_v56  ;;  %v6032_v5 = vand.u32 4294901760, %v6031_v28  ;;  %v5260_v13 = vsub.f32 %v9950_v20, %v10654_v60  ;;  %v10650_v45 = vand.u32 4294901760, %v9983_v11 }
 0x29f   :  { %5942 = vmatmul.mubr.f32.vlgmr.msra.gmra.mrb[30].mxu1 %v10929_v46  ;;  %7245 = vmatprep.subr.bf16.mxu1 %v7244_v3  ;;  %v5272_v4 = vsub.f32 %v9972_v53, %v10653_v58  ;;  %v6025_v47 = vsub.f32 %v9958_v21, %v10651_v41  ;;  %v10077_v56 = vsub.f32 %v9995_v51, %v10009_v24  ;;  %v10935_v32 = vand.u32 4294901760, %v9938_v39 }
 0x2a0   :  { %7247 = vmatpush1.bf16.msra.mxu1 %v7246_v23  ;;  %v7248_v28 = vpack.c.bf16 %v6032_v5, %v6020_v30  ;;  %v5261_v57 = vand.u32 4294901760, %v5260_v13  ;;  %v10084_v54 = vsub.f32 %v10004_v2, %v10016_v33  ;;  %5947 = vmatprep.mubr.f32.mxu1 %v10733_v36  ;;  %v10096_v2 = vsub.f32 %v9985_v25, %v10002_v35  ;;  %v10930_v5 = vld [vmem:[#allocation12_spill] sm:$0xff]  ;;  %v6817_v25 = vld [vmem:[%s10469_s4] sm:$0x1] }
 0x2a1   :  { %5177 = vmatmul.mubr.f32.vlgmr.msra.gmra.mrb[30].mxu0 %v10929_v46  ;;  %v6037_v46 = vsub.f32 %v9983_v11, %v10650_v45  ;;  %v5273_v3 = vand.u32 4294901760, %v5272_v4  ;;  %v6026_v59 = vand.u32 4294901760, %v6025_v47  ;;  %v10648_v51 = vand.u32 4294901760, %v10077_v56 }
 0x2a2   :  { %7199 = vmatpush1.bf16.msra.mxu0 %v7198_v44  ;;  %5182 = vmatprep.mubr.f32.mxu0 %v10733_v36  ;;  %v10090_v44 = vsub.f32 %v9977_v34, %v9993_v12  ;;  %v10649_v30 = vand.u32 4294901760, %v10084_v54  ;;  %v7252_v47 = vpack.c.bf16 %v9938_v39, %v9919_v52  ;;  %v7258_v60 = vpack.c.bf16 %v9983_v11, %v9958_v21 }
 0x2a3   :  { %7201 = vmatprep.subr.bf16.mxu0 %v7200_v31  ;;  %7249 = vmatprep.subr.bf16.mxu1 %v7248_v28  ;;  %v6038_v23 = vand.u32 4294901760, %v6037_v46  ;;  %v7204_v31 = vpack.c.bf16 %v9931_v19, %v9915_v29  ;;  %v7202_v13 = vpack.c.bf16 %v5273_v3, %v5261_v57  ;;  %v5278_v34 = vsub.f32 %v10077_v56, %v10648_v51 }
 0x2a4   :  { %5953 = vmatmul.mubr.f32.gmra.mrb[32].mxu1 %v10930_v5  ;;  %v10652_v4 = vand.u32 4294901760, %v10090_v44  ;;  %v6043_v46 = vsub.f32 %v10084_v54, %v10649_v30  ;;  %v10657_v57 = vand.u32 4294901760, %v10096_v2  ;;  %v7206_v3 = vpack.c.bf16 %v9926_v61, %v9903_v17 }
 0x2a5   :  { %5188 = vmatmul.mubr.f32.gmra.mrb[32].mxu0 %v10930_v5  ;;  %v7250_v28 = vpack.c.bf16 %v6038_v23, %v6026_v59  ;;  %5958 = vmatprep.mubr.f32.mxu1 %v10733_v36  ;;  %v5279_v5 = vand.u32 4294901760, %v5278_v34  ;;  %v7254_v59 = vpack.c.bf16 %v9940_v1, %v9910_v55  ;;  %v7208_v23 = vpack.c.bf16 %v9990_v43, %v9956_v8 }
 0x2a6   :  { %5193 = vmatprep.mubr.f32.mxu0 %v10733_v36  ;;  %7203 = vmatpush1.bf16.msra.mxu0 %v7202_v13  ;;  %v5284_v51 = vsub.f32 %v10090_v44, %v10652_v4  ;;  %v8033_v30 = vmov 3   ;;  %v6044_v45 = vand.u32 4294901760, %v6043_v46  ;;  %v6049_v41 = vsub.f32 %v10096_v2, %v10657_v57  ;;  %v10931_v4 = vld [vmem:[#allocation19_spill] sm:$0xff] }
 0x2a7   :  { %7782 = vset.pattern.permute.xlu1 %v8033_v30  ;;  %7251 = vmatpush1.bf16.msra.mxu1 %v7250_v28  ;;  %v7256_v13 = vpack.c.bf16 %v9999_v50, %v9961_v15  ;;  %v7210_v34 = vpack.c.bf16 %v9972_v53, %v9950_v20  ;;  %v10932_v28 = vand.u32 4294901760, %v9915_v29  ;;  %v10933_v46 = vand.u32 4294901760, %v9931_v19 }
 0x2a8   :  { %6820 = vperm.xlu1 %7782, %v6817_v25   ;;  %5280 = vmatprep.subr.mxu0 %v5279_v5  ;;  %v5285_v58 = vand.u32 4294901760, %v5284_v51  ;;  %v10934_v57 = vand.u32 4294901760, %v9919_v52  ;;  %v6050_v25 = vand.u32 4294901760, %v6049_v41  ;;  %v10936_v51 = vand.u32 4294901760, %v9903_v17 }
 0x2a9   :  { %5199 = vmatmul.mubr.f32.gmra.mrb[34].mxu0 %v10931_v4  ;;  %v10140_v9 = vpack.c.bf16 %v10933_v46, %v10932_v28  ;;  %6045 = vmatprep.subr.mxu1 %v6044_v45  ;;  %v10937_v5 = vand.u32 4294901760, %v9926_v61  ;;  %v10938_v29 = vand.u32 4294901760, %v9910_v55  ;;  %v10939_v19 = vand.u32 4294901760, %v9940_v1 }
 0x2aa   :  { %v10146_v35 = vpack.c.bf16 %v10935_v32, %v10934_v57  ;;  %5964 = vmatmul.mubr.f32.gmra.mrb[34].mxu1 %v10931_v4  ;;  %v10940_v52 = vand.u32 4294901760, %v9956_v8  ;;  %v10941_v32 = vand.u32 4294901760, %v9990_v43  ;;  %5286 = vmatpush1.msra.mxu0 %v5285_v58  ;;  %v10942_v17 = vand.u32 4294901760, %v9961_v15 }
 0x2ab   :  { %v10153_v12 = vpack.c.bf16 %v10937_v5, %v10936_v51  ;;  %v10159_v28 = vpack.c.bf16 %v10939_v19, %v10938_v29  ;;  %5204 = vmatprep.mubr.f32.mxu0 %v10733_v36  ;;  %v10943_v61 = vand.u32 4294901760, %v9999_v50  ;;  %v10944_v55 = vand.u32 4294901760, %v9950_v20  ;;  %6051 = vmatpush1.msra.mxu1 %v6050_v25 }
 0x2ac   :  { %v10165_v45 = vpack.c.bf16 %v10941_v32, %v10940_v52  ;;  %v10945_v1 = vand.u32 4294901760, %v9972_v53  ;;  %v10946_v8 = vand.u32 4294901760, %v9958_v21  ;;  %v10947_v43 = vand.u32 4294901760, %v9983_v11  ;;  %7205 = vmatprep.subr.bf16.mxu0 %v7204_v31  ;;  %7253 = vmatprep.subr.bf16.mxu1 %v7252_v47  ;;  %v10956_v21 = vld [vmem:[#allocation25_spill] sm:$0xff]  ;;  %v10959_v11 = vld [vmem:[#allocation10_spill] sm:$0xff] }
 0x2ad   :  { %v10172_v39 = vpack.c.bf16 %v10943_v61, %v10942_v17  ;;  %5969 = vmatprep.mubr.f32.mxu1 %v10733_v36  ;;  %5210 = vmatmul.mubr.f32.gmra.mrb[36].mxu0 %v9618_v14  ;;  %v10955_v20 = vand.u32 4294901760, %v10084_v54  ;;  %v10957_v15 = vand.u32 4294901760, %v10090_v44  ;;  %v10958_v53 = vand.u32 4294901760, %v10096_v2 }
 0x2ae   :  { %v10178_v41 = vpack.c.bf16 %v10945_v1, %v10944_v55  ;;  %v10184_v4 = vpack.c.bf16 %v10947_v43, %v10946_v8  ;;  %5975 = vmatmul.mubr.f32.gmra.mrb[36].mxu1 %v9618_v14  ;;  %5215 = vmatprep.mubr.f32.mxu0 %v10733_v36  ;;  %v10949_v14 = vld [vmem:[#allocation36_spill] sm:$0xff] }
 0x2af   :  { %5980 = vmatprep.mubr.f32.mxu1 %v10733_v36  ;;  %7783 = vset.pattern.permute.xlu0 %v8033_v30 }
 0x2b1   :  { %5221 = vmatmul.mubr.f32.gmra.mrb[38].mxu0 %v9709_v22 }
 0x2b2   :  { %5986 = vmatmul.mubr.f32.gmra.mrb[38].mxu1 %v9709_v22  ;;  %5341 = vmatprep.mubr.f32.mxu0 %v10733_v36  ;;  %v10951_v22 = vld [vmem:[#allocation20_spill] sm:$0xff] }
 0x2b3   :  { %6106 = vmatprep.mubr.f32.mxu1 %v10733_v36 }
 0x2b5   :  { %5343 = vmatmul.mubr.f32.vlgmr.msra.gmra.mrb[30].mxu0 %v9380_v49 }
 0x2b6   :  { %6108 = vmatmul.mubr.f32.vlgmr.msra.gmra.mrb[30].mxu1 %v9380_v49  ;;  %7207 = vmatpush1.bf16.msra.mxu0 %v7206_v3 }
 0x2b7   :  { %7255 = vmatpush1.bf16.msra.mxu1 %v7254_v59  ;;  %7209 = vmatprep.subr.bf16.mxu0 %v7208_v23 }
 0x2b8   :  { %7257 = vmatprep.subr.bf16.mxu1 %v7256_v13  ;;  %5348 = vmatprep.mubr.f32.mxu0 %v10733_v36 }
 0x2b9   :  { %6113 = vmatprep.mubr.f32.mxu1 %v10733_v36  ;;  %5350 = vmatmul.mubr.f32.gmra.mrb[32].mxu0 %v9382_v42 }
 0x2ba   :  { %6115 = vmatmul.mubr.f32.gmra.mrb[32].mxu1 %v9382_v42  ;;  %7211 = vmatpush1.bf16.msra.mxu0 %v7210_v34 }
 0x2bb   :  { %7259 = vmatpush1.bf16.msra.mxu1 %v7258_v60  ;;  %5403 = vmatprep.subr.mxu0 %v10077_v56  ;;  %v10954_v60 = vand.u32 4294901760, %v10077_v56 }
 0x2bc   :  { %6168 = vmatprep.subr.mxu1 %v10084_v54  ;;  %5355 = vmatprep.mubr.f32.mxu0 %v10733_v36 }
 0x2bd   :  { %6120 = vmatprep.mubr.f32.mxu1 %v10733_v36  ;;  %5357 = vmatmul.mubr.f32.gmra.mrb[34].mxu0 %v9384_v26 }
 0x2be   :  { %6122 = vmatmul.mubr.f32.gmra.mrb[34].mxu1 %v9384_v26  ;;  %5406 = vmatpush1.msra.mxu0 %v10090_v44 }
 0x2bf   :  { %6171 = vmatpush1.msra.mxu1 %v10096_v2  ;;  %7213 = vmatprep.subr.bf16.mxu0 %v9929_v7 }
 0x2c0   :  { %7261 = vmatprep.subr.bf16.mxu1 %v9936_v27  ;;  %5362 = vmatprep.mubr.f32.mxu0 %v10733_v36 }
 0x2c1   :  { %6127 = vmatprep.mubr.f32.mxu1 %v10733_v36  ;;  %5364 = vmatmul.mubr.f32.gmra.mrb[36].mxu0 %v9411_v16 }
 0x2c2   :  { %6129 = vmatmul.mubr.f32.gmra.mrb[36].mxu1 %v9411_v16  ;;  %5369 = vmatprep.mubr.f32.mxu0 %v10733_v36 }
 0x2c3   :  { %6134 = vmatprep.mubr.f32.mxu1 %v10733_v36 }
 0x2c5   :  { %5371 = vmatmul.mubr.f32.gmra.mrb[38].mxu0 %v9416_v0 }
 0x2c6   :  { %6136 = vmatmul.mubr.f32.gmra.mrb[38].mxu1 %v9416_v0  ;;  %5461 = vmatprep.mubr.f32.mxu0 %v10733_v36 }
 0x2c7   :  { %6226 = vmatprep.mubr.f32.mxu1 %v10733_v36 }
 0x2c9   :  { %5464 = vmatmul.mubr.f32.vlgmr.msra.gmra.mrb[30].mxu0 %v9395_v40 }
 0x2ca   :  { %6229 = vmatmul.mubr.f32.vlgmr.msra.gmra.mrb[30].mxu1 %v9395_v40  ;;  %7215 = vmatpush1.bf16.msra.mxu0 %v9924_v6  ;;  %v10948_v40 = vld [vmem:[#allocation28_spill] sm:$0xff] }
 0x2cb   :  { %7263 = vmatpush1.bf16.msra.mxu1 %v9933_v18  ;;  %7217 = vmatprep.subr.bf16.mxu0 %v9988_v10 }
 0x2cc   :  { %7265 = vmatprep.subr.bf16.mxu1 %v9997_v63  ;;  %5469 = vmatprep.mubr.f32.mxu0 %v10733_v36 }
 0x2cd   :  { %6234 = vmatprep.mubr.f32.mxu1 %v10733_v36  ;;  %5472 = vmatmul.mubr.f32.gmra.mrb[32].mxu0 %v9400_v37 }
 0x2ce   :  { %6237 = vmatmul.mubr.f32.gmra.mrb[32].mxu1 %v9400_v37  ;;  %7219 = vmatpush1.bf16.msra.mxu0 %v9970_v48  ;;  %v10950_v37 = vld [vmem:[#allocation13_spill] sm:$0xff] }
 0x2cf   :  { %7267 = vmatpush1.bf16.msra.mxu1 %v9981_v62  ;;  %5519 = vmatprep.subr.mxu0 %v10009_v24 }
 0x2d0   :  { %6284 = vmatprep.subr.mxu1 %v10016_v33  ;;  %5477 = vmatprep.mubr.f32.mxu0 %v10733_v36 }
 0x2d1   :  { %6242 = vmatprep.mubr.f32.mxu1 %v10733_v36  ;;  %5480 = vmatmul.mubr.f32.gmra.mrb[34].mxu0 %v10913_v38 }
 0x2d2   :  { %6245 = vmatmul.mubr.f32.gmra.mrb[34].mxu1 %v10913_v38  ;;  %5521 = vmatpush1.msra.mxu0 %v10948_v40  ;;  %v10953_v38 = vld [vmem:[#allocation8_spill] sm:$0xff] }
 0x2d3   :  { %6286 = vmatpush1.msra.mxu1 %v10949_v14  ;;  %7221 = vmatprep.subr.bf16.mxu0 %v10140_v9  ;;  %v10952_v9 = vld [vmem:[#allocation32_spill] sm:$0xff] }
 0x2d4   :  { %7269 = vmatprep.subr.bf16.mxu1 %v10146_v35  ;;  %5485 = vmatprep.mubr.f32.mxu0 %v10733_v36 }
 0x2d5   :  { %6250 = vmatprep.mubr.f32.mxu1 %v10733_v36  ;;  %5488 = vmatmul.mubr.f32.gmra.mrb[36].mxu0 %v10950_v37 }
 0x2d6   :  { %6253 = vmatmul.mubr.f32.gmra.mrb[36].mxu1 %v10950_v37  ;;  %5493 = vmatprep.mubr.f32.mxu0 %v10733_v36 }
 0x2d7   :  { %6258 = vmatprep.mubr.f32.mxu1 %v10733_v36 }
 0x2d9   :  { %5496 = vmatmul.mubr.f32.gmra.mrb[38].mxu0 %v10951_v22 }
 0x2da   :  { %6261 = vmatmul.mubr.f32.gmra.mrb[38].mxu1 %v10951_v22  ;;  %5576 = vmatprep.mubr.f32.mxu0 %v10733_v36 }
 0x2db   :  { %6341 = vmatprep.mubr.f32.mxu1 %v10733_v36 }
 0x2dd   :  { %5580 = vmatmul.mubr.f32.vlgmr.msra.gmra.mrb[30].mxu0 %v10952_v9 }
 0x2de   :  { %6345 = vmatmul.mubr.f32.vlgmr.msra.gmra.mrb[30].mxu1 %v10952_v9  ;;  %7223 = vmatpush1.bf16.msra.mxu0 %v10153_v12  ;;  %v10960_v12 = vld [vmem:[#allocation44_spill] sm:$0xff] }
 0x2df   :  { %7271 = vmatpush1.bf16.msra.mxu1 %v10159_v28  ;;  %7225 = vmatprep.subr.bf16.mxu0 %v10165_v45 }
 0x2e0   :  { %7273 = vmatprep.subr.bf16.mxu1 %v10172_v39  ;;  %5585 = vmatprep.mubr.f32.mxu0 %v10733_v36 }
 0x2e1   :  { %6350 = vmatprep.mubr.f32.mxu1 %v10733_v36  ;;  %5589 = vmatmul.mubr.f32.gmra.mrb[32].mxu0 %v10953_v38 }
 0x2e2   :  { %6354 = vmatmul.mubr.f32.gmra.mrb[32].mxu1 %v10953_v38  ;;  %7227 = vmatpush1.bf16.msra.mxu0 %v10178_v41 }
 0x2e3   :  { %7275 = vmatpush1.bf16.msra.mxu1 %v10184_v4  ;;  %5657 = vmatprep.subr.mxu0 %v10954_v60 }
 0x2e4   :  { %6422 = vmatprep.subr.mxu1 %v10955_v20  ;;  %5594 = vmatprep.mubr.f32.mxu0 %v10733_v36 }
 0x2e5   :  { %6359 = vmatprep.mubr.f32.mxu1 %v10733_v36  ;;  %5598 = vmatmul.mubr.f32.gmra.mrb[34].mxu0 %v10956_v21 }
 0x2e6   :  { %6363 = vmatmul.mubr.f32.gmra.mrb[34].mxu1 %v10956_v21  ;;  %5661 = vmatpush1.msra.mxu0 %v10957_v15 }
 0x2e7   :  { %6426 = vmatpush1.msra.mxu1 %v10958_v53  ;;  %7229 = vmatprep.subr.bf16.mxu0 %v9929_v7 }
 0x2e8   :  { %7277 = vmatprep.subr.bf16.mxu1 %v9936_v27  ;;  %5603 = vmatprep.mubr.f32.mxu0 %v10733_v36 }
 0x2e9   :  { %6368 = vmatprep.mubr.f32.mxu1 %v10733_v36  ;;  %5607 = vmatmul.mubr.f32.gmra.mrb[36].mxu0 %v10959_v11 }
 0x2ea   :  { %6372 = vmatmul.mubr.f32.gmra.mrb[36].mxu1 %v10959_v11  ;;  %5612 = vmatprep.mubr.f32.mxu0 %v10733_v36 }
 0x2eb   :  { %6377 = vmatprep.mubr.f32.mxu1 %v10733_v36 }
 0x2ed   :  { %5616 = vmatmul.mubr.f32.gmra.mrb[38].mxu0 %v10960_v12 }
 0x2ee   :  { %6381 = vmatmul.mubr.f32.gmra.mrb[38].mxu1 %v10960_v12  ;;  %5716 = vmatprep.mubr.f32.mxu0 %v10733_v36 }
 0x2ef   :  { %6481 = vmatprep.mubr.f32.mxu1 %v10733_v36 }
 0x2f1   :  { %5718 = vmatmul.mubr.f32.vlgmr.msra.gmra.mrb[30].mxu0 %v9380_v49 }
 0x2f2   :  { %6483 = vmatmul.mubr.f32.vlgmr.msra.gmra.mrb[30].mxu1 %v9380_v49  ;;  %7231 = vmatpush1.bf16.msra.mxu0 %v9924_v6 }
 0x2f3   :  { %7279 = vmatpush1.bf16.msra.mxu1 %v9933_v18  ;;  %7233 = vmatprep.subr.bf16.mxu0 %v9988_v10 }
 0x2f4   :  { %7281 = vmatprep.subr.bf16.mxu1 %v9997_v63  ;;  %5723 = vmatprep.mubr.f32.mxu0 %v10733_v36 }
 0x2f5   :  { %6488 = vmatprep.mubr.f32.mxu1 %v10733_v36  ;;  %5725 = vmatmul.mubr.f32.gmra.mrb[32].mxu0 %v9382_v42 }
 0x2f6   :  { %6490 = vmatmul.mubr.f32.gmra.mrb[32].mxu1 %v9382_v42  ;;  %7235 = vmatpush1.bf16.msra.mxu0 %v9970_v48 }
 0x2f7   :  { %7283 = vmatpush1.bf16.msra.mxu1 %v9981_v62  ;;  %5769 = vmatprep.subr.mxu0 %v10009_v24 }
 0x2f8   :  { %6534 = vmatprep.subr.mxu1 %v10016_v33  ;;  %5730 = vmatprep.mubr.f32.mxu0 %v10733_v36 }
 0x2f9   :  { %6495 = vmatprep.mubr.f32.mxu1 %v10733_v36  ;;  %5732 = vmatmul.mubr.f32.gmra.mrb[34].mxu0 %v9384_v26 }
 0x2fa   :  { %6497 = vmatmul.mubr.f32.gmra.mrb[34].mxu1 %v9384_v26  ;;  %5771 = vmatpush1.msra.mxu0 %v10948_v40 }
 0x2fb   :  { %6536 = vmatpush1.msra.mxu1 %v10949_v14  ;;  %5737 = vmatprep.mubr.f32.mxu0 %v10733_v36 }
 0x2fc   :  { %6502 = vmatprep.mubr.f32.mxu1 %v10733_v36 }
 0x2fd   :  { %5739 = vmatmul.mubr.f32.gmra.mrb[36].mxu0 %v9411_v16 }
 0x2fe   :  { %6504 = vmatmul.mubr.f32.gmra.mrb[36].mxu1 %v9411_v16  ;;  %5744 = vmatprep.mubr.f32.mxu0 %v10733_v36 }
 0x2ff   :  { %6509 = vmatprep.mubr.f32.mxu1 %v10733_v36 }
 0x301   :  { %5746 = vmatmul.mubr.f32.gmra.mrb[38].mxu0 %v9416_v0 }
 0x302   :  { %6511 = vmatmul.mubr.f32.gmra.mrb[38].mxu1 %v9416_v0  ;;  %5826 = vmatprep.mubr.f32.mxu0 %v10733_v36 }
 0x303   :  { %6591 = vmatprep.mubr.f32.mxu1 %v10733_v36 }
 0x305   :  { %5828 = vmatmul.mubr.f32.vlgmr.msra.gmra.mrb[30].mxu0 %v9380_v49 }
 0x306   :  { %6593 = vmatmul.mubr.f32.vlgmr.msra.gmra.mrb[30].mxu1 %v9380_v49  ;;  %5833 = vmatprep.mubr.f32.mxu0 %v10733_v36  ;;  %v10337_v49 = vpop.permute.xlu1 %3533 }
 0x307   :  { %6598 = vmatprep.mubr.f32.mxu1 %v10733_v36 }
 0x309   :  { %5835 = vmatmul.mubr.f32.gmra.mrb[32].mxu0 %v9382_v42 }
 0x30a   :  { %6600 = vmatmul.mubr.f32.gmra.mrb[32].mxu1 %v9382_v42  ;;  %5840 = vmatprep.mubr.f32.mxu0 %v10733_v36  ;;  %v10340_v7 = vpop.permute.xlu1 %3541 }
 0x30b   :  { %6605 = vmatprep.mubr.f32.mxu1 %v10733_v36 }
 0x30d   :  { %5842 = vmatmul.mubr.f32.gmra.mrb[34].mxu0 %v9384_v26 }
 0x30e   :  { %6607 = vmatmul.mubr.f32.gmra.mrb[34].mxu1 %v9384_v26  ;;  %5847 = vmatprep.mubr.f32.mxu0 %v10733_v36  ;;  %v10350_v58 = vpop.permute.xlu1 %3545 }
 0x30f   :  { %6612 = vmatprep.mubr.f32.mxu1 %v10733_v36 }
 0x311   :  { %5849 = vmatmul.mubr.f32.gmra.mrb[36].mxu0 %v9411_v16 }
 0x312   :  { %6614 = vmatmul.mubr.f32.gmra.mrb[36].mxu1 %v9411_v16  ;;  %5854 = vmatprep.mubr.f32.mxu0 %v10733_v36  ;;  %v10343_v16 = vpop.permute.xlu0 %3537  ;;  %v10359_v34 = vpop.permute.xlu1 %6674 }
 0x313   :  { %6619 = vmatprep.mubr.f32.mxu1 %v10733_v36 }
 0x315   :  { %5856 = vmatmul.mubr.f32.gmra.mrb[38].mxu0 %v9416_v0 }
 0x316   :  { %6621 = vmatmul.mubr.f32.gmra.mrb[38].mxu1 %v9416_v0  ;;  %v10353_v44 = vpop.permute.xlu0 %3549  ;;  %v10369_v41 = vpop.permute.xlu1 %6684 }
 0x31a   :  { %v10364_v32 = vpop.permute.xlu0 %6679 }
 0x35e   :  { %v5064_v42 = vpop.f32.mrb[20].mxu1 }
 0x35f   :  { %v7334_v26 = vadd.f32 %v5064_v42, %v10337_v49  ;;  %v5066_v6 = vpop.f32.mrb[21].mxu1 }
 0x360   :  { %v4299_v18 = vpop.f32.mrb[20].mxu0  ;;  %v7335_v27 = vadd.f32 %v5066_v6, %v10337_v49 }
 0x361   :  { %v7324_v48 = vadd.f32 %v4299_v18, %v10337_v49  ;;  %7944 = vtanh.f32 %v7334_v26  ;;  %v4301_v36 = vpop.f32.mrb[21].mxu0 }
 0x362   :  { %v7325_v62 = vadd.f32 %v4301_v36, %v10337_v49  ;;  %7946 = vtanh.f32 %v7335_v27  ;;  %v5071_v0 = vpop.f32.mrb[22].mxu1 }
 0x363   :  { %7948 = vtanh.f32 %v7324_v48  ;;  %v7336_v10 = vadd.f32 %v5071_v0, %v10343_v16  ;;  %v5073_v63 = vpop.f32.mrb[23].mxu1 }
 0x364   :  { %7950 = vtanh.f32 %v7325_v62  ;;  %v4306_v50 = vpop.f32.mrb[22].mxu0  ;;  %v7337_v35 = vadd.f32 %v5073_v63, %v10343_v16 }
 0x365   :  { %v7326_v24 = vadd.f32 %v4306_v50, %v10343_v16  ;;  %7952 = vtanh.f32 %v7336_v10  ;;  %v4308_v33 = vpop.f32.mrb[23].mxu0  ;;  %v10383_v10 = vpop.permute.xlu1 %6689 }
 0x366   :  { %v7327_v56 = vadd.f32 %v4308_v33, %v10343_v16  ;;  %7954 = vtanh.f32 %v7337_v35  ;;  %v5078_v54 = vpop.f32.mrb[24].mxu1 }
 0x367   :  { %7956 = vtanh.f32 %v7326_v24  ;;  %v7338_v2 = vadd.f32 %v5078_v54, %v10340_v7  ;;  %v5080_v31 = vpop.f32.mrb[25].mxu1 }
 0x368   :  { %7958 = vtanh.f32 %v7327_v56  ;;  %v4313_v30 = vpop.f32.mrb[24].mxu0  ;;  %v7339_v3 = vadd.f32 %v5080_v31, %v10340_v7 }
 0x369   :  { %v7328_v47 = vadd.f32 %v4313_v30, %v10340_v7  ;;  %v4315_v57 = vpop.f32.mrb[25].mxu0  ;;  %7960 = vtanh.f32 %v7338_v2 }
 0x36a   :  { %v7329_v59 = vadd.f32 %v4315_v57, %v10340_v7  ;;  %v5085_v13 = vpop.f32.mrb[26].mxu1  ;;  %v10389_v57 = vpop.permute.xlu0 %6694 }
 0x36b   :  { %v7945_v23 = vpop.eup %7944  ;;  %7962 = vtanh.f32 %v7328_v47  ;;  %v7340_v51 = vadd.f32 %v5085_v13, %v10350_v58  ;;  %v5087_v5 = vpop.f32.mrb[27].mxu1 }
 0x36c   :  { %v7947_v46 = vpop.eup %7946  ;;  %7964 = vtanh.f32 %v7329_v59  ;;  %v4320_v25 = vpop.f32.mrb[26].mxu0  ;;  %v7341_v52 = vadd.f32 %v5087_v5, %v10350_v58  ;;  %v6699_v39 = vmul.f32 %v7945_v23, %v10359_v34 }
 0x36d   :  { %v7949_v29 = vpop.eup %7948  ;;  %7966 = vtanh.f32 %v7339_v3  ;;  %v7330_v19 = vadd.f32 %v4320_v25, %v10350_v58  ;;  %v4322_v28 = vpop.f32.mrb[27].mxu0  ;;  %v6700_v55 = vmul.f32 %v7947_v46, %v10359_v34 }
 0x36e   :  { %v7951_v45 = vpop.eup %7950  ;;  %7968 = vtanh.f32 %v7340_v51  ;;  %v7331_v17 = vadd.f32 %v4322_v28, %v10350_v58  ;;  %v5092_v1 = vpop.f32.mrb[28].mxu1  ;;  %v6697_v43 = vmul.f32 %v7949_v29, %v10359_v34 }
 0x36f   :  { %v7953_v61 = vpop.eup %7952  ;;  %7970 = vtanh.f32 %v7330_v19  ;;  %v7342_v40 = vadd.f32 %v5092_v1, %v10353_v44  ;;  %v5094_v37 = vpop.f32.mrb[29].mxu1  ;;  %v6698_v12 = vmul.f32 %v7951_v45, %v10359_v34 }
 0x370   :  { %v7955_v8 = vpop.eup %7954  ;;  %7972 = vtanh.f32 %v7331_v17  ;;  %v4327_v4 = vpop.f32.mrb[28].mxu0  ;;  %v6707_v14 = vmul.f32 %v7953_v61, %v10364_v32  ;;  %v7343_v20 = vadd.f32 %v5094_v37, %v10353_v44 }
 0x371   :  { %v7957_v22 = vpop.eup %7956  ;;  %7974 = vtanh.f32 %v7341_v52  ;;  %v7332_v9 = vadd.f32 %v4327_v4, %v10353_v44  ;;  %v6708_v38 = vmul.f32 %v7955_v8, %v10364_v32  ;;  %v4329_v60 = vpop.f32.mrb[29].mxu0 }
 0x372   :  { %v7959_v21 = vpop.eup %7958  ;;  %7976 = vtanh.f32 %v7342_v40  ;;  %v6705_v15 = vmul.f32 %v7957_v22, %v10364_v32  ;;  %v6757_v53 = vadd.f32 %v6707_v14, %v6699_v39  ;;  %v7333_v11 = vadd.f32 %v4329_v60, %v10353_v44 }
 0x373   :  { %7978 = vtanh.f32 %v7332_v9  ;;  %v6706_v42 = vmul.f32 %v7959_v21, %v10364_v32  ;;  %v6767_v26 = vadd.f32 %v6708_v38, %v6700_v55  ;;  %v7961_v6 = vpop.eup %7960 }
 0x374   :  { %v6737_v18 = vadd.f32 %v6705_v15, %v6697_v43  ;;  %7980 = vtanh.f32 %v7333_v11  ;;  %v6715_v36 = vmul.f32 %v7961_v6, %v10369_v41  ;;  %v8034_v15 = vmov 1966171168  }
 0x375   :  { %v7963_v27 = vpop.eup %7962  ;;  %v6747_v48 = vadd.f32 %v6706_v42, %v6698_v12  ;;  %7982 = vtanh.f32 %v7343_v20 }
 0x376   :  { %v7965_v62 = vpop.eup %7964  ;;  %v6713_v0 = vmul.f32 %v7963_v27, %v10369_v41  ;;  %v6758_v35 = vadd.f32 %v6757_v53, %v6715_v36  ;;  %v6844_v53 = vunpack.c.l.s4 %v8034_v15 }
 0x377   :  { %v7967_v63 = vpop.eup %7966  ;;  %v6714_v50 = vmul.f32 %v7965_v62, %v10369_v41  ;;  %v10397_v62 = vpop.permute.xlu1 %6820 }
 0x378   :  { %v7969_v24 = vpop.eup %7968  ;;  %v6716_v33 = vmul.f32 %v7967_v63, %v10369_v41  ;;  %v6738_v56 = vadd.f32 %v6737_v18, %v6713_v0  ;;  %v6845_v36 = vunpack.c.0.s8 %v6844_v53 }
 0x379   :  { %v7971_v54 = vpop.eup %7970  ;;  %v6723_v30 = vmul.f32 %v7969_v24, %v10383_v10  ;;  %v6748_v2 = vadd.f32 %v6747_v48, %v6714_v50 }
 0x37a   :  { %v7973_v31 = vpop.eup %7972  ;;  %v6721_v47 = vmul.f32 %v7971_v54, %v10383_v10  ;;  %v6768_v3 = vadd.f32 %v6767_v26, %v6716_v33 }
 0x37b   :  { %v7975_v59 = vpop.eup %7974  ;;  %v6722_v23 = vmul.f32 %v7973_v31, %v10383_v10  ;;  %v6759_v13 = vadd.f32 %v6758_v35, %v6723_v30  ;;  %v10961_v30 = vld [vmem:[#allocation5_spill] sm:$0xff] }
 0x37c   :  { %v7977_v46 = vpop.eup %7976  ;;  %v6724_v25 = vmul.f32 %v7975_v59, %v10383_v10  ;;  %v6739_v51 = vadd.f32 %v6738_v56, %v6721_v47 }
 0x37d   :  { %v7979_v5 = vpop.eup %7978  ;;  %v6731_v29 = vmul.f32 %v7977_v46, %v10389_v57  ;;  %v6749_v19 = vadd.f32 %v6748_v2, %v6722_v23  ;;  %v10402_v2 = vsub.s32 %v6845_v36, %v10961_v30 }
 0x37e   :  { %v7981_v28 = vpop.eup %7980  ;;  %v6729_v52 = vmul.f32 %v7979_v5, %v10389_v57  ;;  %v6769_v45 = vadd.f32 %v6768_v3, %v6724_v25 }
 0x37f   :  { %v7983_v17 = vpop.eup %7982  ;;  %v6730_v61 = vmul.f32 %v7981_v28, %v10389_v57  ;;  %v6760_v39 = vadd.f32 %v6759_v13, %v6731_v29 }
 0x380   :  { %v6732_v55 = vmul.f32 %v7983_v17, %v10389_v57  ;;  %v6740_v1 = vadd.f32 %v6739_v51, %v6729_v52 }
 0x381   :  { %v6750_v8 = vadd.f32 %v6749_v19, %v6730_v61  ;;  %v6761_v43 = vrot.slane %v6760_v39, 4 }
 0x382   :  { %v6741_v4 = vrot.slane %v6740_v1, 4  ;;  %v6770_v40 = vadd.f32 %v6769_v45, %v6732_v55 }
 0x383   :  { %v6751_v14 = vrot.slane %v6750_v8, 4  ;;  %v6762_v37 = vadd.f32 %v6761_v43, %v6760_v39 }
 0x384   :  { %v6742_v22 = vadd.f32 %v6741_v4, %v6740_v1  ;;  %v6771_v9 = vrot.slane %v6770_v40, 4 }
 0x385   :  { %v6752_v38 = vadd.f32 %v6751_v14, %v6750_v8  ;;  %v6763_v60 = vrot.slane %v6762_v37, 2 }
 0x386   :  { %v6772_v20 = vadd.f32 %v6771_v9, %v6770_v40  ;;  %v6743_v21 = vrot.slane %v6742_v22, 2 }
 0x387   :  { %v6753_v11 = vrot.slane %v6752_v38, 2  ;;  %v6764_v12 = vadd.f32 %v6763_v60, %v6762_v37 }
 0x388   :  { %v6744_v42 = vadd.f32 %v6743_v21, %v6742_v22  ;;  %v6773_v26 = vrot.slane %v6772_v20, 2 }
 0x389   :  { %v6754_v6 = vadd.f32 %v6753_v11, %v6752_v38  ;;  %v6765_v18 = vrot.slane %v6764_v12, 1 }
 0x38a   :  { %v6745_v27 = vrot.slane %v6744_v42, 1  ;;  %v6774_v48 = vadd.f32 %v6773_v26, %v6772_v20 }
 0x38b   :  { %v6755_v0 = vrot.slane %v6754_v6, 1  ;;  %v6766_v63 = vadd.f32 %v6765_v18, %v6764_v12 }
 0x38c   :  { %v6746_v50 = vadd.f32 %v6745_v27, %v6744_v42  ;;  %v6775_v35 = vrot.slane %v6774_v48, 1 }
 0x38d   :  { %v6756_v24 = vadd.f32 %v6755_v0, %v6754_v6  ;;  %v6825_v54 = vadd.f32 %v10397_v62, %v6766_v63 }
 0x38e   :  { %v6776_v33 = vadd.f32 %v6775_v35, %v6774_v48  ;;  %v6823_v56 = vadd.f32 %v10397_v62, %v6746_v50 }
 0x38f   :  { %v6824_v31 = vadd.f32 %v10397_v62, %v6756_v24 }
 0x390   :  { %v6826_v47 = vadd.f32 %v10397_v62, %v6776_v33 }
 0x391   :  { %v6839_v3 = vcombine.low %v6823_v56, %v6824_v31 }
 0x392   :  { %v6840_v59 = vcombine.low %v6825_v54, %v6826_v47 }
 0x393   :  { %v10407_v23 = vrot.slane %v6839_v3, %v10402_v2 }
 0x394   :  { %v10410_v13 = vrot.slane %v6840_v59, %v10402_v2 }
 0x396   :  { %v6871_v46 = vcombine.low %v10407_v23, %v10410_v13 }
 0x3d8   :  { %v5829_v25 = vpop.f32.mrb[30].mxu0 }
 0x3d9   :  { %v6594_v51 = vpop.f32.mrb[30].mxu1  ;;  %v7344_v5 = vadd.f32 %v5829_v25, %v10337_v49  ;;  %v5831_v19 = vpop.f32.mrb[31].mxu0 }
 0x3da   :  { %v7354_v29 = vadd.f32 %v6594_v51, %v10337_v49  ;;  %v6596_v28 = vpop.f32.mrb[31].mxu1  ;;  %v7345_v52 = vadd.f32 %v5831_v19, %v10337_v49 }
 0x3db   :  { %v7355_v45 = vadd.f32 %v6596_v28, %v10337_v49  ;;  %7984 = vtanh.f32 %v7344_v5 }
 0x3dc   :  { %7986 = vtanh.f32 %v7354_v29  ;;  %v5836_v17 = vpop.f32.mrb[32].mxu0 }
 0x3dd   :  { %v6601_v61 = vpop.f32.mrb[32].mxu1  ;;  %7988 = vtanh.f32 %v7345_v52  ;;  %v7346_v39 = vadd.f32 %v5836_v17, %v10343_v16  ;;  %v5838_v1 = vpop.f32.mrb[33].mxu0 }
 0x3de   :  { %v7356_v55 = vadd.f32 %v6601_v61, %v10343_v16  ;;  %v6603_v8 = vpop.f32.mrb[33].mxu1  ;;  %7990 = vtanh.f32 %v7355_v45  ;;  %v7347_v43 = vadd.f32 %v5838_v1, %v10343_v16 }
 0x3df   :  { %v7357_v4 = vadd.f32 %v6603_v8, %v10343_v16  ;;  %7992 = vtanh.f32 %v7346_v39 }
 0x3e0   :  { %7994 = vtanh.f32 %v7356_v55  ;;  %v5843_v40 = vpop.f32.mrb[34].mxu0 }
 0x3e1   :  { %v6608_v49 = vpop.f32.mrb[34].mxu1  ;;  %7996 = vtanh.f32 %v7347_v43  ;;  %v7348_v14 = vadd.f32 %v5843_v40, %v10340_v7  ;;  %v5845_v22 = vpop.f32.mrb[35].mxu0 }
 0x3e2   :  { %v7358_v37 = vadd.f32 %v6608_v49, %v10340_v7  ;;  %v6610_v9 = vpop.f32.mrb[35].mxu1  ;;  %7998 = vtanh.f32 %v7357_v4  ;;  %v7349_v38 = vadd.f32 %v5845_v22, %v10340_v7 }
 0x3e3   :  { %v7359_v60 = vadd.f32 %v6610_v9, %v10340_v7  ;;  %8000 = vtanh.f32 %v7348_v14 }
 0x3e4   :  { %8002 = vtanh.f32 %v7358_v37  ;;  %v5850_v20 = vpop.f32.mrb[36].mxu0 }
 0x3e5   :  { %v6615_v16 = vpop.f32.mrb[36].mxu1  ;;  %v7985_v21 = vpop.eup %7984  ;;  %8004 = vtanh.f32 %v7349_v38  ;;  %v7350_v15 = vadd.f32 %v5850_v20, %v10350_v58 }
 0x3e6   :  { %v7360_v53 = vadd.f32 %v6615_v16, %v10350_v58  ;;  %v5852_v11 = vpop.f32.mrb[37].mxu0  ;;  %v6617_v12 = vpop.f32.mrb[37].mxu1  ;;  %8006 = vtanh.f32 %v7359_v60  ;;  %v6701_v0 = vmul.f32 %v7985_v21, %v10359_v34 }
 0x3e7   :  { %v7987_v42 = vpop.eup %7986  ;;  %v7351_v26 = vadd.f32 %v5852_v11, %v10350_v58  ;;  %v7361_v6 = vadd.f32 %v6617_v12, %v10350_v58  ;;  %8008 = vtanh.f32 %v7350_v15 }
 0x3e8   :  { %v7989_v18 = vpop.eup %7988  ;;  %8010 = vtanh.f32 %v7360_v53  ;;  %v5857_v27 = vpop.f32.mrb[38].mxu0  ;;  %v6703_v31 = vmul.f32 %v7987_v42, %v10359_v34 }
 0x3e9   :  { %v7991_v7 = vpop.eup %7990  ;;  %v6622_v48 = vpop.f32.mrb[38].mxu1  ;;  %8012 = vtanh.f32 %v7351_v26  ;;  %v7352_v63 = vadd.f32 %v5857_v27, %v10353_v44  ;;  %v6702_v59 = vmul.f32 %v7989_v18, %v10359_v34 }
 0x3ea   :  { %v7993_v36 = vpop.eup %7992  ;;  %v7362_v50 = vadd.f32 %v6622_v48, %v10353_v44  ;;  %v5859_v35 = vpop.f32.mrb[39].mxu0  ;;  %8014 = vtanh.f32 %v7361_v6  ;;  %v6704_v29 = vmul.f32 %v7991_v7, %v10359_v34 }
 0x3eb   :  { %v6624_v24 = vpop.f32.mrb[39].mxu1  ;;  %v7995_v33 = vpop.eup %7994  ;;  %v6709_v56 = vmul.f32 %v7993_v36, %v10364_v32  ;;  %v7353_v58 = vadd.f32 %v5859_v35, %v10353_v44  ;;  %8016 = vtanh.f32 %v7352_v63 }
 0x3ec   :  { %v7363_v54 = vadd.f32 %v6624_v24, %v10353_v44  ;;  %v7997_v30 = vpop.eup %7996  ;;  %v6711_v47 = vmul.f32 %v7995_v33, %v10364_v32  ;;  %8018 = vtanh.f32 %v7362_v50 }
 0x3ed   :  { %v7999_v3 = vpop.eup %7998  ;;  %v6777_v25 = vadd.f32 %v6709_v56, %v6701_v0  ;;  %v6710_v51 = vmul.f32 %v7997_v30, %v10364_v32  ;;  %8020 = vtanh.f32 %v7353_v58 }
 0x3ee   :  { %v8001_v5 = vpop.eup %8000  ;;  %v6797_v19 = vadd.f32 %v6711_v47, %v6703_v31  ;;  %v6712_v28 = vmul.f32 %v7999_v3, %v10364_v32  ;;  %8022 = vtanh.f32 %v7363_v54 }
 0x3ef   :  { %v8003_v44 = vpop.eup %8002  ;;  %v6787_v52 = vadd.f32 %v6710_v51, %v6702_v59  ;;  %v6717_v45 = vmul.f32 %v8001_v5, %v10369_v41 }
 0x3f0   :  { %v8005_v17 = vpop.eup %8004  ;;  %v6807_v61 = vadd.f32 %v6712_v28, %v6704_v29  ;;  %v6719_v39 = vmul.f32 %v8003_v44, %v10369_v41 }
 0x3f1   :  { %v8007_v55 = vpop.eup %8006  ;;  %v6778_v1 = vadd.f32 %v6777_v25, %v6717_v45  ;;  %v6718_v8 = vmul.f32 %v8005_v17, %v10369_v41 }
 0x3f2   :  { %v8009_v43 = vpop.eup %8008  ;;  %v6798_v4 = vadd.f32 %v6797_v19, %v6719_v39  ;;  %v6720_v34 = vmul.f32 %v8007_v55, %v10369_v41 }
 0x3f3   :  { %v8011_v40 = vpop.eup %8010  ;;  %v6788_v32 = vadd.f32 %v6787_v52, %v6718_v8  ;;  %v6725_v49 = vmul.f32 %v8009_v43, %v10383_v10 }
 0x3f4   :  { %v8013_v14 = vpop.eup %8012  ;;  %v6808_v37 = vadd.f32 %v6807_v61, %v6720_v34  ;;  %v6727_v22 = vmul.f32 %v8011_v40, %v10383_v10  ;;  %v6879_v34 = vrot.slane %v6871_v46, %v10402_v2 }
 0x3f5   :  { %v8015_v9 = vpop.eup %8014  ;;  %v6779_v38 = vadd.f32 %v6778_v1, %v6725_v49  ;;  %v6726_v60 = vmul.f32 %v8013_v14, %v10383_v10 }
 0x3f6   :  { %v8017_v20 = vpop.eup %8016  ;;  %v6799_v16 = vadd.f32 %v6798_v4, %v6727_v22  ;;  %v6728_v21 = vmul.f32 %v8015_v9, %v10383_v10 }
 0x3f7   :  { %v8019_v15 = vpop.eup %8018  ;;  %v6789_v53 = vadd.f32 %v6788_v32, %v6726_v60  ;;  %v6733_v41 = vmul.f32 %v8017_v20, %v10389_v57 }
 0x3f8   :  { %v8021_v11 = vpop.eup %8020  ;;  %v6809_v12 = vadd.f32 %v6808_v37, %v6728_v21  ;;  %v6735_v42 = vmul.f32 %v8019_v15, %v10389_v57 }
 0x3f9   :  { %v8023_v26 = vpop.eup %8022  ;;  %v6780_v6 = vadd.f32 %v6779_v38, %v6733_v41  ;;  %v6734_v18 = vmul.f32 %v8021_v11, %v10389_v57 }
 0x3fa   :  { %v6800_v7 = vadd.f32 %v6799_v16, %v6735_v42  ;;  %v6736_v27 = vmul.f32 %v8023_v26, %v10389_v57 }
 0x3fb   :  { %v6781_v48 = vrot.slane %v6780_v6, 4  ;;  %v6790_v36 = vadd.f32 %v6789_v53, %v6734_v18 }
 0x3fc   :  { %v6801_v0 = vrot.slane %v6800_v7, 4  ;;  %v6810_v63 = vadd.f32 %v6809_v12, %v6736_v27 }
 0x3fd   :  { %v6782_v10 = vadd.f32 %v6781_v48, %v6780_v6  ;;  %v6791_v50 = vrot.slane %v6790_v36, 4 }
 0x3fe   :  { %v6802_v35 = vadd.f32 %v6801_v0, %v6800_v7  ;;  %v6811_v24 = vrot.slane %v6810_v63, 4 }
 0x3ff   :  { %v6783_v33 = vrot.slane %v6782_v10, 2  ;;  %v6792_v56 = vadd.f32 %v6791_v50, %v6790_v36 }
 0x400   :  { %v6803_v58 = vrot.slane %v6802_v35, 2  ;;  %v6812_v54 = vadd.f32 %v6811_v24, %v6810_v63 }
 0x401   :  { %v6784_v30 = vadd.f32 %v6783_v33, %v6782_v10  ;;  %v6793_v31 = vrot.slane %v6792_v56, 2 }
 0x402   :  { %v6804_v47 = vadd.f32 %v6803_v58, %v6802_v35  ;;  %v6813_v3 = vrot.slane %v6812_v54, 2 }
 0x403   :  { %v6785_v59 = vrot.slane %v6784_v30, 1  ;;  %v6794_v25 = vadd.f32 %v6793_v31, %v6792_v56 }
 0x404   :  { %v6805_v51 = vrot.slane %v6804_v47, 1  ;;  %v6814_v57 = vadd.f32 %v6813_v3, %v6812_v54 }
 0x405   :  { %v6786_v5 = vadd.f32 %v6785_v59, %v6784_v30  ;;  %v6795_v29 = vrot.slane %v6794_v25, 1 }
 0x406   :  { %v6806_v19 = vadd.f32 %v6805_v51, %v6804_v47  ;;  %v6815_v28 = vrot.slane %v6814_v57, 1 }
 0x407   :  { %v6827_v44 = vadd.f32 %v10397_v62, %v6786_v5  ;;  %v6796_v52 = vadd.f32 %v6795_v29, %v6794_v25 }
 0x408   :  { %v6829_v45 = vadd.f32 %v10397_v62, %v6806_v19  ;;  %v6816_v17 = vadd.f32 %v6815_v28, %v6814_v57 }
 0x409   :  { %v6828_v61 = vadd.f32 %v10397_v62, %v6796_v52 }
 0x40a   :  { %v6830_v39 = vadd.f32 %v10397_v62, %v6816_v17 }
 0x40b   :  { %v6841_v55 = vcombine.low %v6827_v44, %v6828_v61 }
 0x40c   :  { %v6842_v1 = vcombine.low %v6829_v45, %v6830_v39 }
 0x40d   :  { %v6863_v8 = vrot.slane %v6841_v55, %v10402_v2 }
 0x40e   :  { %v6870_v43 = vrot.slane %v6842_v1, %v10402_v2 }
 0x410   :  { %v6872_v4 = vcombine.low %v6863_v8, %v6870_v43 }
 0x412   :  { %v6886_v40 = vrot.slane %v6872_v4, %v10402_v2 }
 0x414   :  { %v6887_v32 = vcombine.low %v6879_v34, %v6886_v40 }
 0x416   :  { %6889 = vst [vmem:[%s10473_s5] sm:$0xff] %v6887_v32 }

</bundles_post_ra>
